<compile_context>
chip_gen: v5e
topology: v5e:2x2
jax: 0.10.0
libtpu: 0.0.40
codegen_flags: <defaults>
</compile_context>

<pallas_src>
import math
from functools import partial

import jax
import jax.numpy as jnp
from jax.experimental import pallas as pl
from jax.experimental.pallas import tpu as pltpu  # noqa: F401  (kept for TPU-specific tuning hooks)

# ---- model hyper-parameters (mirrors the PyTorch config, small synthetic sizes) ----
VOCAB_SIZE = 50
D_MODEL = 32
N_HEADS = 4
NUM_LAYERS = 2
NUM_CLASSES = 3
NUM_DOMAIN_LABELS = 2
MAX_LENGTH = 16
PAD_IDX = 0
LN_EPS = 1e-6
NEG_INF = -1e30


def _layer_norm(x, gamma, beta, eps=LN_EPS):
    mu = jnp.mean(x, axis=-1, keepdims=True)
    var = jnp.mean(jnp.square(x - mu), axis=-1, keepdims=True)
    return (x - mu) * jax.lax.rsqrt(var + eps) * gamma + beta


# ---------------------- fused forward Pallas kernel ----------------------
def fused_forward_kernel(x_ref, bias_ref,
                         wqkv_ref, bqkv_ref, wo_ref, bo_ref,
                         g1_ref, be1_ref, g2_ref, be2_ref,
                         w1_ref, b1_ref, w2_ref, b2_ref,
                         fg_ref, fb_ref, wc_ref, bc_ref,
                         o_ref, *, num_layers, h, B, L):
    D = x_ref.shape[1]
    dk = D // h
    scale = 1.0 / math.sqrt(dk)
    bf16 = jnp.bfloat16

    x = x_ref[...]                      # (B*L, D) f32, resident for the whole forward
    bias = bias_ref[...]                # (B, L)  f32 additive key mask (0 / -1e30)

    for layer in range(num_layers):
        wqkv = wqkv_ref[layer]          # (D, 3D) bf16
        wo = wo_ref[layer]              # (D, D)  bf16
        w1 = w1_ref[layer]              # (D, 4D) bf16
        w2 = w2_ref[layer]              # (4D, D) bf16

        # --- sublayer 0: pre-LN multi-head self-attention + residual ---
        xn = _layer_norm(x, g1_ref[layer], be1_ref[layer])
        qkv = jnp.dot(xn.astype(bf16), wqkv,
                      preferred_element_type=jnp.float32) + bqkv_ref[layer]   # (B*L, 3D)

        rows = []
        for b in range(B):
            qkv_b = qkv[b * L:(b + 1) * L]          # (L, 3D)
            bias_b = bias[b:b + 1, :]               # (1, L) broadcast over query rows
            acc = jnp.zeros((L, D), jnp.float32)
            for i in range(h):
                qh = qkv_b[:, i * dk:(i + 1) * dk].astype(bf16)
                kh = qkv_b[:, D + i * dk:D + (i + 1) * dk].astype(bf16)
                vh = qkv_b[:, 2 * D + i * dk:2 * D + (i + 1) * dk].astype(bf16)
                s = jnp.dot(qh, kh.T, preferred_element_type=jnp.float32) * scale + bias_b
                s = s - jnp.max(s, axis=-1, keepdims=True)
                p = jnp.exp(s)
                p = p * pl.reciprocal(jnp.sum(p, axis=-1, keepdims=True), approx=True)
                pv = jnp.dot(p.astype(bf16), vh, preferred_element_type=jnp.float32)
                # accumulate head output through its W_o row slice (no lane concat)
                acc = acc + jnp.dot(pv.astype(bf16), wo[i * dk:(i + 1) * dk, :],
                                    preferred_element_type=jnp.float32)
            rows.append(acc)
        attn = jnp.concatenate(rows, axis=0) + bo_ref[layer]        # (B*L, D)
        # TODO(synk): dropout is identity in eval mode and therefore omitted.
        x = x + attn

        # --- sublayer 1: pre-LN position-wise FFN + residual ---
        xn = _layer_norm(x, g2_ref[layer], be2_ref[layer])
        hid = jnp.dot(xn.astype(bf16), w1,
                      preferred_element_type=jnp.float32) + b1_ref[layer]
        hid = jnp.maximum(hid, 0.0)
        x = x + jnp.dot(hid.astype(bf16), w2,
                        preferred_element_type=jnp.float32) + b2_ref[layer]

    # --- final LayerNorm + classifier + log_softmax on the CLS position ---
    cls = jnp.concatenate([x[b * L:b * L + 1, :] for b in range(B)], axis=0)   # (B, D)
    xn0 = _layer_norm(cls, fg_ref[...], fb_ref[...])
    logits = jnp.dot(xn0, wc_ref[...], preferred_element_type=jnp.float32) + bc_ref[...]
    z = logits - jnp.max(logits, axis=-1, keepdims=True)
    o_ref[...] = z - jnp.log(jnp.sum(jnp.exp(z), axis=-1, keepdims=True))


# ---------------------------- parameter init ----------------------------
def _xavier_uniform(key, shape):
    fan_in, fan_out = shape[0], shape[1]
    a = math.sqrt(6.0 / (fan_in + fan_out))
    return jax.random.uniform(key, shape, jnp.float32, -a, a)


def init_params(key):
    keys = iter(jax.random.split(key, 8 + NUM_LAYERS * 8))
    p = {}
    tok = _xavier_uniform(next(keys), (VOCAB_SIZE, D_MODEL))
    p["tok_embed"] = tok.at[PAD_IDX].set(0.0)
    p["pos_embed"] = _xavier_uniform(next(keys), (MAX_LENGTH, D_MODEL))
    p["domain_embed"] = _xavier_uniform(next(keys), (NUM_DOMAIN_LABELS, D_MODEL))
    p["cls_token"] = jax.random.normal(next(keys), (D_MODEL,), jnp.float32)

    layers = []
    for _ in range(NUM_LAYERS):
        lp = {
            "wq": _xavier_uniform(next(keys), (D_MODEL, D_MODEL)),
            "bq": jnp.zeros((1, D_MODEL), jnp.float32),
            "wk": _xavier_uniform(next(keys), (D_MODEL, D_MODEL)),
            "bk": jnp.zeros((1, D_MODEL), jnp.float32),
            "wv": _xavier_uniform(next(keys), (D_MODEL, D_MODEL)),
            "bv": jnp.zeros((1, D_MODEL), jnp.float32),
            "wo": _xavier_uniform(next(keys), (D_MODEL, D_MODEL)),
            "bo": jnp.zeros((1, D_MODEL), jnp.float32),
            "g1": jnp.ones((1, D_MODEL), jnp.float32),
            "be1": jnp.zeros((1, D_MODEL), jnp.float32),
            "g2": jnp.ones((1, D_MODEL), jnp.float32),
            "be2": jnp.zeros((1, D_MODEL), jnp.float32),
            "w1": _xavier_uniform(next(keys), (D_MODEL, 4 * D_MODEL)),
            "b1": jnp.zeros((1, 4 * D_MODEL), jnp.float32),
            "w2": _xavier_uniform(next(keys), (4 * D_MODEL, D_MODEL)),
            "b2": jnp.zeros((1, D_MODEL), jnp.float32),
        }
        layers.append(lp)
    p["layers"] = layers

    p["final_g"] = jnp.ones((1, D_MODEL), jnp.float32)
    p["final_b"] = jnp.zeros((1, D_MODEL), jnp.float32)
    p["wc"] = _xavier_uniform(next(keys), (D_MODEL, NUM_CLASSES))
    p["bc"] = jnp.zeros((1, NUM_CLASSES), jnp.float32)
    return p


def _pack_layer_params(layers):
    """Stack per-layer weights with a leading layer axis; cast matmul weights to bf16."""
    wqkv = jnp.stack([jnp.concatenate([lp["wq"], lp["wk"], lp["wv"]], axis=1)
                      for lp in layers]).astype(jnp.bfloat16)        # (NL, D, 3D)
    bqkv = jnp.stack([jnp.concatenate([lp["bq"], lp["bk"], lp["bv"]], axis=1)
                      for lp in layers])                             # (NL, 1, 3D)
    wo = jnp.stack([lp["wo"] for lp in layers]).astype(jnp.bfloat16)
    bo = jnp.stack([lp["bo"] for lp in layers])
    g1 = jnp.stack([lp["g1"] for lp in layers])
    be1 = jnp.stack([lp["be1"] for lp in layers])
    g2 = jnp.stack([lp["g2"] for lp in layers])
    be2 = jnp.stack([lp["be2"] for lp in layers])
    w1 = jnp.stack([lp["w1"] for lp in layers]).astype(jnp.bfloat16)
    b1 = jnp.stack([lp["b1"] for lp in layers])
    w2 = jnp.stack([lp["w2"] for lp in layers]).astype(jnp.bfloat16)
    b2 = jnp.stack([lp["b2"] for lp in layers])
    return (wqkv, bqkv, wo, bo, g1, be1, g2, be2, w1, b1, w2, b2)


# ------------------------------- forward --------------------------------
def classifier_forward(params, inp_tokens, inp_lengths, domain_label=None):
    B, S = inp_tokens.shape
    num_extra = 1 if domain_label is None else 2
    L_real = S + num_extra
    L = ((L_real + 7) // 8) * 8                                  # pad seq to sublane multiple

    pos_idx = jnp.broadcast_to(jnp.arange(S, dtype=jnp.int32)[None, :], (B, S))

    # embedding lookups + CLS / domain token concat (plain-JAX glue)
    tok_emb = jnp.take(params["tok_embed"], inp_tokens, axis=0)
    pos_emb = jnp.take(params["pos_embed"], pos_idx, axis=0)
    emb = tok_emb + pos_emb                                      # (B, S, D)

    cls = jnp.broadcast_to(params["cls_token"][None, None, :], (B, 1, D_MODEL))
    pieces = [cls]
    if domain_label is not None:
        pieces.append(jnp.take(params["domain_embed"], domain_label, axis=0)[:, None, :])
    pieces.append(emb)
    x = jnp.concatenate(pieces, axis=1).astype(jnp.float32)      # (B, L_real, D)
    x = jnp.pad(x, ((0, 0), (0, L - L_real), (0, 0)))            # (B, L, D)
    x2 = x.reshape(B * L, D_MODEL)                               # flat activation slab

    # additive attention bias over key positions: 0.0 == attend, NEG_INF == masked
    col = jnp.arange(L, dtype=jnp.int32)[None, :]                # (1, L)
    key_pos = col - num_extra
    valid = (col < num_extra) | ((key_pos >= 0) & (key_pos < S)
                                 & (key_pos < inp_lengths[:, None]))
    bias = jnp.where(valid, 0.0, NEG_INF).astype(jnp.float32)    # (B, L)

    packed = _pack_layer_params(params["layers"])

    return pl.pallas_call(
        partial(fused_forward_kernel, num_layers=NUM_LAYERS, h=N_HEADS, B=B, L=L),
        out_shape=jax.ShapeDtypeStruct((B, NUM_CLASSES), jnp.float32),
    )(x2, bias, *packed,
      params["final_g"], params["final_b"], params["wc"], params["bc"])


if __name__ == "__main__":
    key = jax.random.PRNGKey(0)
    pkey, tkey = jax.random.split(key)
    params = init_params(pkey)

    B, S = 2, 8
    inp_tokens = jax.random.randint(tkey, (B, S), 1, VOCAB_SIZE, dtype=jnp.int32)
    inp_lengths = jnp.array([8, 5], dtype=jnp.int32)

    fwd = jax.jit(classifier_forward)
    out = fwd(params, inp_tokens, inp_lengths)
    out = jax.block_until_ready(out)
    assert out.shape == (B, NUM_CLASSES)
    assert bool(jnp.all(jnp.isfinite(out)))
    print("KERNEL_OK")
</pallas_src>

<mosaic_0001>
module attributes {stable_mosaic.version = 11 : i64} {
  func.func @fused_forward_kernel(%arg0: memref<32x32xf32, #tpu.memory_space<vmem>>, %arg1: memref<2x16xf32, #tpu.memory_space<vmem>>, %arg2: memref<2x32x96xbf16, #tpu.memory_space<vmem>>, %arg3: memref<2x1x96xf32, #tpu.memory_space<vmem>>, %arg4: memref<2x32x32xbf16, #tpu.memory_space<vmem>>, %arg5: memref<2x1x32xf32, #tpu.memory_space<vmem>>, %arg6: memref<2x1x32xf32, #tpu.memory_space<vmem>>, %arg7: memref<2x1x32xf32, #tpu.memory_space<vmem>>, %arg8: memref<2x1x32xf32, #tpu.memory_space<vmem>>, %arg9: memref<2x1x32xf32, #tpu.memory_space<vmem>>, %arg10: memref<2x32x128xbf16, #tpu.memory_space<vmem>>, %arg11: memref<2x1x128xf32, #tpu.memory_space<vmem>>, %arg12: memref<2x128x32xbf16, #tpu.memory_space<vmem>>, %arg13: memref<2x1x32xf32, #tpu.memory_space<vmem>>, %arg14: memref<1x32xf32, #tpu.memory_space<vmem>>, %arg15: memref<1x32xf32, #tpu.memory_space<vmem>>, %arg16: memref<32x3xf32, #tpu.memory_space<vmem>>, %arg17: memref<1x3xf32, #tpu.memory_space<vmem>>, %arg18: memref<2x3xf32, #tpu.memory_space<vmem>>) attributes {dimension_semantics = [], scalar_prefetch = 0 : i64, scratch_operands = 0 : i64, tpu.core_type = #tpu.core_type<tc>} {
    %c0 = arith.constant 0 : index
    %c0_0 = arith.constant 0 : index
    %0 = vector.load %arg0[%c0, %c0_0] : memref<32x32xf32, #tpu.memory_space<vmem>>, vector<32x32xf32>
    %c0_1 = arith.constant 0 : index
    %c0_2 = arith.constant 0 : index
    %1 = vector.load %arg1[%c0_1, %c0_2] : memref<2x16xf32, #tpu.memory_space<vmem>>, vector<2x16xf32>
    %c0_3 = arith.constant 0 : index
    %c0_4 = arith.constant 0 : index
    %c0_5 = arith.constant 0 : index
    %2 = vector.load %arg2[%c0_3, %c0_4, %c0_5] : memref<2x32x96xbf16, #tpu.memory_space<vmem>>, vector<1x32x96xbf16>
    %3 = vector.shape_cast %2 : vector<1x32x96xbf16> to vector<32x96xbf16>
    %c0_6 = arith.constant 0 : index
    %c0_7 = arith.constant 0 : index
    %c0_8 = arith.constant 0 : index
    %4 = vector.load %arg4[%c0_6, %c0_7, %c0_8] : memref<2x32x32xbf16, #tpu.memory_space<vmem>>, vector<1x32x32xbf16>
    %5 = vector.shape_cast %4 : vector<1x32x32xbf16> to vector<32x32xbf16>
    %c0_9 = arith.constant 0 : index
    %c0_10 = arith.constant 0 : index
    %c0_11 = arith.constant 0 : index
    %6 = vector.load %arg10[%c0_9, %c0_10, %c0_11] : memref<2x32x128xbf16, #tpu.memory_space<vmem>>, vector<1x32x128xbf16>
    %7 = vector.shape_cast %6 : vector<1x32x128xbf16> to vector<32x128xbf16>
    %c0_12 = arith.constant 0 : index
    %c0_13 = arith.constant 0 : index
    %c0_14 = arith.constant 0 : index
    %8 = vector.load %arg12[%c0_12, %c0_13, %c0_14] : memref<2x128x32xbf16, #tpu.memory_space<vmem>>, vector<1x128x32xbf16>
    %9 = vector.shape_cast %8 : vector<1x128x32xbf16> to vector<128x32xbf16>
    %c0_15 = arith.constant 0 : index
    %c0_16 = arith.constant 0 : index
    %c0_17 = arith.constant 0 : index
    %10 = vector.load %arg6[%c0_15, %c0_16, %c0_17] : memref<2x1x32xf32, #tpu.memory_space<vmem>>, vector<1x1x32xf32>
    %11 = vector.shape_cast %10 : vector<1x1x32xf32> to vector<1x32xf32>
    %c0_18 = arith.constant 0 : index
    %c0_19 = arith.constant 0 : index
    %c0_20 = arith.constant 0 : index
    %12 = vector.load %arg7[%c0_18, %c0_19, %c0_20] : memref<2x1x32xf32, #tpu.memory_space<vmem>>, vector<1x1x32xf32>
    %13 = vector.shape_cast %12 : vector<1x1x32xf32> to vector<1x32xf32>
    %cst = arith.constant dense<0.000000e+00> : vector<32xf32>
    %14 = vector.multi_reduction <add>, %0, %cst [1] : vector<32x32xf32> to vector<32xf32>
    %15 = vector.shape_cast %14 : vector<32xf32> to vector<32x1xf32>
    %cst_21 = arith.constant 3.200000e+01 : f32
    %16 = vector.broadcast %cst_21 : f32 to vector<32x1xf32>
    %17 = arith.divf %15, %16 : vector<32x1xf32>
    %18 = vector.broadcast %17 : vector<32x1xf32> to vector<32x32xf32>
    %19 = arith.subf %0, %18 : vector<32x32xf32>
    %20 = arith.mulf %19, %19 : vector<32x32xf32>
    %cst_22 = arith.constant dense<0.000000e+00> : vector<32xf32>
    %21 = vector.multi_reduction <add>, %20, %cst_22 [1] : vector<32x32xf32> to vector<32xf32>
    %22 = vector.shape_cast %21 : vector<32xf32> to vector<32x1xf32>
    %cst_23 = arith.constant 3.200000e+01 : f32
    %23 = vector.broadcast %cst_23 : f32 to vector<32x1xf32>
    %24 = arith.divf %22, %23 : vector<32x1xf32>
    %25 = vector.broadcast %17 : vector<32x1xf32> to vector<32x32xf32>
    %26 = arith.subf %0, %25 : vector<32x32xf32>
    %cst_24 = arith.constant 9.99999997E-7 : f32
    %27 = vector.broadcast %cst_24 : f32 to vector<32x1xf32>
    %28 = arith.addf %24, %27 : vector<32x1xf32>
    %29 = math.rsqrt %28 : vector<32x1xf32>
    %30 = vector.broadcast %29 : vector<32x1xf32> to vector<32x32xf32>
    %31 = arith.mulf %26, %30 : vector<32x32xf32>
    %32 = vector.broadcast %11 : vector<1x32xf32> to vector<32x32xf32>
    %33 = arith.mulf %31, %32 : vector<32x32xf32>
    %34 = vector.broadcast %13 : vector<1x32xf32> to vector<32x32xf32>
    %35 = arith.addf %33, %34 : vector<32x32xf32>
    %36 = arith.truncf %35 : vector<32x32xf32> to vector<32x32xbf16>
    %cst_25 = arith.constant dense<0.000000e+00> : vector<32x96xf32>
    %37 = tpu.matmul %36, %3, %cst_25 {dimension_numbers = #tpu.dot_dimension_numbers<[1], [0], [0], [1], [0, 0, 1, 1], [], []>} : vector<32x32xbf16>, vector<32x96xbf16>, vector<32x96xf32> -> vector<32x96xf32>
    %c0_26 = arith.constant 0 : index
    %c0_27 = arith.constant 0 : index
    %c0_28 = arith.constant 0 : index
    %38 = vector.load %arg3[%c0_26, %c0_27, %c0_28] : memref<2x1x96xf32, #tpu.memory_space<vmem>>, vector<1x1x96xf32>
    %39 = vector.shape_cast %38 : vector<1x1x96xf32> to vector<1x96xf32>
    %40 = vector.broadcast %39 : vector<1x96xf32> to vector<32x96xf32>
    %41 = arith.addf %37, %40 : vector<32x96xf32>
    %42 = vector.extract_strided_slice %41 {offsets = [0, 0], sizes = [16, 96], strides = [1, 1]} : vector<32x96xf32> to vector<16x96xf32>
    %43 = vector.extract_strided_slice %1 {offsets = [0, 0], sizes = [1, 16], strides = [1, 1]} : vector<2x16xf32> to vector<1x16xf32>
    %cst_29 = arith.constant 0.000000e+00 : f32
    %44 = vector.broadcast %cst_29 : f32 to vector<16x32xf32>
    %45 = vector.extract_strided_slice %42 {offsets = [0, 0], sizes = [16, 8], strides = [1, 1]} : vector<16x96xf32> to vector<16x8xf32>
    %46 = arith.truncf %45 : vector<16x8xf32> to vector<16x8xbf16>
    %47 = vector.extract_strided_slice %42 {offsets = [0, 32], sizes = [16, 8], strides = [1, 1]} : vector<16x96xf32> to vector<16x8xf32>
    %48 = arith.truncf %47 : vector<16x8xf32> to vector<16x8xbf16>
    %49 = vector.extract_strided_slice %42 {offsets = [0, 64], sizes = [16, 8], strides = [1, 1]} : vector<16x96xf32> to vector<16x8xf32>
    %50 = arith.truncf %49 : vector<16x8xf32> to vector<16x8xbf16>
    %51 = tpu.transpose %48, [1, 0] : vector<16x8xbf16> -> vector<8x16xbf16>
    %cst_30 = arith.constant dense<0.000000e+00> : vector<16x16xf32>
    %52 = tpu.matmul %46, %51, %cst_30 {dimension_numbers = #tpu.dot_dimension_numbers<[1], [0], [0], [1], [0, 0, 1, 1], [], []>} : vector<16x8xbf16>, vector<8x16xbf16>, vector<16x16xf32> -> vector<16x16xf32>
    %cst_31 = arith.constant 0.353553385 : f32
    %53 = vector.broadcast %cst_31 : f32 to vector<16x16xf32>
    %54 = arith.mulf %52, %53 : vector<16x16xf32>
    %55 = vector.broadcast %43 : vector<1x16xf32> to vector<16x16xf32>
    %56 = arith.addf %54, %55 : vector<16x16xf32>
    %cst_32 = arith.constant dense<0xFF800000> : vector<16xf32>
    %57 = vector.multi_reduction <maximumf>, %56, %cst_32 [1] : vector<16x16xf32> to vector<16xf32>
    %58 = vector.shape_cast %57 : vector<16xf32> to vector<16x1xf32>
    %59 = vector.broadcast %58 : vector<16x1xf32> to vector<16x16xf32>
    %60 = arith.subf %56, %59 : vector<16x16xf32>
    %61 = math.exp %60 : vector<16x16xf32>
    %cst_33 = arith.constant dense<0.000000e+00> : vector<16xf32>
    %62 = vector.multi_reduction <add>, %61, %cst_33 [1] : vector<16x16xf32> to vector<16xf32>
    %63 = vector.shape_cast %62 : vector<16xf32> to vector<16x1xf32>
    %64 = tpu.reciprocal %63 {approx = true} : vector<16x1xf32> -> vector<16x1xf32>
    %65 = vector.broadcast %64 : vector<16x1xf32> to vector<16x16xf32>
    %66 = arith.mulf %61, %65 : vector<16x16xf32>
    %67 = arith.truncf %66 : vector<16x16xf32> to vector<16x16xbf16>
    %cst_34 = arith.constant dense<0.000000e+00> : vector<16x8xf32>
    %68 = tpu.matmul %67, %50, %cst_34 {dimension_numbers = #tpu.dot_dimension_numbers<[1], [0], [0], [1], [0, 0, 1, 1], [], []>} : vector<16x16xbf16>, vector<16x8xbf16>, vector<16x8xf32> -> vector<16x8xf32>
    %69 = arith.truncf %68 : vector<16x8xf32> to vector<16x8xbf16>
    %70 = vector.extract_strided_slice %5 {offsets = [0, 0], sizes = [8, 32], strides = [1, 1]} : vector<32x32xbf16> to vector<8x32xbf16>
    %cst_35 = arith.constant dense<0.000000e+00> : vector<16x32xf32>
    %71 = tpu.matmul %69, %70, %cst_35 {dimension_numbers = #tpu.dot_dimension_numbers<[1], [0], [0], [1], [0, 0, 1, 1], [], []>} : vector<16x8xbf16>, vector<8x32xbf16>, vector<16x32xf32> -> vector<16x32xf32>
    %72 = arith.addf %44, %71 : vector<16x32xf32>
    %73 = vector.extract_strided_slice %42 {offsets = [0, 8], sizes = [16, 8], strides = [1, 1]} : vector<16x96xf32> to vector<16x8xf32>
    %74 = arith.truncf %73 : vector<16x8xf32> to vector<16x8xbf16>
    %75 = vector.extract_strided_slice %42 {offsets = [0, 40], sizes = [16, 8], strides = [1, 1]} : vector<16x96xf32> to vector<16x8xf32>
    %76 = arith.truncf %75 : vector<16x8xf32> to vector<16x8xbf16>
    %77 = vector.extract_strided_slice %42 {offsets = [0, 72], sizes = [16, 8], strides = [1, 1]} : vector<16x96xf32> to vector<16x8xf32>
    %78 = arith.truncf %77 : vector<16x8xf32> to vector<16x8xbf16>
    %79 = tpu.transpose %76, [1, 0] : vector<16x8xbf16> -> vector<8x16xbf16>
    %cst_36 = arith.constant dense<0.000000e+00> : vector<16x16xf32>
    %80 = tpu.matmul %74, %79, %cst_36 {dimension_numbers = #tpu.dot_dimension_numbers<[1], [0], [0], [1], [0, 0, 1, 1], [], []>} : vector<16x8xbf16>, vector<8x16xbf16>, vector<16x16xf32> -> vector<16x16xf32>
    %cst_37 = arith.constant 0.353553385 : f32
    %81 = vector.broadcast %cst_37 : f32 to vector<16x16xf32>
    %82 = arith.mulf %80, %81 : vector<16x16xf32>
    %83 = vector.broadcast %43 : vector<1x16xf32> to vector<16x16xf32>
    %84 = arith.addf %82, %83 : vector<16x16xf32>
    %cst_38 = arith.constant dense<0xFF800000> : vector<16xf32>
    %85 = vector.multi_reduction <maximumf>, %84, %cst_38 [1] : vector<16x16xf32> to vector<16xf32>
    %86 = vector.shape_cast %85 : vector<16xf32> to vector<16x1xf32>
    %87 = vector.broadcast %86 : vector<16x1xf32> to vector<16x16xf32>
    %88 = arith.subf %84, %87 : vector<16x16xf32>
    %89 = math.exp %88 : vector<16x16xf32>
    %cst_39 = arith.constant dense<0.000000e+00> : vector<16xf32>
    %90 = vector.multi_reduction <add>, %89, %cst_39 [1] : vector<16x16xf32> to vector<16xf32>
    %91 = vector.shape_cast %90 : vector<16xf32> to vector<16x1xf32>
    %92 = tpu.reciprocal %91 {approx = true} : vector<16x1xf32> -> vector<16x1xf32>
    %93 = vector.broadcast %92 : vector<16x1xf32> to vector<16x16xf32>
    %94 = arith.mulf %89, %93 : vector<16x16xf32>
    %95 = arith.truncf %94 : vector<16x16xf32> to vector<16x16xbf16>
    %cst_40 = arith.constant dense<0.000000e+00> : vector<16x8xf32>
    %96 = tpu.matmul %95, %78, %cst_40 {dimension_numbers = #tpu.dot_dimension_numbers<[1], [0], [0], [1], [0, 0, 1, 1], [], []>} : vector<16x16xbf16>, vector<16x8xbf16>, vector<16x8xf32> -> vector<16x8xf32>
    %97 = arith.truncf %96 : vector<16x8xf32> to vector<16x8xbf16>
    %98 = vector.extract_strided_slice %5 {offsets = [8, 0], sizes = [8, 32], strides = [1, 1]} : vector<32x32xbf16> to vector<8x32xbf16>
    %cst_41 = arith.constant dense<0.000000e+00> : vector<16x32xf32>
    %99 = tpu.matmul %97, %98, %cst_41 {dimension_numbers = #tpu.dot_dimension_numbers<[1], [0], [0], [1], [0, 0, 1, 1], [], []>} : vector<16x8xbf16>, vector<8x32xbf16>, vector<16x32xf32> -> vector<16x32xf32>
    %100 = arith.addf %72, %99 : vector<16x32xf32>
    %101 = vector.extract_strided_slice %42 {offsets = [0, 16], sizes = [16, 8], strides = [1, 1]} : vector<16x96xf32> to vector<16x8xf32>
    %102 = arith.truncf %101 : vector<16x8xf32> to vector<16x8xbf16>
    %103 = vector.extract_strided_slice %42 {offsets = [0, 48], sizes = [16, 8], strides = [1, 1]} : vector<16x96xf32> to vector<16x8xf32>
    %104 = arith.truncf %103 : vector<16x8xf32> to vector<16x8xbf16>
    %105 = vector.extract_strided_slice %42 {offsets = [0, 80], sizes = [16, 8], strides = [1, 1]} : vector<16x96xf32> to vector<16x8xf32>
    %106 = arith.truncf %105 : vector<16x8xf32> to vector<16x8xbf16>
    %107 = tpu.transpose %104, [1, 0] : vector<16x8xbf16> -> vector<8x16xbf16>
    %cst_42 = arith.constant dense<0.000000e+00> : vector<16x16xf32>
    %108 = tpu.matmul %102, %107, %cst_42 {dimension_numbers = #tpu.dot_dimension_numbers<[1], [0], [0], [1], [0, 0, 1, 1], [], []>} : vector<16x8xbf16>, vector<8x16xbf16>, vector<16x16xf32> -> vector<16x16xf32>
    %cst_43 = arith.constant 0.353553385 : f32
    %109 = vector.broadcast %cst_43 : f32 to vector<16x16xf32>
    %110 = arith.mulf %108, %109 : vector<16x16xf32>
    %111 = vector.broadcast %43 : vector<1x16xf32> to vector<16x16xf32>
    %112 = arith.addf %110, %111 : vector<16x16xf32>
    %cst_44 = arith.constant dense<0xFF800000> : vector<16xf32>
    %113 = vector.multi_reduction <maximumf>, %112, %cst_44 [1] : vector<16x16xf32> to vector<16xf32>
    %114 = vector.shape_cast %113 : vector<16xf32> to vector<16x1xf32>
    %115 = vector.broadcast %114 : vector<16x1xf32> to vector<16x16xf32>
    %116 = arith.subf %112, %115 : vector<16x16xf32>
    %117 = math.exp %116 : vector<16x16xf32>
    %cst_45 = arith.constant dense<0.000000e+00> : vector<16xf32>
    %118 = vector.multi_reduction <add>, %117, %cst_45 [1] : vector<16x16xf32> to vector<16xf32>
    %119 = vector.shape_cast %118 : vector<16xf32> to vector<16x1xf32>
    %120 = tpu.reciprocal %119 {approx = true} : vector<16x1xf32> -> vector<16x1xf32>
    %121 = vector.broadcast %120 : vector<16x1xf32> to vector<16x16xf32>
    %122 = arith.mulf %117, %121 : vector<16x16xf32>
    %123 = arith.truncf %122 : vector<16x16xf32> to vector<16x16xbf16>
    %cst_46 = arith.constant dense<0.000000e+00> : vector<16x8xf32>
    %124 = tpu.matmul %123, %106, %cst_46 {dimension_numbers = #tpu.dot_dimension_numbers<[1], [0], [0], [1], [0, 0, 1, 1], [], []>} : vector<16x16xbf16>, vector<16x8xbf16>, vector<16x8xf32> -> vector<16x8xf32>
    %125 = arith.truncf %124 : vector<16x8xf32> to vector<16x8xbf16>
    %126 = vector.extract_strided_slice %5 {offsets = [16, 0], sizes = [8, 32], strides = [1, 1]} : vector<32x32xbf16> to vector<8x32xbf16>
    %cst_47 = arith.constant dense<0.000000e+00> : vector<16x32xf32>
    %127 = tpu.matmul %125, %126, %cst_47 {dimension_numbers = #tpu.dot_dimension_numbers<[1], [0], [0], [1], [0, 0, 1, 1], [], []>} : vector<16x8xbf16>, vector<8x32xbf16>, vector<16x32xf32> -> vector<16x32xf32>
    %128 = arith.addf %100, %127 : vector<16x32xf32>
    %129 = vector.extract_strided_slice %42 {offsets = [0, 24], sizes = [16, 8], strides = [1, 1]} : vector<16x96xf32> to vector<16x8xf32>
    %130 = arith.truncf %129 : vector<16x8xf32> to vector<16x8xbf16>
    %131 = vector.extract_strided_slice %42 {offsets = [0, 56], sizes = [16, 8], strides = [1, 1]} : vector<16x96xf32> to vector<16x8xf32>
    %132 = arith.truncf %131 : vector<16x8xf32> to vector<16x8xbf16>
    %133 = vector.extract_strided_slice %42 {offsets = [0, 88], sizes = [16, 8], strides = [1, 1]} : vector<16x96xf32> to vector<16x8xf32>
    %134 = arith.truncf %133 : vector<16x8xf32> to vector<16x8xbf16>
    %135 = tpu.transpose %132, [1, 0] : vector<16x8xbf16> -> vector<8x16xbf16>
    %cst_48 = arith.constant dense<0.000000e+00> : vector<16x16xf32>
    %136 = tpu.matmul %130, %135, %cst_48 {dimension_numbers = #tpu.dot_dimension_numbers<[1], [0], [0], [1], [0, 0, 1, 1], [], []>} : vector<16x8xbf16>, vector<8x16xbf16>, vector<16x16xf32> -> vector<16x16xf32>
    %cst_49 = arith.constant 0.353553385 : f32
    %137 = vector.broadcast %cst_49 : f32 to vector<16x16xf32>
    %138 = arith.mulf %136, %137 : vector<16x16xf32>
    %139 = vector.broadcast %43 : vector<1x16xf32> to vector<16x16xf32>
    %140 = arith.addf %138, %139 : vector<16x16xf32>
    %cst_50 = arith.constant dense<0xFF800000> : vector<16xf32>
    %141 = vector.multi_reduction <maximumf>, %140, %cst_50 [1] : vector<16x16xf32> to vector<16xf32>
    %142 = vector.shape_cast %141 : vector<16xf32> to vector<16x1xf32>
    %143 = vector.broadcast %142 : vector<16x1xf32> to vector<16x16xf32>
    %144 = arith.subf %140, %143 : vector<16x16xf32>
    %145 = math.exp %144 : vector<16x16xf32>
    %cst_51 = arith.constant dense<0.000000e+00> : vector<16xf32>
    %146 = vector.multi_reduction <add>, %145, %cst_51 [1] : vector<16x16xf32> to vector<16xf32>
    %147 = vector.shape_cast %146 : vector<16xf32> to vector<16x1xf32>
    %148 = tpu.reciprocal %147 {approx = true} : vector<16x1xf32> -> vector<16x1xf32>
    %149 = vector.broadcast %148 : vector<16x1xf32> to vector<16x16xf32>
    %150 = arith.mulf %145, %149 : vector<16x16xf32>
    %151 = arith.truncf %150 : vector<16x16xf32> to vector<16x16xbf16>
    %cst_52 = arith.constant dense<0.000000e+00> : vector<16x8xf32>
    %152 = tpu.matmul %151, %134, %cst_52 {dimension_numbers = #tpu.dot_dimension_numbers<[1], [0], [0], [1], [0, 0, 1, 1], [], []>} : vector<16x16xbf16>, vector<16x8xbf16>, vector<16x8xf32> -> vector<16x8xf32>
    %153 = arith.truncf %152 : vector<16x8xf32> to vector<16x8xbf16>
    %154 = vector.extract_strided_slice %5 {offsets = [24, 0], sizes = [8, 32], strides = [1, 1]} : vector<32x32xbf16> to vector<8x32xbf16>
    %cst_53 = arith.constant dense<0.000000e+00> : vector<16x32xf32>
    %155 = tpu.matmul %153, %154, %cst_53 {dimension_numbers = #tpu.dot_dimension_numbers<[1], [0], [0], [1], [0, 0, 1, 1], [], []>} : vector<16x8xbf16>, vector<8x32xbf16>, vector<16x32xf32> -> vector<16x32xf32>
    %156 = arith.addf %128, %155 : vector<16x32xf32>
    %157 = vector.extract_strided_slice %41 {offsets = [16, 0], sizes = [16, 96], strides = [1, 1]} : vector<32x96xf32> to vector<16x96xf32>
    %158 = vector.extract_strided_slice %1 {offsets = [1, 0], sizes = [1, 16], strides = [1, 1]} : vector<2x16xf32> to vector<1x16xf32>
    %cst_54 = arith.constant 0.000000e+00 : f32
    %159 = vector.broadcast %cst_54 : f32 to vector<16x32xf32>
    %160 = vector.extract_strided_slice %157 {offsets = [0, 0], sizes = [16, 8], strides = [1, 1]} : vector<16x96xf32> to vector<16x8xf32>
    %161 = arith.truncf %160 : vector<16x8xf32> to vector<16x8xbf16>
    %162 = vector.extract_strided_slice %157 {offsets = [0, 32], sizes = [16, 8], strides = [1, 1]} : vector<16x96xf32> to vector<16x8xf32>
    %163 = arith.truncf %162 : vector<16x8xf32> to vector<16x8xbf16>
    %164 = vector.extract_strided_slice %157 {offsets = [0, 64], sizes = [16, 8], strides = [1, 1]} : vector<16x96xf32> to vector<16x8xf32>
    %165 = arith.truncf %164 : vector<16x8xf32> to vector<16x8xbf16>
    %166 = tpu.transpose %163, [1, 0] : vector<16x8xbf16> -> vector<8x16xbf16>
    %cst_55 = arith.constant dense<0.000000e+00> : vector<16x16xf32>
    %167 = tpu.matmul %161, %166, %cst_55 {dimension_numbers = #tpu.dot_dimension_numbers<[1], [0], [0], [1], [0, 0, 1, 1], [], []>} : vector<16x8xbf16>, vector<8x16xbf16>, vector<16x16xf32> -> vector<16x16xf32>
    %cst_56 = arith.constant 0.353553385 : f32
    %168 = vector.broadcast %cst_56 : f32 to vector<16x16xf32>
    %169 = arith.mulf %167, %168 : vector<16x16xf32>
    %170 = vector.broadcast %158 : vector<1x16xf32> to vector<16x16xf32>
    %171 = arith.addf %169, %170 : vector<16x16xf32>
    %cst_57 = arith.constant dense<0xFF800000> : vector<16xf32>
    %172 = vector.multi_reduction <maximumf>, %171, %cst_57 [1] : vector<16x16xf32> to vector<16xf32>
    %173 = vector.shape_cast %172 : vector<16xf32> to vector<16x1xf32>
    %174 = vector.broadcast %173 : vector<16x1xf32> to vector<16x16xf32>
    %175 = arith.subf %171, %174 : vector<16x16xf32>
    %176 = math.exp %175 : vector<16x16xf32>
    %cst_58 = arith.constant dense<0.000000e+00> : vector<16xf32>
    %177 = vector.multi_reduction <add>, %176, %cst_58 [1] : vector<16x16xf32> to vector<16xf32>
    %178 = vector.shape_cast %177 : vector<16xf32> to vector<16x1xf32>
    %179 = tpu.reciprocal %178 {approx = true} : vector<16x1xf32> -> vector<16x1xf32>
    %180 = vector.broadcast %179 : vector<16x1xf32> to vector<16x16xf32>
    %181 = arith.mulf %176, %180 : vector<16x16xf32>
    %182 = arith.truncf %181 : vector<16x16xf32> to vector<16x16xbf16>
    %cst_59 = arith.constant dense<0.000000e+00> : vector<16x8xf32>
    %183 = tpu.matmul %182, %165, %cst_59 {dimension_numbers = #tpu.dot_dimension_numbers<[1], [0], [0], [1], [0, 0, 1, 1], [], []>} : vector<16x16xbf16>, vector<16x8xbf16>, vector<16x8xf32> -> vector<16x8xf32>
    %184 = arith.truncf %183 : vector<16x8xf32> to vector<16x8xbf16>
    %185 = vector.extract_strided_slice %5 {offsets = [0, 0], sizes = [8, 32], strides = [1, 1]} : vector<32x32xbf16> to vector<8x32xbf16>
    %cst_60 = arith.constant dense<0.000000e+00> : vector<16x32xf32>
    %186 = tpu.matmul %184, %185, %cst_60 {dimension_numbers = #tpu.dot_dimension_numbers<[1], [0], [0], [1], [0, 0, 1, 1], [], []>} : vector<16x8xbf16>, vector<8x32xbf16>, vector<16x32xf32> -> vector<16x32xf32>
    %187 = arith.addf %159, %186 : vector<16x32xf32>
    %188 = vector.extract_strided_slice %157 {offsets = [0, 8], sizes = [16, 8], strides = [1, 1]} : vector<16x96xf32> to vector<16x8xf32>
    %189 = arith.truncf %188 : vector<16x8xf32> to vector<16x8xbf16>
    %190 = vector.extract_strided_slice %157 {offsets = [0, 40], sizes = [16, 8], strides = [1, 1]} : vector<16x96xf32> to vector<16x8xf32>
    %191 = arith.truncf %190 : vector<16x8xf32> to vector<16x8xbf16>
    %192 = vector.extract_strided_slice %157 {offsets = [0, 72], sizes = [16, 8], strides = [1, 1]} : vector<16x96xf32> to vector<16x8xf32>
    %193 = arith.truncf %192 : vector<16x8xf32> to vector<16x8xbf16>
    %194 = tpu.transpose %191, [1, 0] : vector<16x8xbf16> -> vector<8x16xbf16>
    %cst_61 = arith.constant dense<0.000000e+00> : vector<16x16xf32>
    %195 = tpu.matmul %189, %194, %cst_61 {dimension_numbers = #tpu.dot_dimension_numbers<[1], [0], [0], [1], [0, 0, 1, 1], [], []>} : vector<16x8xbf16>, vector<8x16xbf16>, vector<16x16xf32> -> vector<16x16xf32>
    %cst_62 = arith.constant 0.353553385 : f32
    %196 = vector.broadcast %cst_62 : f32 to vector<16x16xf32>
    %197 = arith.mulf %195, %196 : vector<16x16xf32>
    %198 = vector.broadcast %158 : vector<1x16xf32> to vector<16x16xf32>
    %199 = arith.addf %197, %198 : vector<16x16xf32>
    %cst_63 = arith.constant dense<0xFF800000> : vector<16xf32>
    %200 = vector.multi_reduction <maximumf>, %199, %cst_63 [1] : vector<16x16xf32> to vector<16xf32>
    %201 = vector.shape_cast %200 : vector<16xf32> to vector<16x1xf32>
    %202 = vector.broadcast %201 : vector<16x1xf32> to vector<16x16xf32>
    %203 = arith.subf %199, %202 : vector<16x16xf32>
    %204 = math.exp %203 : vector<16x16xf32>
    %cst_64 = arith.constant dense<0.000000e+00> : vector<16xf32>
    %205 = vector.multi_reduction <add>, %204, %cst_64 [1] : vector<16x16xf32> to vector<16xf32>
    %206 = vector.shape_cast %205 : vector<16xf32> to vector<16x1xf32>
    %207 = tpu.reciprocal %206 {approx = true} : vector<16x1xf32> -> vector<16x1xf32>
    %208 = vector.broadcast %207 : vector<16x1xf32> to vector<16x16xf32>
    %209 = arith.mulf %204, %208 : vector<16x16xf32>
    %210 = arith.truncf %209 : vector<16x16xf32> to vector<16x16xbf16>
    %cst_65 = arith.constant dense<0.000000e+00> : vector<16x8xf32>
    %211 = tpu.matmul %210, %193, %cst_65 {dimension_numbers = #tpu.dot_dimension_numbers<[1], [0], [0], [1], [0, 0, 1, 1], [], []>} : vector<16x16xbf16>, vector<16x8xbf16>, vector<16x8xf32> -> vector<16x8xf32>
    %212 = arith.truncf %211 : vector<16x8xf32> to vector<16x8xbf16>
    %213 = vector.extract_strided_slice %5 {offsets = [8, 0], sizes = [8, 32], strides = [1, 1]} : vector<32x32xbf16> to vector<8x32xbf16>
    %cst_66 = arith.constant dense<0.000000e+00> : vector<16x32xf32>
    %214 = tpu.matmul %212, %213, %cst_66 {dimension_numbers = #tpu.dot_dimension_numbers<[1], [0], [0], [1], [0, 0, 1, 1], [], []>} : vector<16x8xbf16>, vector<8x32xbf16>, vector<16x32xf32> -> vector<16x32xf32>
    %215 = arith.addf %187, %214 : vector<16x32xf32>
    %216 = vector.extract_strided_slice %157 {offsets = [0, 16], sizes = [16, 8], strides = [1, 1]} : vector<16x96xf32> to vector<16x8xf32>
    %217 = arith.truncf %216 : vector<16x8xf32> to vector<16x8xbf16>
    %218 = vector.extract_strided_slice %157 {offsets = [0, 48], sizes = [16, 8], strides = [1, 1]} : vector<16x96xf32> to vector<16x8xf32>
    %219 = arith.truncf %218 : vector<16x8xf32> to vector<16x8xbf16>
    %220 = vector.extract_strided_slice %157 {offsets = [0, 80], sizes = [16, 8], strides = [1, 1]} : vector<16x96xf32> to vector<16x8xf32>
    %221 = arith.truncf %220 : vector<16x8xf32> to vector<16x8xbf16>
    %222 = tpu.transpose %219, [1, 0] : vector<16x8xbf16> -> vector<8x16xbf16>
    %cst_67 = arith.constant dense<0.000000e+00> : vector<16x16xf32>
    %223 = tpu.matmul %217, %222, %cst_67 {dimension_numbers = #tpu.dot_dimension_numbers<[1], [0], [0], [1], [0, 0, 1, 1], [], []>} : vector<16x8xbf16>, vector<8x16xbf16>, vector<16x16xf32> -> vector<16x16xf32>
    %cst_68 = arith.constant 0.353553385 : f32
    %224 = vector.broadcast %cst_68 : f32 to vector<16x16xf32>
    %225 = arith.mulf %223, %224 : vector<16x16xf32>
    %226 = vector.broadcast %158 : vector<1x16xf32> to vector<16x16xf32>
    %227 = arith.addf %225, %226 : vector<16x16xf32>
    %cst_69 = arith.constant dense<0xFF800000> : vector<16xf32>
    %228 = vector.multi_reduction <maximumf>, %227, %cst_69 [1] : vector<16x16xf32> to vector<16xf32>
    %229 = vector.shape_cast %228 : vector<16xf32> to vector<16x1xf32>
    %230 = vector.broadcast %229 : vector<16x1xf32> to vector<16x16xf32>
    %231 = arith.subf %227, %230 : vector<16x16xf32>
    %232 = math.exp %231 : vector<16x16xf32>
    %cst_70 = arith.constant dense<0.000000e+00> : vector<16xf32>
    %233 = vector.multi_reduction <add>, %232, %cst_70 [1] : vector<16x16xf32> to vector<16xf32>
    %234 = vector.shape_cast %233 : vector<16xf32> to vector<16x1xf32>
    %235 = tpu.reciprocal %234 {approx = true} : vector<16x1xf32> -> vector<16x1xf32>
    %236 = vector.broadcast %235 : vector<16x1xf32> to vector<16x16xf32>
    %237 = arith.mulf %232, %236 : vector<16x16xf32>
    %238 = arith.truncf %237 : vector<16x16xf32> to vector<16x16xbf16>
    %cst_71 = arith.constant dense<0.000000e+00> : vector<16x8xf32>
    %239 = tpu.matmul %238, %221, %cst_71 {dimension_numbers = #tpu.dot_dimension_numbers<[1], [0], [0], [1], [0, 0, 1, 1], [], []>} : vector<16x16xbf16>, vector<16x8xbf16>, vector<16x8xf32> -> vector<16x8xf32>
    %240 = arith.truncf %239 : vector<16x8xf32> to vector<16x8xbf16>
    %241 = vector.extract_strided_slice %5 {offsets = [16, 0], sizes = [8, 32], strides = [1, 1]} : vector<32x32xbf16> to vector<8x32xbf16>
    %cst_72 = arith.constant dense<0.000000e+00> : vector<16x32xf32>
    %242 = tpu.matmul %240, %241, %cst_72 {dimension_numbers = #tpu.dot_dimension_numbers<[1], [0], [0], [1], [0, 0, 1, 1], [], []>} : vector<16x8xbf16>, vector<8x32xbf16>, vector<16x32xf32> -> vector<16x32xf32>
    %243 = arith.addf %215, %242 : vector<16x32xf32>
    %244 = vector.extract_strided_slice %157 {offsets = [0, 24], sizes = [16, 8], strides = [1, 1]} : vector<16x96xf32> to vector<16x8xf32>
    %245 = arith.truncf %244 : vector<16x8xf32> to vector<16x8xbf16>
    %246 = vector.extract_strided_slice %157 {offsets = [0, 56], sizes = [16, 8], strides = [1, 1]} : vector<16x96xf32> to vector<16x8xf32>
    %247 = arith.truncf %246 : vector<16x8xf32> to vector<16x8xbf16>
    %248 = vector.extract_strided_slice %157 {offsets = [0, 88], sizes = [16, 8], strides = [1, 1]} : vector<16x96xf32> to vector<16x8xf32>
    %249 = arith.truncf %248 : vector<16x8xf32> to vector<16x8xbf16>
    %250 = tpu.transpose %247, [1, 0] : vector<16x8xbf16> -> vector<8x16xbf16>
    %cst_73 = arith.constant dense<0.000000e+00> : vector<16x16xf32>
    %251 = tpu.matmul %245, %250, %cst_73 {dimension_numbers = #tpu.dot_dimension_numbers<[1], [0], [0], [1], [0, 0, 1, 1], [], []>} : vector<16x8xbf16>, vector<8x16xbf16>, vector<16x16xf32> -> vector<16x16xf32>
    %cst_74 = arith.constant 0.353553385 : f32
    %252 = vector.broadcast %cst_74 : f32 to vector<16x16xf32>
    %253 = arith.mulf %251, %252 : vector<16x16xf32>
    %254 = vector.broadcast %158 : vector<1x16xf32> to vector<16x16xf32>
    %255 = arith.addf %253, %254 : vector<16x16xf32>
    %cst_75 = arith.constant dense<0xFF800000> : vector<16xf32>
    %256 = vector.multi_reduction <maximumf>, %255, %cst_75 [1] : vector<16x16xf32> to vector<16xf32>
    %257 = vector.shape_cast %256 : vector<16xf32> to vector<16x1xf32>
    %258 = vector.broadcast %257 : vector<16x1xf32> to vector<16x16xf32>
    %259 = arith.subf %255, %258 : vector<16x16xf32>
    %260 = math.exp %259 : vector<16x16xf32>
    %cst_76 = arith.constant dense<0.000000e+00> : vector<16xf32>
    %261 = vector.multi_reduction <add>, %260, %cst_76 [1] : vector<16x16xf32> to vector<16xf32>
    %262 = vector.shape_cast %261 : vector<16xf32> to vector<16x1xf32>
    %263 = tpu.reciprocal %262 {approx = true} : vector<16x1xf32> -> vector<16x1xf32>
    %264 = vector.broadcast %263 : vector<16x1xf32> to vector<16x16xf32>
    %265 = arith.mulf %260, %264 : vector<16x16xf32>
    %266 = arith.truncf %265 : vector<16x16xf32> to vector<16x16xbf16>
    %cst_77 = arith.constant dense<0.000000e+00> : vector<16x8xf32>
    %267 = tpu.matmul %266, %249, %cst_77 {dimension_numbers = #tpu.dot_dimension_numbers<[1], [0], [0], [1], [0, 0, 1, 1], [], []>} : vector<16x16xbf16>, vector<16x8xbf16>, vector<16x8xf32> -> vector<16x8xf32>
    %268 = arith.truncf %267 : vector<16x8xf32> to vector<16x8xbf16>
    %269 = vector.extract_strided_slice %5 {offsets = [24, 0], sizes = [8, 32], strides = [1, 1]} : vector<32x32xbf16> to vector<8x32xbf16>
    %cst_78 = arith.constant dense<0.000000e+00> : vector<16x32xf32>
    %270 = tpu.matmul %268, %269, %cst_78 {dimension_numbers = #tpu.dot_dimension_numbers<[1], [0], [0], [1], [0, 0, 1, 1], [], []>} : vector<16x8xbf16>, vector<8x32xbf16>, vector<16x32xf32> -> vector<16x32xf32>
    %271 = arith.addf %243, %270 : vector<16x32xf32>
    %272 = tpu.concatenate %156, %271 in 0 : vector<16x32xf32>, vector<16x32xf32> -> vector<32x32xf32>
    %c0_79 = arith.constant 0 : index
    %c0_80 = arith.constant 0 : index
    %c0_81 = arith.constant 0 : index
    %273 = vector.load %arg5[%c0_79, %c0_80, %c0_81] : memref<2x1x32xf32, #tpu.memory_space<vmem>>, vector<1x1x32xf32>
    %274 = vector.shape_cast %273 : vector<1x1x32xf32> to vector<1x32xf32>
    %275 = vector.broadcast %274 : vector<1x32xf32> to vector<32x32xf32>
    %276 = arith.addf %272, %275 : vector<32x32xf32>
    %277 = arith.addf %0, %276 : vector<32x32xf32>
    %c0_82 = arith.constant 0 : index
    %c0_83 = arith.constant 0 : index
    %c0_84 = arith.constant 0 : index
    %278 = vector.load %arg8[%c0_82, %c0_83, %c0_84] : memref<2x1x32xf32, #tpu.memory_space<vmem>>, vector<1x1x32xf32>
    %279 = vector.shape_cast %278 : vector<1x1x32xf32> to vector<1x32xf32>
    %c0_85 = arith.constant 0 : index
    %c0_86 = arith.constant 0 : index
    %c0_87 = arith.constant 0 : index
    %280 = vector.load %arg9[%c0_85, %c0_86, %c0_87] : memref<2x1x32xf32, #tpu.memory_space<vmem>>, vector<1x1x32xf32>
    %281 = vector.shape_cast %280 : vector<1x1x32xf32> to vector<1x32xf32>
    %cst_88 = arith.constant dense<0.000000e+00> : vector<32xf32>
    %282 = vector.multi_reduction <add>, %277, %cst_88 [1] : vector<32x32xf32> to vector<32xf32>
    %283 = vector.shape_cast %282 : vector<32xf32> to vector<32x1xf32>
    %cst_89 = arith.constant 3.200000e+01 : f32
    %284 = vector.broadcast %cst_89 : f32 to vector<32x1xf32>
    %285 = arith.divf %283, %284 : vector<32x1xf32>
    %286 = vector.broadcast %285 : vector<32x1xf32> to vector<32x32xf32>
    %287 = arith.subf %277, %286 : vector<32x32xf32>
    %288 = arith.mulf %287, %287 : vector<32x32xf32>
    %cst_90 = arith.constant dense<0.000000e+00> : vector<32xf32>
    %289 = vector.multi_reduction <add>, %288, %cst_90 [1] : vector<32x32xf32> to vector<32xf32>
    %290 = vector.shape_cast %289 : vector<32xf32> to vector<32x1xf32>
    %cst_91 = arith.constant 3.200000e+01 : f32
    %291 = vector.broadcast %cst_91 : f32 to vector<32x1xf32>
    %292 = arith.divf %290, %291 : vector<32x1xf32>
    %293 = vector.broadcast %285 : vector<32x1xf32> to vector<32x32xf32>
    %294 = arith.subf %277, %293 : vector<32x32xf32>
    %cst_92 = arith.constant 9.99999997E-7 : f32
    %295 = vector.broadcast %cst_92 : f32 to vector<32x1xf32>
    %296 = arith.addf %292, %295 : vector<32x1xf32>
    %297 = math.rsqrt %296 : vector<32x1xf32>
    %298 = vector.broadcast %297 : vector<32x1xf32> to vector<32x32xf32>
    %299 = arith.mulf %294, %298 : vector<32x32xf32>
    %300 = vector.broadcast %279 : vector<1x32xf32> to vector<32x32xf32>
    %301 = arith.mulf %299, %300 : vector<32x32xf32>
    %302 = vector.broadcast %281 : vector<1x32xf32> to vector<32x32xf32>
    %303 = arith.addf %301, %302 : vector<32x32xf32>
    %304 = arith.truncf %303 : vector<32x32xf32> to vector<32x32xbf16>
    %cst_93 = arith.constant dense<0.000000e+00> : vector<32x128xf32>
    %305 = tpu.matmul %304, %7, %cst_93 {dimension_numbers = #tpu.dot_dimension_numbers<[1], [0], [0], [1], [0, 0, 1, 1], [], []>} : vector<32x32xbf16>, vector<32x128xbf16>, vector<32x128xf32> -> vector<32x128xf32>
    %c0_94 = arith.constant 0 : index
    %c0_95 = arith.constant 0 : index
    %c0_96 = arith.constant 0 : index
    %306 = vector.load %arg11[%c0_94, %c0_95, %c0_96] : memref<2x1x128xf32, #tpu.memory_space<vmem>>, vector<1x1x128xf32>
    %307 = vector.shape_cast %306 : vector<1x1x128xf32> to vector<1x128xf32>
    %308 = vector.broadcast %307 : vector<1x128xf32> to vector<32x128xf32>
    %309 = arith.addf %305, %308 : vector<32x128xf32>
    %cst_97 = arith.constant 0.000000e+00 : f32
    %310 = vector.broadcast %cst_97 : f32 to vector<32x128xf32>
    %311 = arith.maximumf %309, %310 : vector<32x128xf32>
    %312 = arith.truncf %311 : vector<32x128xf32> to vector<32x128xbf16>
    %cst_98 = arith.constant dense<0.000000e+00> : vector<32x32xf32>
    %313 = tpu.matmul %312, %9, %cst_98 {dimension_numbers = #tpu.dot_dimension_numbers<[1], [0], [0], [1], [0, 0, 1, 1], [], []>} : vector<32x128xbf16>, vector<128x32xbf16>, vector<32x32xf32> -> vector<32x32xf32>
    %314 = arith.addf %277, %313 : vector<32x32xf32>
    %c0_99 = arith.constant 0 : index
    %c0_100 = arith.constant 0 : index
    %c0_101 = arith.constant 0 : index
    %315 = vector.load %arg13[%c0_99, %c0_100, %c0_101] : memref<2x1x32xf32, #tpu.memory_space<vmem>>, vector<1x1x32xf32>
    %316 = vector.shape_cast %315 : vector<1x1x32xf32> to vector<1x32xf32>
    %317 = vector.broadcast %316 : vector<1x32xf32> to vector<32x32xf32>
    %318 = arith.addf %314, %317 : vector<32x32xf32>
    %c1 = arith.constant 1 : index
    %c0_102 = arith.constant 0 : index
    %c0_103 = arith.constant 0 : index
    %319 = vector.load %arg2[%c1, %c0_102, %c0_103] : memref<2x32x96xbf16, #tpu.memory_space<vmem>>, vector<1x32x96xbf16>
    %320 = vector.shape_cast %319 : vector<1x32x96xbf16> to vector<32x96xbf16>
    %c1_104 = arith.constant 1 : index
    %c0_105 = arith.constant 0 : index
    %c0_106 = arith.constant 0 : index
    %321 = vector.load %arg4[%c1_104, %c0_105, %c0_106] : memref<2x32x32xbf16, #tpu.memory_space<vmem>>, vector<1x32x32xbf16>
    %322 = vector.shape_cast %321 : vector<1x32x32xbf16> to vector<32x32xbf16>
    %c1_107 = arith.constant 1 : index
    %c0_108 = arith.constant 0 : index
    %c0_109 = arith.constant 0 : index
    %323 = vector.load %arg10[%c1_107, %c0_108, %c0_109] : memref<2x32x128xbf16, #tpu.memory_space<vmem>>, vector<1x32x128xbf16>
    %324 = vector.shape_cast %323 : vector<1x32x128xbf16> to vector<32x128xbf16>
    %c1_110 = arith.constant 1 : index
    %c0_111 = arith.constant 0 : index
    %c0_112 = arith.constant 0 : index
    %325 = vector.load %arg12[%c1_110, %c0_111, %c0_112] : memref<2x128x32xbf16, #tpu.memory_space<vmem>>, vector<1x128x32xbf16>
    %326 = vector.shape_cast %325 : vector<1x128x32xbf16> to vector<128x32xbf16>
    %c1_113 = arith.constant 1 : index
    %c0_114 = arith.constant 0 : index
    %c0_115 = arith.constant 0 : index
    %327 = vector.load %arg6[%c1_113, %c0_114, %c0_115] : memref<2x1x32xf32, #tpu.memory_space<vmem>>, vector<1x1x32xf32>
    %328 = vector.shape_cast %327 : vector<1x1x32xf32> to vector<1x32xf32>
    %c1_116 = arith.constant 1 : index
    %c0_117 = arith.constant 0 : index
    %c0_118 = arith.constant 0 : index
    %329 = vector.load %arg7[%c1_116, %c0_117, %c0_118] : memref<2x1x32xf32, #tpu.memory_space<vmem>>, vector<1x1x32xf32>
    %330 = vector.shape_cast %329 : vector<1x1x32xf32> to vector<1x32xf32>
    %cst_119 = arith.constant dense<0.000000e+00> : vector<32xf32>
    %331 = vector.multi_reduction <add>, %318, %cst_119 [1] : vector<32x32xf32> to vector<32xf32>
    %332 = vector.shape_cast %331 : vector<32xf32> to vector<32x1xf32>
    %cst_120 = arith.constant 3.200000e+01 : f32
    %333 = vector.broadcast %cst_120 : f32 to vector<32x1xf32>
    %334 = arith.divf %332, %333 : vector<32x1xf32>
    %335 = vector.broadcast %334 : vector<32x1xf32> to vector<32x32xf32>
    %336 = arith.subf %318, %335 : vector<32x32xf32>
    %337 = arith.mulf %336, %336 : vector<32x32xf32>
    %cst_121 = arith.constant dense<0.000000e+00> : vector<32xf32>
    %338 = vector.multi_reduction <add>, %337, %cst_121 [1] : vector<32x32xf32> to vector<32xf32>
    %339 = vector.shape_cast %338 : vector<32xf32> to vector<32x1xf32>
    %cst_122 = arith.constant 3.200000e+01 : f32
    %340 = vector.broadcast %cst_122 : f32 to vector<32x1xf32>
    %341 = arith.divf %339, %340 : vector<32x1xf32>
    %342 = vector.broadcast %334 : vector<32x1xf32> to vector<32x32xf32>
    %343 = arith.subf %318, %342 : vector<32x32xf32>
    %cst_123 = arith.constant 9.99999997E-7 : f32
    %344 = vector.broadcast %cst_123 : f32 to vector<32x1xf32>
    %345 = arith.addf %341, %344 : vector<32x1xf32>
    %346 = math.rsqrt %345 : vector<32x1xf32>
    %347 = vector.broadcast %346 : vector<32x1xf32> to vector<32x32xf32>
    %348 = arith.mulf %343, %347 : vector<32x32xf32>
    %349 = vector.broadcast %328 : vector<1x32xf32> to vector<32x32xf32>
    %350 = arith.mulf %348, %349 : vector<32x32xf32>
    %351 = vector.broadcast %330 : vector<1x32xf32> to vector<32x32xf32>
    %352 = arith.addf %350, %351 : vector<32x32xf32>
    %353 = arith.truncf %352 : vector<32x32xf32> to vector<32x32xbf16>
    %cst_124 = arith.constant dense<0.000000e+00> : vector<32x96xf32>
    %354 = tpu.matmul %353, %320, %cst_124 {dimension_numbers = #tpu.dot_dimension_numbers<[1], [0], [0], [1], [0, 0, 1, 1], [], []>} : vector<32x32xbf16>, vector<32x96xbf16>, vector<32x96xf32> -> vector<32x96xf32>
    %c1_125 = arith.constant 1 : index
    %c0_126 = arith.constant 0 : index
    %c0_127 = arith.constant 0 : index
    %355 = vector.load %arg3[%c1_125, %c0_126, %c0_127] : memref<2x1x96xf32, #tpu.memory_space<vmem>>, vector<1x1x96xf32>
    %356 = vector.shape_cast %355 : vector<1x1x96xf32> to vector<1x96xf32>
    %357 = vector.broadcast %356 : vector<1x96xf32> to vector<32x96xf32>
    %358 = arith.addf %354, %357 : vector<32x96xf32>
    %359 = vector.extract_strided_slice %358 {offsets = [0, 0], sizes = [16, 96], strides = [1, 1]} : vector<32x96xf32> to vector<16x96xf32>
    %360 = vector.extract_strided_slice %1 {offsets = [0, 0], sizes = [1, 16], strides = [1, 1]} : vector<2x16xf32> to vector<1x16xf32>
    %cst_128 = arith.constant 0.000000e+00 : f32
    %361 = vector.broadcast %cst_128 : f32 to vector<16x32xf32>
    %362 = vector.extract_strided_slice %359 {offsets = [0, 0], sizes = [16, 8], strides = [1, 1]} : vector<16x96xf32> to vector<16x8xf32>
    %363 = arith.truncf %362 : vector<16x8xf32> to vector<16x8xbf16>
    %364 = vector.extract_strided_slice %359 {offsets = [0, 32], sizes = [16, 8], strides = [1, 1]} : vector<16x96xf32> to vector<16x8xf32>
    %365 = arith.truncf %364 : vector<16x8xf32> to vector<16x8xbf16>
    %366 = vector.extract_strided_slice %359 {offsets = [0, 64], sizes = [16, 8], strides = [1, 1]} : vector<16x96xf32> to vector<16x8xf32>
    %367 = arith.truncf %366 : vector<16x8xf32> to vector<16x8xbf16>
    %368 = tpu.transpose %365, [1, 0] : vector<16x8xbf16> -> vector<8x16xbf16>
    %cst_129 = arith.constant dense<0.000000e+00> : vector<16x16xf32>
    %369 = tpu.matmul %363, %368, %cst_129 {dimension_numbers = #tpu.dot_dimension_numbers<[1], [0], [0], [1], [0, 0, 1, 1], [], []>} : vector<16x8xbf16>, vector<8x16xbf16>, vector<16x16xf32> -> vector<16x16xf32>
    %cst_130 = arith.constant 0.353553385 : f32
    %370 = vector.broadcast %cst_130 : f32 to vector<16x16xf32>
    %371 = arith.mulf %369, %370 : vector<16x16xf32>
    %372 = vector.broadcast %360 : vector<1x16xf32> to vector<16x16xf32>
    %373 = arith.addf %371, %372 : vector<16x16xf32>
    %cst_131 = arith.constant dense<0xFF800000> : vector<16xf32>
    %374 = vector.multi_reduction <maximumf>, %373, %cst_131 [1] : vector<16x16xf32> to vector<16xf32>
    %375 = vector.shape_cast %374 : vector<16xf32> to vector<16x1xf32>
    %376 = vector.broadcast %375 : vector<16x1xf32> to vector<16x16xf32>
    %377 = arith.subf %373, %376 : vector<16x16xf32>
    %378 = math.exp %377 : vector<16x16xf32>
    %cst_132 = arith.constant dense<0.000000e+00> : vector<16xf32>
    %379 = vector.multi_reduction <add>, %378, %cst_132 [1] : vector<16x16xf32> to vector<16xf32>
    %380 = vector.shape_cast %379 : vector<16xf32> to vector<16x1xf32>
    %381 = tpu.reciprocal %380 {approx = true} : vector<16x1xf32> -> vector<16x1xf32>
    %382 = vector.broadcast %381 : vector<16x1xf32> to vector<16x16xf32>
    %383 = arith.mulf %378, %382 : vector<16x16xf32>
    %384 = arith.truncf %383 : vector<16x16xf32> to vector<16x16xbf16>
    %cst_133 = arith.constant dense<0.000000e+00> : vector<16x8xf32>
    %385 = tpu.matmul %384, %367, %cst_133 {dimension_numbers = #tpu.dot_dimension_numbers<[1], [0], [0], [1], [0, 0, 1, 1], [], []>} : vector<16x16xbf16>, vector<16x8xbf16>, vector<16x8xf32> -> vector<16x8xf32>
    %386 = arith.truncf %385 : vector<16x8xf32> to vector<16x8xbf16>
    %387 = vector.extract_strided_slice %322 {offsets = [0, 0], sizes = [8, 32], strides = [1, 1]} : vector<32x32xbf16> to vector<8x32xbf16>
    %cst_134 = arith.constant dense<0.000000e+00> : vector<16x32xf32>
    %388 = tpu.matmul %386, %387, %cst_134 {dimension_numbers = #tpu.dot_dimension_numbers<[1], [0], [0], [1], [0, 0, 1, 1], [], []>} : vector<16x8xbf16>, vector<8x32xbf16>, vector<16x32xf32> -> vector<16x32xf32>
    %389 = arith.addf %361, %388 : vector<16x32xf32>
    %390 = vector.extract_strided_slice %359 {offsets = [0, 8], sizes = [16, 8], strides = [1, 1]} : vector<16x96xf32> to vector<16x8xf32>
    %391 = arith.truncf %390 : vector<16x8xf32> to vector<16x8xbf16>
    %392 = vector.extract_strided_slice %359 {offsets = [0, 40], sizes = [16, 8], strides = [1, 1]} : vector<16x96xf32> to vector<16x8xf32>
    %393 = arith.truncf %392 : vector<16x8xf32> to vector<16x8xbf16>
    %394 = vector.extract_strided_slice %359 {offsets = [0, 72], sizes = [16, 8], strides = [1, 1]} : vector<16x96xf32> to vector<16x8xf32>
    %395 = arith.truncf %394 : vector<16x8xf32> to vector<16x8xbf16>
    %396 = tpu.transpose %393, [1, 0] : vector<16x8xbf16> -> vector<8x16xbf16>
    %cst_135 = arith.constant dense<0.000000e+00> : vector<16x16xf32>
    %397 = tpu.matmul %391, %396, %cst_135 {dimension_numbers = #tpu.dot_dimension_numbers<[1], [0], [0], [1], [0, 0, 1, 1], [], []>} : vector<16x8xbf16>, vector<8x16xbf16>, vector<16x16xf32> -> vector<16x16xf32>
    %cst_136 = arith.constant 0.353553385 : f32
    %398 = vector.broadcast %cst_136 : f32 to vector<16x16xf32>
    %399 = arith.mulf %397, %398 : vector<16x16xf32>
    %400 = vector.broadcast %360 : vector<1x16xf32> to vector<16x16xf32>
    %401 = arith.addf %399, %400 : vector<16x16xf32>
    %cst_137 = arith.constant dense<0xFF800000> : vector<16xf32>
    %402 = vector.multi_reduction <maximumf>, %401, %cst_137 [1] : vector<16x16xf32> to vector<16xf32>
    %403 = vector.shape_cast %402 : vector<16xf32> to vector<16x1xf32>
    %404 = vector.broadcast %403 : vector<16x1xf32> to vector<16x16xf32>
    %405 = arith.subf %401, %404 : vector<16x16xf32>
    %406 = math.exp %405 : vector<16x16xf32>
    %cst_138 = arith.constant dense<0.000000e+00> : vector<16xf32>
    %407 = vector.multi_reduction <add>, %406, %cst_138 [1] : vector<16x16xf32> to vector<16xf32>
    %408 = vector.shape_cast %407 : vector<16xf32> to vector<16x1xf32>
    %409 = tpu.reciprocal %408 {approx = true} : vector<16x1xf32> -> vector<16x1xf32>
    %410 = vector.broadcast %409 : vector<16x1xf32> to vector<16x16xf32>
    %411 = arith.mulf %406, %410 : vector<16x16xf32>
    %412 = arith.truncf %411 : vector<16x16xf32> to vector<16x16xbf16>
    %cst_139 = arith.constant dense<0.000000e+00> : vector<16x8xf32>
    %413 = tpu.matmul %412, %395, %cst_139 {dimension_numbers = #tpu.dot_dimension_numbers<[1], [0], [0], [1], [0, 0, 1, 1], [], []>} : vector<16x16xbf16>, vector<16x8xbf16>, vector<16x8xf32> -> vector<16x8xf32>
    %414 = arith.truncf %413 : vector<16x8xf32> to vector<16x8xbf16>
    %415 = vector.extract_strided_slice %322 {offsets = [8, 0], sizes = [8, 32], strides = [1, 1]} : vector<32x32xbf16> to vector<8x32xbf16>
    %cst_140 = arith.constant dense<0.000000e+00> : vector<16x32xf32>
    %416 = tpu.matmul %414, %415, %cst_140 {dimension_numbers = #tpu.dot_dimension_numbers<[1], [0], [0], [1], [0, 0, 1, 1], [], []>} : vector<16x8xbf16>, vector<8x32xbf16>, vector<16x32xf32> -> vector<16x32xf32>
    %417 = arith.addf %389, %416 : vector<16x32xf32>
    %418 = vector.extract_strided_slice %359 {offsets = [0, 16], sizes = [16, 8], strides = [1, 1]} : vector<16x96xf32> to vector<16x8xf32>
    %419 = arith.truncf %418 : vector<16x8xf32> to vector<16x8xbf16>
    %420 = vector.extract_strided_slice %359 {offsets = [0, 48], sizes = [16, 8], strides = [1, 1]} : vector<16x96xf32> to vector<16x8xf32>
    %421 = arith.truncf %420 : vector<16x8xf32> to vector<16x8xbf16>
    %422 = vector.extract_strided_slice %359 {offsets = [0, 80], sizes = [16, 8], strides = [1, 1]} : vector<16x96xf32> to vector<16x8xf32>
    %423 = arith.truncf %422 : vector<16x8xf32> to vector<16x8xbf16>
    %424 = tpu.transpose %421, [1, 0] : vector<16x8xbf16> -> vector<8x16xbf16>
    %cst_141 = arith.constant dense<0.000000e+00> : vector<16x16xf32>
    %425 = tpu.matmul %419, %424, %cst_141 {dimension_numbers = #tpu.dot_dimension_numbers<[1], [0], [0], [1], [0, 0, 1, 1], [], []>} : vector<16x8xbf16>, vector<8x16xbf16>, vector<16x16xf32> -> vector<16x16xf32>
    %cst_142 = arith.constant 0.353553385 : f32
    %426 = vector.broadcast %cst_142 : f32 to vector<16x16xf32>
    %427 = arith.mulf %425, %426 : vector<16x16xf32>
    %428 = vector.broadcast %360 : vector<1x16xf32> to vector<16x16xf32>
    %429 = arith.addf %427, %428 : vector<16x16xf32>
    %cst_143 = arith.constant dense<0xFF800000> : vector<16xf32>
    %430 = vector.multi_reduction <maximumf>, %429, %cst_143 [1] : vector<16x16xf32> to vector<16xf32>
    %431 = vector.shape_cast %430 : vector<16xf32> to vector<16x1xf32>
    %432 = vector.broadcast %431 : vector<16x1xf32> to vector<16x16xf32>
    %433 = arith.subf %429, %432 : vector<16x16xf32>
    %434 = math.exp %433 : vector<16x16xf32>
    %cst_144 = arith.constant dense<0.000000e+00> : vector<16xf32>
    %435 = vector.multi_reduction <add>, %434, %cst_144 [1] : vector<16x16xf32> to vector<16xf32>
    %436 = vector.shape_cast %435 : vector<16xf32> to vector<16x1xf32>
    %437 = tpu.reciprocal %436 {approx = true} : vector<16x1xf32> -> vector<16x1xf32>
    %438 = vector.broadcast %437 : vector<16x1xf32> to vector<16x16xf32>
    %439 = arith.mulf %434, %438 : vector<16x16xf32>
    %440 = arith.truncf %439 : vector<16x16xf32> to vector<16x16xbf16>
    %cst_145 = arith.constant dense<0.000000e+00> : vector<16x8xf32>
    %441 = tpu.matmul %440, %423, %cst_145 {dimension_numbers = #tpu.dot_dimension_numbers<[1], [0], [0], [1], [0, 0, 1, 1], [], []>} : vector<16x16xbf16>, vector<16x8xbf16>, vector<16x8xf32> -> vector<16x8xf32>
    %442 = arith.truncf %441 : vector<16x8xf32> to vector<16x8xbf16>
    %443 = vector.extract_strided_slice %322 {offsets = [16, 0], sizes = [8, 32], strides = [1, 1]} : vector<32x32xbf16> to vector<8x32xbf16>
    %cst_146 = arith.constant dense<0.000000e+00> : vector<16x32xf32>
    %444 = tpu.matmul %442, %443, %cst_146 {dimension_numbers = #tpu.dot_dimension_numbers<[1], [0], [0], [1], [0, 0, 1, 1], [], []>} : vector<16x8xbf16>, vector<8x32xbf16>, vector<16x32xf32> -> vector<16x32xf32>
    %445 = arith.addf %417, %444 : vector<16x32xf32>
    %446 = vector.extract_strided_slice %359 {offsets = [0, 24], sizes = [16, 8], strides = [1, 1]} : vector<16x96xf32> to vector<16x8xf32>
    %447 = arith.truncf %446 : vector<16x8xf32> to vector<16x8xbf16>
    %448 = vector.extract_strided_slice %359 {offsets = [0, 56], sizes = [16, 8], strides = [1, 1]} : vector<16x96xf32> to vector<16x8xf32>
    %449 = arith.truncf %448 : vector<16x8xf32> to vector<16x8xbf16>
    %450 = vector.extract_strided_slice %359 {offsets = [0, 88], sizes = [16, 8], strides = [1, 1]} : vector<16x96xf32> to vector<16x8xf32>
    %451 = arith.truncf %450 : vector<16x8xf32> to vector<16x8xbf16>
    %452 = tpu.transpose %449, [1, 0] : vector<16x8xbf16> -> vector<8x16xbf16>
    %cst_147 = arith.constant dense<0.000000e+00> : vector<16x16xf32>
    %453 = tpu.matmul %447, %452, %cst_147 {dimension_numbers = #tpu.dot_dimension_numbers<[1], [0], [0], [1], [0, 0, 1, 1], [], []>} : vector<16x8xbf16>, vector<8x16xbf16>, vector<16x16xf32> -> vector<16x16xf32>
    %cst_148 = arith.constant 0.353553385 : f32
    %454 = vector.broadcast %cst_148 : f32 to vector<16x16xf32>
    %455 = arith.mulf %453, %454 : vector<16x16xf32>
    %456 = vector.broadcast %360 : vector<1x16xf32> to vector<16x16xf32>
    %457 = arith.addf %455, %456 : vector<16x16xf32>
    %cst_149 = arith.constant dense<0xFF800000> : vector<16xf32>
    %458 = vector.multi_reduction <maximumf>, %457, %cst_149 [1] : vector<16x16xf32> to vector<16xf32>
    %459 = vector.shape_cast %458 : vector<16xf32> to vector<16x1xf32>
    %460 = vector.broadcast %459 : vector<16x1xf32> to vector<16x16xf32>
    %461 = arith.subf %457, %460 : vector<16x16xf32>
    %462 = math.exp %461 : vector<16x16xf32>
    %cst_150 = arith.constant dense<0.000000e+00> : vector<16xf32>
    %463 = vector.multi_reduction <add>, %462, %cst_150 [1] : vector<16x16xf32> to vector<16xf32>
    %464 = vector.shape_cast %463 : vector<16xf32> to vector<16x1xf32>
    %465 = tpu.reciprocal %464 {approx = true} : vector<16x1xf32> -> vector<16x1xf32>
    %466 = vector.broadcast %465 : vector<16x1xf32> to vector<16x16xf32>
    %467 = arith.mulf %462, %466 : vector<16x16xf32>
    %468 = arith.truncf %467 : vector<16x16xf32> to vector<16x16xbf16>
    %cst_151 = arith.constant dense<0.000000e+00> : vector<16x8xf32>
    %469 = tpu.matmul %468, %451, %cst_151 {dimension_numbers = #tpu.dot_dimension_numbers<[1], [0], [0], [1], [0, 0, 1, 1], [], []>} : vector<16x16xbf16>, vector<16x8xbf16>, vector<16x8xf32> -> vector<16x8xf32>
    %470 = arith.truncf %469 : vector<16x8xf32> to vector<16x8xbf16>
    %471 = vector.extract_strided_slice %322 {offsets = [24, 0], sizes = [8, 32], strides = [1, 1]} : vector<32x32xbf16> to vector<8x32xbf16>
    %cst_152 = arith.constant dense<0.000000e+00> : vector<16x32xf32>
    %472 = tpu.matmul %470, %471, %cst_152 {dimension_numbers = #tpu.dot_dimension_numbers<[1], [0], [0], [1], [0, 0, 1, 1], [], []>} : vector<16x8xbf16>, vector<8x32xbf16>, vector<16x32xf32> -> vector<16x32xf32>
    %473 = arith.addf %445, %472 : vector<16x32xf32>
    %474 = vector.extract_strided_slice %358 {offsets = [16, 0], sizes = [16, 96], strides = [1, 1]} : vector<32x96xf32> to vector<16x96xf32>
    %475 = vector.extract_strided_slice %1 {offsets = [1, 0], sizes = [1, 16], strides = [1, 1]} : vector<2x16xf32> to vector<1x16xf32>
    %cst_153 = arith.constant 0.000000e+00 : f32
    %476 = vector.broadcast %cst_153 : f32 to vector<16x32xf32>
    %477 = vector.extract_strided_slice %474 {offsets = [0, 0], sizes = [16, 8], strides = [1, 1]} : vector<16x96xf32> to vector<16x8xf32>
    %478 = arith.truncf %477 : vector<16x8xf32> to vector<16x8xbf16>
    %479 = vector.extract_strided_slice %474 {offsets = [0, 32], sizes = [16, 8], strides = [1, 1]} : vector<16x96xf32> to vector<16x8xf32>
    %480 = arith.truncf %479 : vector<16x8xf32> to vector<16x8xbf16>
    %481 = vector.extract_strided_slice %474 {offsets = [0, 64], sizes = [16, 8], strides = [1, 1]} : vector<16x96xf32> to vector<16x8xf32>
    %482 = arith.truncf %481 : vector<16x8xf32> to vector<16x8xbf16>
    %483 = tpu.transpose %480, [1, 0] : vector<16x8xbf16> -> vector<8x16xbf16>
    %cst_154 = arith.constant dense<0.000000e+00> : vector<16x16xf32>
    %484 = tpu.matmul %478, %483, %cst_154 {dimension_numbers = #tpu.dot_dimension_numbers<[1], [0], [0], [1], [0, 0, 1, 1], [], []>} : vector<16x8xbf16>, vector<8x16xbf16>, vector<16x16xf32> -> vector<16x16xf32>
    %cst_155 = arith.constant 0.353553385 : f32
    %485 = vector.broadcast %cst_155 : f32 to vector<16x16xf32>
    %486 = arith.mulf %484, %485 : vector<16x16xf32>
    %487 = vector.broadcast %475 : vector<1x16xf32> to vector<16x16xf32>
    %488 = arith.addf %486, %487 : vector<16x16xf32>
    %cst_156 = arith.constant dense<0xFF800000> : vector<16xf32>
    %489 = vector.multi_reduction <maximumf>, %488, %cst_156 [1] : vector<16x16xf32> to vector<16xf32>
    %490 = vector.shape_cast %489 : vector<16xf32> to vector<16x1xf32>
    %491 = vector.broadcast %490 : vector<16x1xf32> to vector<16x16xf32>
    %492 = arith.subf %488, %491 : vector<16x16xf32>
    %493 = math.exp %492 : vector<16x16xf32>
    %cst_157 = arith.constant dense<0.000000e+00> : vector<16xf32>
    %494 = vector.multi_reduction <add>, %493, %cst_157 [1] : vector<16x16xf32> to vector<16xf32>
    %495 = vector.shape_cast %494 : vector<16xf32> to vector<16x1xf32>
    %496 = tpu.reciprocal %495 {approx = true} : vector<16x1xf32> -> vector<16x1xf32>
    %497 = vector.broadcast %496 : vector<16x1xf32> to vector<16x16xf32>
    %498 = arith.mulf %493, %497 : vector<16x16xf32>
    %499 = arith.truncf %498 : vector<16x16xf32> to vector<16x16xbf16>
    %cst_158 = arith.constant dense<0.000000e+00> : vector<16x8xf32>
    %500 = tpu.matmul %499, %482, %cst_158 {dimension_numbers = #tpu.dot_dimension_numbers<[1], [0], [0], [1], [0, 0, 1, 1], [], []>} : vector<16x16xbf16>, vector<16x8xbf16>, vector<16x8xf32> -> vector<16x8xf32>
    %501 = arith.truncf %500 : vector<16x8xf32> to vector<16x8xbf16>
    %502 = vector.extract_strided_slice %322 {offsets = [0, 0], sizes = [8, 32], strides = [1, 1]} : vector<32x32xbf16> to vector<8x32xbf16>
    %cst_159 = arith.constant dense<0.000000e+00> : vector<16x32xf32>
    %503 = tpu.matmul %501, %502, %cst_159 {dimension_numbers = #tpu.dot_dimension_numbers<[1], [0], [0], [1], [0, 0, 1, 1], [], []>} : vector<16x8xbf16>, vector<8x32xbf16>, vector<16x32xf32> -> vector<16x32xf32>
    %504 = arith.addf %476, %503 : vector<16x32xf32>
    %505 = vector.extract_strided_slice %474 {offsets = [0, 8], sizes = [16, 8], strides = [1, 1]} : vector<16x96xf32> to vector<16x8xf32>
    %506 = arith.truncf %505 : vector<16x8xf32> to vector<16x8xbf16>
    %507 = vector.extract_strided_slice %474 {offsets = [0, 40], sizes = [16, 8], strides = [1, 1]} : vector<16x96xf32> to vector<16x8xf32>
    %508 = arith.truncf %507 : vector<16x8xf32> to vector<16x8xbf16>
    %509 = vector.extract_strided_slice %474 {offsets = [0, 72], sizes = [16, 8], strides = [1, 1]} : vector<16x96xf32> to vector<16x8xf32>
    %510 = arith.truncf %509 : vector<16x8xf32> to vector<16x8xbf16>
    %511 = tpu.transpose %508, [1, 0] : vector<16x8xbf16> -> vector<8x16xbf16>
    %cst_160 = arith.constant dense<0.000000e+00> : vector<16x16xf32>
    %512 = tpu.matmul %506, %511, %cst_160 {dimension_numbers = #tpu.dot_dimension_numbers<[1], [0], [0], [1], [0, 0, 1, 1], [], []>} : vector<16x8xbf16>, vector<8x16xbf16>, vector<16x16xf32> -> vector<16x16xf32>
    %cst_161 = arith.constant 0.353553385 : f32
    %513 = vector.broadcast %cst_161 : f32 to vector<16x16xf32>
    %514 = arith.mulf %512, %513 : vector<16x16xf32>
    %515 = vector.broadcast %475 : vector<1x16xf32> to vector<16x16xf32>
    %516 = arith.addf %514, %515 : vector<16x16xf32>
    %cst_162 = arith.constant dense<0xFF800000> : vector<16xf32>
    %517 = vector.multi_reduction <maximumf>, %516, %cst_162 [1] : vector<16x16xf32> to vector<16xf32>
    %518 = vector.shape_cast %517 : vector<16xf32> to vector<16x1xf32>
    %519 = vector.broadcast %518 : vector<16x1xf32> to vector<16x16xf32>
    %520 = arith.subf %516, %519 : vector<16x16xf32>
    %521 = math.exp %520 : vector<16x16xf32>
    %cst_163 = arith.constant dense<0.000000e+00> : vector<16xf32>
    %522 = vector.multi_reduction <add>, %521, %cst_163 [1] : vector<16x16xf32> to vector<16xf32>
    %523 = vector.shape_cast %522 : vector<16xf32> to vector<16x1xf32>
    %524 = tpu.reciprocal %523 {approx = true} : vector<16x1xf32> -> vector<16x1xf32>
    %525 = vector.broadcast %524 : vector<16x1xf32> to vector<16x16xf32>
    %526 = arith.mulf %521, %525 : vector<16x16xf32>
    %527 = arith.truncf %526 : vector<16x16xf32> to vector<16x16xbf16>
    %cst_164 = arith.constant dense<0.000000e+00> : vector<16x8xf32>
    %528 = tpu.matmul %527, %510, %cst_164 {dimension_numbers = #tpu.dot_dimension_numbers<[1], [0], [0], [1], [0, 0, 1, 1], [], []>} : vector<16x16xbf16>, vector<16x8xbf16>, vector<16x8xf32> -> vector<16x8xf32>
    %529 = arith.truncf %528 : vector<16x8xf32> to vector<16x8xbf16>
    %530 = vector.extract_strided_slice %322 {offsets = [8, 0], sizes = [8, 32], strides = [1, 1]} : vector<32x32xbf16> to vector<8x32xbf16>
    %cst_165 = arith.constant dense<0.000000e+00> : vector<16x32xf32>
    %531 = tpu.matmul %529, %530, %cst_165 {dimension_numbers = #tpu.dot_dimension_numbers<[1], [0], [0], [1], [0, 0, 1, 1], [], []>} : vector<16x8xbf16>, vector<8x32xbf16>, vector<16x32xf32> -> vector<16x32xf32>
    %532 = arith.addf %504, %531 : vector<16x32xf32>
    %533 = vector.extract_strided_slice %474 {offsets = [0, 16], sizes = [16, 8], strides = [1, 1]} : vector<16x96xf32> to vector<16x8xf32>
    %534 = arith.truncf %533 : vector<16x8xf32> to vector<16x8xbf16>
    %535 = vector.extract_strided_slice %474 {offsets = [0, 48], sizes = [16, 8], strides = [1, 1]} : vector<16x96xf32> to vector<16x8xf32>
    %536 = arith.truncf %535 : vector<16x8xf32> to vector<16x8xbf16>
    %537 = vector.extract_strided_slice %474 {offsets = [0, 80], sizes = [16, 8], strides = [1, 1]} : vector<16x96xf32> to vector<16x8xf32>
    %538 = arith.truncf %537 : vector<16x8xf32> to vector<16x8xbf16>
    %539 = tpu.transpose %536, [1, 0] : vector<16x8xbf16> -> vector<8x16xbf16>
    %cst_166 = arith.constant dense<0.000000e+00> : vector<16x16xf32>
    %540 = tpu.matmul %534, %539, %cst_166 {dimension_numbers = #tpu.dot_dimension_numbers<[1], [0], [0], [1], [0, 0, 1, 1], [], []>} : vector<16x8xbf16>, vector<8x16xbf16>, vector<16x16xf32> -> vector<16x16xf32>
    %cst_167 = arith.constant 0.353553385 : f32
    %541 = vector.broadcast %cst_167 : f32 to vector<16x16xf32>
    %542 = arith.mulf %540, %541 : vector<16x16xf32>
    %543 = vector.broadcast %475 : vector<1x16xf32> to vector<16x16xf32>
    %544 = arith.addf %542, %543 : vector<16x16xf32>
    %cst_168 = arith.constant dense<0xFF800000> : vector<16xf32>
    %545 = vector.multi_reduction <maximumf>, %544, %cst_168 [1] : vector<16x16xf32> to vector<16xf32>
    %546 = vector.shape_cast %545 : vector<16xf32> to vector<16x1xf32>
    %547 = vector.broadcast %546 : vector<16x1xf32> to vector<16x16xf32>
    %548 = arith.subf %544, %547 : vector<16x16xf32>
    %549 = math.exp %548 : vector<16x16xf32>
    %cst_169 = arith.constant dense<0.000000e+00> : vector<16xf32>
    %550 = vector.multi_reduction <add>, %549, %cst_169 [1] : vector<16x16xf32> to vector<16xf32>
    %551 = vector.shape_cast %550 : vector<16xf32> to vector<16x1xf32>
    %552 = tpu.reciprocal %551 {approx = true} : vector<16x1xf32> -> vector<16x1xf32>
    %553 = vector.broadcast %552 : vector<16x1xf32> to vector<16x16xf32>
    %554 = arith.mulf %549, %553 : vector<16x16xf32>
    %555 = arith.truncf %554 : vector<16x16xf32> to vector<16x16xbf16>
    %cst_170 = arith.constant dense<0.000000e+00> : vector<16x8xf32>
    %556 = tpu.matmul %555, %538, %cst_170 {dimension_numbers = #tpu.dot_dimension_numbers<[1], [0], [0], [1], [0, 0, 1, 1], [], []>} : vector<16x16xbf16>, vector<16x8xbf16>, vector<16x8xf32> -> vector<16x8xf32>
    %557 = arith.truncf %556 : vector<16x8xf32> to vector<16x8xbf16>
    %558 = vector.extract_strided_slice %322 {offsets = [16, 0], sizes = [8, 32], strides = [1, 1]} : vector<32x32xbf16> to vector<8x32xbf16>
    %cst_171 = arith.constant dense<0.000000e+00> : vector<16x32xf32>
    %559 = tpu.matmul %557, %558, %cst_171 {dimension_numbers = #tpu.dot_dimension_numbers<[1], [0], [0], [1], [0, 0, 1, 1], [], []>} : vector<16x8xbf16>, vector<8x32xbf16>, vector<16x32xf32> -> vector<16x32xf32>
    %560 = arith.addf %532, %559 : vector<16x32xf32>
    %561 = vector.extract_strided_slice %474 {offsets = [0, 24], sizes = [16, 8], strides = [1, 1]} : vector<16x96xf32> to vector<16x8xf32>
    %562 = arith.truncf %561 : vector<16x8xf32> to vector<16x8xbf16>
    %563 = vector.extract_strided_slice %474 {offsets = [0, 56], sizes = [16, 8], strides = [1, 1]} : vector<16x96xf32> to vector<16x8xf32>
    %564 = arith.truncf %563 : vector<16x8xf32> to vector<16x8xbf16>
    %565 = vector.extract_strided_slice %474 {offsets = [0, 88], sizes = [16, 8], strides = [1, 1]} : vector<16x96xf32> to vector<16x8xf32>
    %566 = arith.truncf %565 : vector<16x8xf32> to vector<16x8xbf16>
    %567 = tpu.transpose %564, [1, 0] : vector<16x8xbf16> -> vector<8x16xbf16>
    %cst_172 = arith.constant dense<0.000000e+00> : vector<16x16xf32>
    %568 = tpu.matmul %562, %567, %cst_172 {dimension_numbers = #tpu.dot_dimension_numbers<[1], [0], [0], [1], [0, 0, 1, 1], [], []>} : vector<16x8xbf16>, vector<8x16xbf16>, vector<16x16xf32> -> vector<16x16xf32>
    %cst_173 = arith.constant 0.353553385 : f32
    %569 = vector.broadcast %cst_173 : f32 to vector<16x16xf32>
    %570 = arith.mulf %568, %569 : vector<16x16xf32>
    %571 = vector.broadcast %475 : vector<1x16xf32> to vector<16x16xf32>
    %572 = arith.addf %570, %571 : vector<16x16xf32>
    %cst_174 = arith.constant dense<0xFF800000> : vector<16xf32>
    %573 = vector.multi_reduction <maximumf>, %572, %cst_174 [1] : vector<16x16xf32> to vector<16xf32>
    %574 = vector.shape_cast %573 : vector<16xf32> to vector<16x1xf32>
    %575 = vector.broadcast %574 : vector<16x1xf32> to vector<16x16xf32>
    %576 = arith.subf %572, %575 : vector<16x16xf32>
    %577 = math.exp %576 : vector<16x16xf32>
    %cst_175 = arith.constant dense<0.000000e+00> : vector<16xf32>
    %578 = vector.multi_reduction <add>, %577, %cst_175 [1] : vector<16x16xf32> to vector<16xf32>
    %579 = vector.shape_cast %578 : vector<16xf32> to vector<16x1xf32>
    %580 = tpu.reciprocal %579 {approx = true} : vector<16x1xf32> -> vector<16x1xf32>
    %581 = vector.broadcast %580 : vector<16x1xf32> to vector<16x16xf32>
    %582 = arith.mulf %577, %581 : vector<16x16xf32>
    %583 = arith.truncf %582 : vector<16x16xf32> to vector<16x16xbf16>
    %cst_176 = arith.constant dense<0.000000e+00> : vector<16x8xf32>
    %584 = tpu.matmul %583, %566, %cst_176 {dimension_numbers = #tpu.dot_dimension_numbers<[1], [0], [0], [1], [0, 0, 1, 1], [], []>} : vector<16x16xbf16>, vector<16x8xbf16>, vector<16x8xf32> -> vector<16x8xf32>
    %585 = arith.truncf %584 : vector<16x8xf32> to vector<16x8xbf16>
    %586 = vector.extract_strided_slice %322 {offsets = [24, 0], sizes = [8, 32], strides = [1, 1]} : vector<32x32xbf16> to vector<8x32xbf16>
    %cst_177 = arith.constant dense<0.000000e+00> : vector<16x32xf32>
    %587 = tpu.matmul %585, %586, %cst_177 {dimension_numbers = #tpu.dot_dimension_numbers<[1], [0], [0], [1], [0, 0, 1, 1], [], []>} : vector<16x8xbf16>, vector<8x32xbf16>, vector<16x32xf32> -> vector<16x32xf32>
    %588 = arith.addf %560, %587 : vector<16x32xf32>
    %589 = tpu.concatenate %473, %588 in 0 : vector<16x32xf32>, vector<16x32xf32> -> vector<32x32xf32>
    %c1_178 = arith.constant 1 : index
    %c0_179 = arith.constant 0 : index
    %c0_180 = arith.constant 0 : index
    %590 = vector.load %arg5[%c1_178, %c0_179, %c0_180] : memref<2x1x32xf32, #tpu.memory_space<vmem>>, vector<1x1x32xf32>
    %591 = vector.shape_cast %590 : vector<1x1x32xf32> to vector<1x32xf32>
    %592 = vector.broadcast %591 : vector<1x32xf32> to vector<32x32xf32>
    %593 = arith.addf %589, %592 : vector<32x32xf32>
    %594 = arith.addf %318, %593 : vector<32x32xf32>
    %c1_181 = arith.constant 1 : index
    %c0_182 = arith.constant 0 : index
    %c0_183 = arith.constant 0 : index
    %595 = vector.load %arg8[%c1_181, %c0_182, %c0_183] : memref<2x1x32xf32, #tpu.memory_space<vmem>>, vector<1x1x32xf32>
    %596 = vector.shape_cast %595 : vector<1x1x32xf32> to vector<1x32xf32>
    %c1_184 = arith.constant 1 : index
    %c0_185 = arith.constant 0 : index
    %c0_186 = arith.constant 0 : index
    %597 = vector.load %arg9[%c1_184, %c0_185, %c0_186] : memref<2x1x32xf32, #tpu.memory_space<vmem>>, vector<1x1x32xf32>
    %598 = vector.shape_cast %597 : vector<1x1x32xf32> to vector<1x32xf32>
    %cst_187 = arith.constant dense<0.000000e+00> : vector<32xf32>
    %599 = vector.multi_reduction <add>, %594, %cst_187 [1] : vector<32x32xf32> to vector<32xf32>
    %600 = vector.shape_cast %599 : vector<32xf32> to vector<32x1xf32>
    %cst_188 = arith.constant 3.200000e+01 : f32
    %601 = vector.broadcast %cst_188 : f32 to vector<32x1xf32>
    %602 = arith.divf %600, %601 : vector<32x1xf32>
    %603 = vector.broadcast %602 : vector<32x1xf32> to vector<32x32xf32>
    %604 = arith.subf %594, %603 : vector<32x32xf32>
    %605 = arith.mulf %604, %604 : vector<32x32xf32>
    %cst_189 = arith.constant dense<0.000000e+00> : vector<32xf32>
    %606 = vector.multi_reduction <add>, %605, %cst_189 [1] : vector<32x32xf32> to vector<32xf32>
    %607 = vector.shape_cast %606 : vector<32xf32> to vector<32x1xf32>
    %cst_190 = arith.constant 3.200000e+01 : f32
    %608 = vector.broadcast %cst_190 : f32 to vector<32x1xf32>
    %609 = arith.divf %607, %608 : vector<32x1xf32>
    %610 = vector.broadcast %602 : vector<32x1xf32> to vector<32x32xf32>
    %611 = arith.subf %594, %610 : vector<32x32xf32>
    %cst_191 = arith.constant 9.99999997E-7 : f32
    %612 = vector.broadcast %cst_191 : f32 to vector<32x1xf32>
    %613 = arith.addf %609, %612 : vector<32x1xf32>
    %614 = math.rsqrt %613 : vector<32x1xf32>
    %615 = vector.broadcast %614 : vector<32x1xf32> to vector<32x32xf32>
    %616 = arith.mulf %611, %615 : vector<32x32xf32>
    %617 = vector.broadcast %596 : vector<1x32xf32> to vector<32x32xf32>
    %618 = arith.mulf %616, %617 : vector<32x32xf32>
    %619 = vector.broadcast %598 : vector<1x32xf32> to vector<32x32xf32>
    %620 = arith.addf %618, %619 : vector<32x32xf32>
    %621 = arith.truncf %620 : vector<32x32xf32> to vector<32x32xbf16>
    %cst_192 = arith.constant dense<0.000000e+00> : vector<32x128xf32>
    %622 = tpu.matmul %621, %324, %cst_192 {dimension_numbers = #tpu.dot_dimension_numbers<[1], [0], [0], [1], [0, 0, 1, 1], [], []>} : vector<32x32xbf16>, vector<32x128xbf16>, vector<32x128xf32> -> vector<32x128xf32>
    %c1_193 = arith.constant 1 : index
    %c0_194 = arith.constant 0 : index
    %c0_195 = arith.constant 0 : index
    %623 = vector.load %arg11[%c1_193, %c0_194, %c0_195] : memref<2x1x128xf32, #tpu.memory_space<vmem>>, vector<1x1x128xf32>
    %624 = vector.shape_cast %623 : vector<1x1x128xf32> to vector<1x128xf32>
    %625 = vector.broadcast %624 : vector<1x128xf32> to vector<32x128xf32>
    %626 = arith.addf %622, %625 : vector<32x128xf32>
    %cst_196 = arith.constant 0.000000e+00 : f32
    %627 = vector.broadcast %cst_196 : f32 to vector<32x128xf32>
    %628 = arith.maximumf %626, %627 : vector<32x128xf32>
    %629 = arith.truncf %628 : vector<32x128xf32> to vector<32x128xbf16>
    %cst_197 = arith.constant dense<0.000000e+00> : vector<32x32xf32>
    %630 = tpu.matmul %629, %326, %cst_197 {dimension_numbers = #tpu.dot_dimension_numbers<[1], [0], [0], [1], [0, 0, 1, 1], [], []>} : vector<32x128xbf16>, vector<128x32xbf16>, vector<32x32xf32> -> vector<32x32xf32>
    %631 = arith.addf %594, %630 : vector<32x32xf32>
    %c1_198 = arith.constant 1 : index
    %c0_199 = arith.constant 0 : index
    %c0_200 = arith.constant 0 : index
    %632 = vector.load %arg13[%c1_198, %c0_199, %c0_200] : memref<2x1x32xf32, #tpu.memory_space<vmem>>, vector<1x1x32xf32>
    %633 = vector.shape_cast %632 : vector<1x1x32xf32> to vector<1x32xf32>
    %634 = vector.broadcast %633 : vector<1x32xf32> to vector<32x32xf32>
    %635 = arith.addf %631, %634 : vector<32x32xf32>
    %636 = vector.extract_strided_slice %635 {offsets = [0, 0], sizes = [1, 32], strides = [1, 1]} : vector<32x32xf32> to vector<1x32xf32>
    %637 = vector.extract_strided_slice %635 {offsets = [16, 0], sizes = [1, 32], strides = [1, 1]} : vector<32x32xf32> to vector<1x32xf32>
    %638 = tpu.concatenate %636, %637 in 0 : vector<1x32xf32>, vector<1x32xf32> -> vector<2x32xf32>
    %c0_201 = arith.constant 0 : index
    %c0_202 = arith.constant 0 : index
    %639 = vector.load %arg14[%c0_201, %c0_202] : memref<1x32xf32, #tpu.memory_space<vmem>>, vector<1x32xf32>
    %c0_203 = arith.constant 0 : index
    %c0_204 = arith.constant 0 : index
    %640 = vector.load %arg15[%c0_203, %c0_204] : memref<1x32xf32, #tpu.memory_space<vmem>>, vector<1x32xf32>
    %cst_205 = arith.constant dense<0.000000e+00> : vector<2xf32>
    %641 = vector.multi_reduction <add>, %638, %cst_205 [1] : vector<2x32xf32> to vector<2xf32>
    %642 = vector.shape_cast %641 : vector<2xf32> to vector<2x1xf32>
    %cst_206 = arith.constant 3.200000e+01 : f32
    %643 = vector.broadcast %cst_206 : f32 to vector<2x1xf32>
    %644 = arith.divf %642, %643 : vector<2x1xf32>
    %645 = vector.broadcast %644 : vector<2x1xf32> to vector<2x32xf32>
    %646 = arith.subf %638, %645 : vector<2x32xf32>
    %647 = arith.mulf %646, %646 : vector<2x32xf32>
    %cst_207 = arith.constant dense<0.000000e+00> : vector<2xf32>
    %648 = vector.multi_reduction <add>, %647, %cst_207 [1] : vector<2x32xf32> to vector<2xf32>
    %649 = vector.shape_cast %648 : vector<2xf32> to vector<2x1xf32>
    %cst_208 = arith.constant 3.200000e+01 : f32
    %650 = vector.broadcast %cst_208 : f32 to vector<2x1xf32>
    %651 = arith.divf %649, %650 : vector<2x1xf32>
    %652 = vector.broadcast %644 : vector<2x1xf32> to vector<2x32xf32>
    %653 = arith.subf %638, %652 : vector<2x32xf32>
    %cst_209 = arith.constant 9.99999997E-7 : f32
    %654 = vector.broadcast %cst_209 : f32 to vector<2x1xf32>
    %655 = arith.addf %651, %654 : vector<2x1xf32>
    %656 = math.rsqrt %655 : vector<2x1xf32>
    %657 = vector.broadcast %656 : vector<2x1xf32> to vector<2x32xf32>
    %658 = arith.mulf %653, %657 : vector<2x32xf32>
    %659 = vector.broadcast %639 : vector<1x32xf32> to vector<2x32xf32>
    %660 = arith.mulf %658, %659 : vector<2x32xf32>
    %661 = vector.broadcast %640 : vector<1x32xf32> to vector<2x32xf32>
    %662 = arith.addf %660, %661 : vector<2x32xf32>
    %c0_210 = arith.constant 0 : index
    %c0_211 = arith.constant 0 : index
    %663 = vector.load %arg16[%c0_210, %c0_211] : memref<32x3xf32, #tpu.memory_space<vmem>>, vector<32x3xf32>
    %cst_212 = arith.constant dense<0.000000e+00> : vector<2x3xf32>
    %664 = tpu.matmul %662, %663, %cst_212 {dimension_numbers = #tpu.dot_dimension_numbers<[1], [0], [0], [1], [0, 0, 1, 1], [], []>} : vector<2x32xf32>, vector<32x3xf32>, vector<2x3xf32> -> vector<2x3xf32>
    %c0_213 = arith.constant 0 : index
    %c0_214 = arith.constant 0 : index
    %665 = vector.load %arg17[%c0_213, %c0_214] : memref<1x3xf32, #tpu.memory_space<vmem>>, vector<1x3xf32>
    %666 = vector.broadcast %665 : vector<1x3xf32> to vector<2x3xf32>
    %667 = arith.addf %664, %666 : vector<2x3xf32>
    %cst_215 = arith.constant dense<0xFF800000> : vector<2xf32>
    %668 = vector.multi_reduction <maximumf>, %667, %cst_215 [1] : vector<2x3xf32> to vector<2xf32>
    %669 = vector.shape_cast %668 : vector<2xf32> to vector<2x1xf32>
    %670 = vector.broadcast %669 : vector<2x1xf32> to vector<2x3xf32>
    %671 = arith.subf %667, %670 : vector<2x3xf32>
    %672 = math.exp %671 : vector<2x3xf32>
    %cst_216 = arith.constant dense<0.000000e+00> : vector<2xf32>
    %673 = vector.multi_reduction <add>, %672, %cst_216 [1] : vector<2x3xf32> to vector<2xf32>
    %674 = vector.shape_cast %673 : vector<2xf32> to vector<2x1xf32>
    %675 = math.log %674 : vector<2x1xf32>
    %676 = vector.broadcast %675 : vector<2x1xf32> to vector<2x3xf32>
    %677 = arith.subf %671, %676 : vector<2x3xf32>
    %c0_217 = arith.constant 0 : index
    %c0_218 = arith.constant 0 : index
    %678 = vector.load %arg18[%c0_217, %c0_218] : memref<2x3xf32, #tpu.memory_space<vmem>>, vector<2x3xf32>
    tpu.vector_store %arg18[%c0_217, %c0_218], %677 {strides = array<i32>} : memref<2x3xf32, #tpu.memory_space<vmem>>, vector<2x3xf32>,
    return
  }
}

</mosaic_0001>

<bundles_post_ra>
// kernel: classifier_forward.1
= control target key start
LH: loop header
LB: loop body
LE: loop exit
PB: predicated region body
PF: predicated region fallthrough
CT: control target
= control target key end

     0   :  { %s3826_s0 = inlined_call_operand.vmem [shape: f32[32,32], index: 0, kind: input, shape index: {}]   ;;  %s3827_s1 = inlined_call_operand.vmem [shape: f32[2,16], index: 1, kind: input, shape index: {}]   ;;  %s3828_s2 = inlined_call_operand.vmem [shape: bf16[2,32,96], index: 2, kind: input, shape index: {}]   ;;  %s3829_s3 = inlined_call_operand.vmem [shape: f32[2,1,96], index: 3, kind: input, shape index: {}]   ;;  %s3830_s4 = inlined_call_operand.vmem [shape: bf16[2,32,32], index: 4, kind: input, shape index: {}]   ;;  %s3831_s5 = inlined_call_operand.vmem [shape: f32[2,1,32], index: 5, kind: input, shape index: {}]   ;;  %s3832_s6 = inlined_call_operand.vmem [shape: f32[2,1,32], index: 6, kind: input, shape index: {}]   ;;  %s3833_s7 = inlined_call_operand.vmem [shape: f32[2,1,32], index: 7, kind: input, shape index: {}]   ;;  %s3834_s8 = inlined_call_operand.vmem [shape: f32[2,1,32], index: 8, kind: input, shape index: {}]   ;;  %s3835_s9 = inlined_call_operand.vmem [shape: f32[2,1,32], index: 9, kind: input, shape index: {}]   ;;  %s3836_s10 = inlined_call_operand.vmem [shape: bf16[2,32,128], index: 10, kind: input, shape index: {}]   ;;  %s3837_s11 = inlined_call_operand.vmem [shape: f32[2,1,128], index: 11, kind: input, shape index: {}]   ;;  %s3838_s12 = inlined_call_operand.vmem [shape: bf16[2,128,32], index: 12, kind: input, shape index: {}]   ;;  %s3839_s13 = inlined_call_operand.vmem [shape: f32[2,1,32], index: 13, kind: input, shape index: {}]   ;;  %s3840_s14 = inlined_call_operand.vmem [shape: f32[1,32], index: 14, kind: input, shape index: {}]   ;;  %s3841_s15 = inlined_call_operand.vmem [shape: f32[1,32], index: 15, kind: input, shape index: {}]   ;;  %s3842_s16 = inlined_call_operand.vmem [shape: f32[32,3], index: 16, kind: input, shape index: {}]   ;;  %s3843_s17 = inlined_call_operand.vmem [shape: f32[1,3], index: 17, kind: input, shape index: {}]   ;;  %s3844_s18 = inlined_call_operand.hbm [shape: f32[2,3], index: 18, kind: output, shape index: {}]  }
   0x1   :  { %3857 = sst [smem:[#allocation5_spill]] %s3826_s0 }
   0x2   :  { %3858 = sst [smem:[#allocation6_spill]] %s3827_s1 }
   0x3   :  { %3859 = sst [smem:[#allocation7_spill]] %s3828_s2 }
   0x4   :  { %s3860_s29 = sld [smem:[#allocation5_spill]]  ;;  %vm96_vm0 = vcmask 261120  }
   0xa   :  { %v3037_v0 = vld [vmem:[%s3860_s29] sm:$0xff]  ;;  %v62_v2 = vld [vmem:[%s3860_s29 + $0x8] sm:$0xff] }
   0xb   :  { %v97_v1 = vsel %vm96_vm0, %v3037_v0, 0.0  ;;  %v100_v3 = vsel %vm96_vm0, %v62_v2, 0.0 }
   0xc   :  { %98 = vadd.xlane.f32.xlu0 %v97_v1 }
   0xd   :  { %23 = vsyncpa [#allocation3], 0  ;;  %v2926_v4 = vmov 32.0   ;;  %s3861_s20 = sld [smem:[#allocation7_spill]]  ;;  %v3063_v42 = vld [vmem:[%s3832_s6] ss:$0 sm:$0xff] }
   0xe   :  { %2731 = vrcp.f32 %v2926_v4  ;;  %v3069_v47 = vld [vmem:[%s3833_s7] ss:$0 sm:$0xff]  ;;  %s2927_s28 = smov 120   ;;  %s2928_s30 = smov 96   ;;  %vm253_vm8 = vcmask 64512   ;;  %vm279_vm9 = vcmask 130048  }
   0xf   :  { %v3078_v53 = vld [vmem:[%s3829_s3] ss:$0 sm:$0xff]  ;;  %s2929_s0 = smov 88   ;;  %s3862_s21 = sld [smem:[#allocation6_spill]]  ;;  %vm399_vm10 = vcmask 1043456  }
  0x10   :  { %s3853_s22 = smov 64   ;;  %s2931_s2 = smov 112  }
  0x11   :  { %s2932_s23 = smov 56   ;;  %s2933_s24 = smov 80  }
  0x12   :  { %s3855_s25 = smov 48   ;;  %s3851_s19 = smov 72  }
  0x13   :  { %v2676_v21 = vld [vmem:[%s3861_s20 + $0x8] sm:$0xff]  ;;  %v2675_v23 = vld [vmem:[%s3861_s20] sm:$0xff]  ;;  %s3849_s1 = smov 104   ;;  %s3847_s27 = smov 40  }
  0x14   :  { %101 = vadd.xlane.f32.xlu0 %v100_v3  ;;  %v2732_v5 = vpop.eup %2731  ;;  %236 = vmatpush.bf16.msra.mxu0 %v2676_v21 }
  0x15   :  { %v110_v6 = vmul.f32 32.0, %v2732_v5  ;;  %vm114_vm1 = vweird.f32 %v2732_v5  ;;  %v3098_v63 = vld [vmem:[%s3862_s21] sm:$0x3] }
  0x16   :  { %v3101_v1 = vperm.slane %v3098_v63, 0 }
  0x17   :  { %v111_v7 = vsub.f32 1.0, %v110_v6 }
  0x18   :  { %237 = vmatpush.bf16.msra.mxu0 %v2675_v23 }
  0x19   :  { %v112_v8 = vmul.f32 %v2732_v5, %v111_v7 }
  0x1b   :  { %v113_v9 = vadd.f32 %v2732_v5, %v112_v8 }
  0x1d   :  { %v3045_v10 = vsel %vm114_vm1, %v2732_v5, %v113_v9 }
  0x7f   :  { %v99_v11 = vpop.xlane.xlu0 %98 }
  0x80   :  { %v116_v12 = vmul.f32 %v3045_v10, %v99_v11 }
  0x82   :  { %v120_v13 = vsub.f32 %v3037_v0, %v116_v12 }
  0x84   :  { %v124_v14 = vmul.f32 %v120_v13, %v120_v13 }
  0x86   :  { %v128_v15 = vsel %vm96_vm0, %v124_v14, 0.0 }
  0x87   :  { %129 = vadd.xlane.f32.xlu1 %v128_v15  ;;  %v102_v16 = vpop.xlane.xlu0 %101 }
  0x88   :  { %v117_v17 = vmul.f32 %v3045_v10, %v102_v16 }
  0x8a   :  { %v121_v18 = vsub.f32 %v62_v2, %v117_v17 }
  0x8c   :  { %v125_v19 = vmul.f32 %v121_v18, %v121_v18 }
  0x8e   :  { %v131_v20 = vsel %vm96_vm0, %v125_v19, 0.0 }
  0x8f   :  { %132 = vadd.xlane.f32.xlu1 %v131_v20 }
  0xfa   :  { %v130_v22 = vpop.xlane.xlu1 %129 }
  0xfb   :  { %v140_v24 = vmul.f32 %v130_v22, %v3045_v10 }
  0xfd   :  { %v144_v25 = vadd.f32 1e-06, %v140_v24 }
  0xff   :  { %2733 = vrsqrt.f32 %v144_v25  ;;  %vm154_vm3 = vweird.f32 %v144_v25 }
 0x102   :  { %v133_v26 = vpop.xlane.xlu1 %132 }
 0x103   :  { %v141_v27 = vmul.f32 %v133_v26, %v3045_v10 }
 0x105   :  { %v2734_v28 = vpop.eup %2733  ;;  %v145_v29 = vadd.f32 1e-06, %v141_v27 }
 0x106   :  { %v149_v30 = vmul.f32 %v2734_v28, %v144_v25  ;;  %vm155_vm2 = vweird.f32 %v2734_v28 }
 0x107   :  { %2735 = vrsqrt.f32 %v145_v29  ;;  %vm156_vm4 = vmor %vm154_vm3, %vm155_vm2  ;;  %vm164_vm6 = vweird.f32 %v145_v29 }
 0x108   :  { %v150_v31 = vmul.f32 %v2734_v28, %v149_v30 }
 0x10a   :  { %v151_v32 = vmul.f32 0.5, %v150_v31 }
 0x10c   :  { %v152_v33 = vsub.f32 1.5, %v151_v32 }
 0x10d   :  { %v2736_v34 = vpop.eup %2735 }
 0x10e   :  { %v153_v35 = vmul.f32 %v2734_v28, %v152_v33  ;;  %v159_v36 = vmul.f32 %v2736_v34, %v145_v29  ;;  %vm165_vm5 = vweird.f32 %v2736_v34 }
 0x10f   :  { %vm166_vm7 = vmor %vm164_vm6, %vm165_vm5 }
 0x110   :  { %v160_v37 = vmul.f32 %v2736_v34, %v159_v36  ;;  %v157_v38 = vsel %vm156_vm4, %v2734_v28, %v153_v35 }
 0x111   :  { %v188_v41 = vmul.f32 %v157_v38, %v120_v13 }
 0x112   :  { %v161_v39 = vmul.f32 0.5, %v160_v37 }
 0x113   :  { %v195_v46 = vmul.f32 %v3063_v42, %v188_v41 }
 0x114   :  { %v162_v40 = vsub.f32 1.5, %v161_v39 }
 0x115   :  { %v202_v49 = vadd.f32 %v3069_v47, %v195_v46 }
 0x116   :  { %v163_v43 = vmul.f32 %v2736_v34, %v162_v40  ;;  %v3126_v40 = vld [vmem:[%s3860_s29 + $0x18] sm:$0xff] }
 0x117   :  { %v106_v41 = vsel %vm96_vm0, %v3126_v40, 0.0 }
 0x118   :  { %v167_v44 = vsel %vm166_vm7, %v2736_v34, %v163_v43 }
 0x119   :  { %v189_v45 = vmul.f32 %v167_v44, %v121_v18 }
 0x11b   :  { %v196_v48 = vmul.f32 %v3063_v42, %v189_v45 }
 0x11d   :  { %v203_v50 = vadd.f32 %v3069_v47, %v196_v48 }
 0x11f   :  { %v206_v51 = vpack.c.bf16 %v203_v50, %v202_v49 }
 0x121   :  { %2494 = vmatmul.msk.bf16.vlgmr.msra.gmra.mxu0 %vm96_vm0, %v206_v51 }
 0x19e   :  { %v239_v52 = vpop.f32.mrf.mxu0 }
 0x19f   :  { %v240_v55 = vadd.f32 %v3078_v53, %v239_v52  ;;  %v3134_v52 = vld [vmem:[%s3860_s29 + $0x10] sm:$0xff] }
 0x1a6   :  { %v241_v54 = vpop.f32.mrf.mxu0 }
 0x1a7   :  { %v242_v56 = vadd.f32 %v3078_v53, %v241_v54  ;;  %v103_v54 = vsel %vm96_vm0, %v3134_v52, 0.0 }
 0x1a9   :  { %v3082_v57 = vpack.c.bf16 %v242_v56, %v240_v55 }
 0x1ab   :  { %324 = vrot.lane.b32.xlu0 %v3082_v57, %s2927_s28  ;;  %251 = vrot.lane.b32.xlu2 %v3082_v57, %s2928_s30 }
 0x1b3   :  { %326 = vrot.lane.b32.xlu2 %v3082_v57, %s2929_s0 }
 0x205   :  { %v252_v58 = vpop.permute.xlu2 %251 }
 0x206   :  { %v258_v59 = vsel %vm253_vm8, %v252_v58, 0 }
 0x207   :  { %267 = vmatpush.bf16.xpose.msra.mxu1 %v258_v59 }
 0x20d   :  { %v327_v60 = vpop.permute.xlu2 %326 }
 0x20e   :  { %2496 = vmatmul.msk.bf16.vlgmr.msra.gmra.mxu1 %vm253_vm8, %v3082_v57  ;;  %v332_v61 = vsel %vm253_vm8, %v327_v60, 0 }
 0x20f   :  { %341 = vmatpush.bf16.xpose.msra.mxu3 %v332_v61 }
 0x21d   :  { %v325_v62 = vpop.permute.xlu0 %324 }
 0x21e   :  { %2498 = vmatmul.msk.bf16.vlgmr.msra.gmra.mxu3 %vm253_vm8, %v325_v62 }
 0x28b   :  { %v269_v2 = vpop.f32.mrf.mxu1 }
 0x28c   :  { %v274_v3 = vmul.f32 0.35355338, %v269_v2 }
 0x28e   :  { %v277_v4 = vadd.f32 %v3101_v1, %v274_v3 }
 0x290   :  { %v280_v5 = vsel %vm279_vm9, %v277_v4, -inf }
 0x291   :  { %281 = vmax.xlane.f32.xlu1 %v280_v5 }
 0x293   :  { %v271_v6 = vpop.f32.mrf.mxu1 }
 0x294   :  { %v275_v7 = vmul.f32 0.35355338, %v271_v6 }
 0x296   :  { %v278_v8 = vadd.f32 %v3101_v1, %v275_v7 }
 0x298   :  { %v283_v9 = vsel %vm279_vm9, %v278_v8, -inf }
 0x299   :  { %284 = vmax.xlane.f32.xlu2 %v283_v9 }
 0x2a1   :  { %v343_v11 = vpop.f32.mrf.mxu3 }
 0x2a2   :  { %v348_v12 = vmul.f32 0.35355338, %v343_v11  ;;  %v70_v11 = vld [vmem:[%s3830_s4] sm:$0xf] }
 0x2a4   :  { %v350_v13 = vadd.f32 %v348_v12, %v3101_v1  ;;  %v3152_v12 = vsel %vm399_vm10, %v70_v11, 0 }
 0x2a5   :  { %430 = vmatpush.bf16.msrb.mxu3 %v3152_v12 }
 0x2a6   :  { %v352_v14 = vsel %vm279_vm9, %v350_v13, -inf }
 0x2a7   :  { %353 = vmax.xlane.f32.xlu1 %v352_v14 }
 0x2a9   :  { %v345_v15 = vpop.f32.mrf.mxu3 }
 0x2aa   :  { %v349_v16 = vmul.f32 0.35355338, %v345_v15 }
 0x2ac   :  { %v351_v17 = vadd.f32 %v349_v16, %v3101_v1 }
 0x2ae   :  { %v355_v18 = vsel %vm279_vm9, %v351_v17, -inf }
 0x2af   :  { %356 = vmax.xlane.f32.xlu1 %v355_v18 }
 0x2c8   :  { %303 = vrot.lane.b32.xlu1 %v3082_v57, %s3853_s22 }
 0x304   :  { %v282_v19 = vpop.xlane.xlu1 %281 }
 0x305   :  { %v286_v20 = vsub.f32 %v277_v4, %v282_v19 }
 0x307   :  { %v288_v21 = vmul.f32 1.442695, %v286_v20 }
 0x309   :  { %2737 = vpow2.f32 %v288_v21 }
 0x30c   :  { %v285_v22 = vpop.xlane.xlu2 %284 }
 0x30d   :  { %v287_v23 = vsub.f32 %v278_v8, %v285_v22 }
 0x30f   :  { %v2738_v24 = vpop.eup %2737  ;;  %v290_v25 = vmul.f32 1.442695, %v287_v23 }
 0x310   :  { %v292_v26 = vsel %vm279_vm9, %v2738_v24, 0.0 }
 0x311   :  { %2739 = vpow2.f32 %v290_v25  ;;  %293 = vadd.xlane.f32.xlu0 %v292_v26 }
 0x317   :  { %v2740_v27 = vpop.eup %2739 }
 0x318   :  { %v295_v28 = vsel %vm279_vm9, %v2740_v27, 0.0 }
 0x319   :  { %296 = vadd.xlane.f32.xlu1 %v295_v28 }
 0x31a   :  { %v354_v29 = vpop.xlane.xlu1 %353 }
 0x31b   :  { %v358_v30 = vsub.f32 %v350_v13, %v354_v29  ;;  %v71_v13 = vld [vmem:[%s3830_s4 + $0x4] sm:$0xf] }
 0x31c   :  { %v3161_v14 = vsel %vm399_vm10, %v71_v13, 0 }
 0x31d   :  { %v360_v31 = vmul.f32 1.442695, %v358_v30  ;;  %410 = vmatpush.bf16.msrb.mxu1 %v3161_v14 }
 0x31f   :  { %2741 = vpow2.f32 %v360_v31 }
 0x322   :  { %v357_v32 = vpop.xlane.xlu1 %356 }
 0x323   :  { %v359_v33 = vsub.f32 %v351_v17, %v357_v32 }
 0x325   :  { %v2742_v34 = vpop.eup %2741  ;;  %v362_v35 = vmul.f32 1.442695, %v359_v33  ;;  %437 = vrot.lane.b32.xlu0 %v3082_v57, %s2931_s2 }
 0x326   :  { %v364_v36 = vsel %vm279_vm9, %v2742_v34, 0.0 }
 0x327   :  { %2743 = vpow2.f32 %v362_v35  ;;  %365 = vadd.xlane.f32.xlu2 %v364_v36 }
 0x32d   :  { %v2744_v37 = vpop.eup %2743 }
 0x32e   :  { %v367_v38 = vsel %vm279_vm9, %v2744_v37, 0.0 }
 0x32f   :  { %368 = vadd.xlane.f32.xlu2 %v367_v38 }
 0x332   :  { %375 = vrot.lane.b32.xlu1 %v3082_v57, %s2932_s23 }
 0x33a   :  { %v304_v39 = vpop.permute.xlu1 %303 }
 0x33b   :  { %316 = vmatpush.bf16.msra.mxu2 %v304_v39 }
 0x347   :  { %439 = vrot.lane.b32.xlu2 %v3082_v57, %s2933_s24 }
 0x35c   :  { %104 = vadd.xlane.f32.xlu1 %v103_v54 }
 0x370   :  { %107 = vadd.xlane.f32.xlu2 %v106_v41 }
 0x384   :  { %v294_v43 = vpop.xlane.xlu0 %293 }
 0x385   :  { %2745 = vrcp.f32 %v294_v43 }
 0x38b   :  { %v2746_v45 = vpop.eup %2745 }
 0x38c   :  { %v297_v44 = vpop.xlane.xlu1 %296  ;;  %v300_v48 = vmul.f32 %v2746_v45, %v2738_v24 }
 0x38d   :  { %2747 = vrcp.f32 %v297_v44 }
 0x393   :  { %v2748_v46 = vpop.eup %2747 }
 0x394   :  { %v301_v49 = vmul.f32 %v2748_v46, %v2740_v27 }
 0x396   :  { %v302_v50 = vpack.c.bf16 %v301_v49, %v300_v48 }
 0x397   :  { %v438_v4 = vpop.permute.xlu0 %437 }
 0x398   :  { %2497 = vmatmul.msk.bf16.vlgmr.msra.gmra.mxu2 %vm279_vm9, %v302_v50 }
 0x39a   :  { %v366_v51 = vpop.xlane.xlu2 %365 }
 0x39b   :  { %2749 = vrcp.f32 %v366_v51 }
 0x3a1   :  { %v2750_v58 = vpop.eup %2749 }
 0x3a2   :  { %v369_v55 = vpop.xlane.xlu2 %368  ;;  %v372_v60 = vmul.f32 %v2750_v58, %v2742_v34 }
 0x3a3   :  { %2751 = vrcp.f32 %v369_v55 }
 0x3a4   :  { %v376_v56 = vpop.permute.xlu1 %375 }
 0x3a5   :  { %388 = vmatpush.bf16.msrb.mxu2 %v376_v56 }
 0x3a9   :  { %v2752_v59 = vpop.eup %2751 }
 0x3aa   :  { %v373_v61 = vmul.f32 %v2752_v59, %v2744_v37  ;;  %v440_v62 = vpop.permute.xlu2 %439 }
 0x3ab   :  { %v445_v2 = vsel %vm253_vm8, %v440_v62, 0 }
 0x3ac   :  { %454 = vmatpush.bf16.xpose.msra.mxu2 %v445_v2  ;;  %v374_v3 = vpack.c.bf16 %v373_v61, %v372_v60 }
 0x3ae   :  { %2499 = vmatmul.msk.bf16.vlgmr.msrb.gmra.mxu2 %vm279_vm9, %v374_v3 }
 0x3be   :  { %2502 = vmatmul.msk.bf16.vlgmr.msra.gmra.mxu2 %vm253_vm8, %v438_v4 }
 0x3cf   :  { %v105_v24 = vpop.xlane.xlu1 %104 }
 0x3d0   :  { %v118_v26 = vmul.f32 %v3045_v10, %v105_v24 }
 0x3d2   :  { %v122_v29 = vsub.f32 %v3134_v52, %v118_v26 }
 0x3d4   :  { %v126_v32 = vmul.f32 %v122_v29, %v122_v29 }
 0x3d6   :  { %v134_v33 = vsel %vm96_vm0, %v126_v32, 0.0 }
 0x3e3   :  { %v108_v5 = vpop.xlane.xlu2 %107 }
 0x3e4   :  { %v119_v6 = vmul.f32 %v3045_v10, %v108_v5 }
 0x3e6   :  { %v3143_v7 = vsub.f32 %v3126_v40, %v119_v6 }
 0x3e8   :  { %v127_v8 = vmul.f32 %v3143_v7, %v3143_v7 }
 0x3ea   :  { %v137_v9 = vsel %vm96_vm0, %v127_v8, 0.0 }
 0x3eb   :  { %138 = vadd.xlane.f32.xlu2 %v137_v9 }
 0x403   :  { %488 = vrot.lane.b32.xlu2 %v3082_v57, %s3855_s25 }
 0x41b   :  { %v318_v15 = vpop.f32.mrf.mxu2 }
 0x423   :  { %v320_v16 = vpop.f32.mrf.mxu2 }
 0x424   :  { %v323_v17 = vpack.c.bf16 %v320_v16, %v318_v15 }
 0x426   :  { %2501 = vmatmul.msk.bf16.vlgmr.msrb.gmra.mxu3 %vm253_vm8, %v323_v17 }
 0x431   :  { %v390_v18 = vpop.f32.mrf.mxu2 }
 0x439   :  { %v392_v19 = vpop.f32.mrf.mxu2 }
 0x43a   :  { %v395_v20 = vpack.c.bf16 %v392_v19, %v390_v18 }
 0x43c   :  { %2500 = vmatmul.msk.bf16.vlgmr.msrb.gmra.mxu1 %vm253_vm8, %v395_v20 }
 0x441   :  { %v456_v21 = vpop.f32.mrf.mxu2 }
 0x442   :  { %v461_v22 = vmul.f32 0.35355338, %v456_v21 }
 0x444   :  { %v463_v23 = vadd.f32 %v461_v22, %v3101_v1 }
 0x446   :  { %v465_v25 = vsel %vm279_vm9, %v463_v23, -inf }
 0x447   :  { %466 = vmax.xlane.f32.xlu0 %v465_v25 }
 0x449   :  { %v458_v27 = vpop.f32.mrf.mxu2 }
 0x44a   :  { %v462_v28 = vmul.f32 0.35355338, %v458_v27 }
 0x44c   :  { %v464_v30 = vadd.f32 %v462_v28, %v3101_v1 }
 0x44e   :  { %v468_v31 = vsel %vm279_vm9, %v464_v30, -inf }
 0x44f   :  { %469 = vmax.xlane.f32.xlu1 %v468_v31 }
 0x457   :  { %135 = vadd.xlane.f32.xlu1 %v134_v33 }
 0x45e   :  { %v139_v34 = vpop.xlane.xlu2 %138 }
 0x45f   :  { %v143_v36 = vmul.f32 %v139_v34, %v3045_v10 }
 0x461   :  { %v147_v37 = vadd.f32 1e-06, %v143_v36  ;;  %v72_v36 = vld [vmem:[%s3830_s4 + $0x8] sm:$0xf] }
 0x463   :  { %2753 = vrsqrt.f32 %v147_v37  ;;  %vm184_vm11 = vweird.f32 %v147_v37 }
 0x466   :  { %v489_v35 = vpop.permute.xlu2 %488 }
 0x467   :  { %501 = vmatpush.bf16.msrb.mxu2 %v489_v35 }
 0x469   :  { %v2754_v48 = vpop.eup %2753 }
 0x46a   :  { %v179_v54 = vmul.f32 %v2754_v48, %v147_v37  ;;  %vm185_vm12 = vweird.f32 %v2754_v48  ;;  %v513_v37 = vsel %vm399_vm10, %v72_v36, 0 }
 0x46b   :  { %vm186_vm13 = vmor %vm184_vm11, %vm185_vm12  ;;  %522 = vmatpush.bf16.msra.mxu1 %v513_v37 }
 0x46c   :  { %v180_v56 = vmul.f32 %v2754_v48, %v179_v54 }
 0x46e   :  { %v181_v62 = vmul.f32 0.5, %v180_v56 }
 0x470   :  { %v182_v3 = vsub.f32 1.5, %v181_v62 }
 0x472   :  { %v183_v5 = vmul.f32 %v2754_v48, %v182_v3 }
 0x474   :  { %v187_v9 = vsel %vm186_vm13, %v2754_v48, %v183_v5 }
 0x475   :  { %v191_v15 = vmul.f32 %v187_v9, %v3143_v7 }
 0x477   :  { %v198_v19 = vmul.f32 %v3063_v42, %v191_v15 }
 0x479   :  { %v205_v22 = vadd.f32 %v3069_v47, %v198_v19 }
 0x4a9   :  { %v432_v38 = vpop.f32.mrf.mxu3 }
 0x4b9   :  { %v412_v39 = vpop.f32.mrf.mxu1 }
 0x4ba   :  { %v3174_v41 = vadd.f32 %v432_v38, %v412_v39  ;;  %v467_v43 = vpop.xlane.xlu0 %466 }
 0x4bb   :  { %v471_v44 = vsub.f32 %v463_v23, %v467_v43 }
 0x4bd   :  { %v473_v45 = vmul.f32 1.442695, %v471_v44 }
 0x4bf   :  { %2755 = vpow2.f32 %v473_v45 }
 0x4c1   :  { %v3207_v45 = vpop.f32.mrf.mxu1 }
 0x4c2   :  { %v470_v46 = vpop.xlane.xlu1 %469 }
 0x4c3   :  { %v472_v49 = vsub.f32 %v464_v30, %v470_v46 }
 0x4c5   :  { %v2756_v50 = vpop.eup %2755  ;;  %v475_v51 = vmul.f32 1.442695, %v472_v49 }
 0x4c6   :  { %v477_v55 = vsel %vm279_vm9, %v2756_v50, 0.0 }
 0x4c7   :  { %2757 = vpow2.f32 %v475_v51  ;;  %478 = vadd.xlane.f32.xlu1 %v477_v55 }
 0x4ca   :  { %v136_v58 = vpop.xlane.xlu1 %135 }
 0x4cb   :  { %v142_v59 = vmul.f32 %v136_v58, %v3045_v10 }
 0x4cd   :  { %v2758_v60 = vpop.eup %2757  ;;  %v146_v61 = vadd.f32 1e-06, %v142_v59 }
 0x4ce   :  { %v480_v2 = vsel %vm279_vm9, %v2758_v60, 0.0 }
 0x4cf   :  { %2759 = vrsqrt.f32 %v146_v61  ;;  %481 = vadd.xlane.f32.xlu0 %v480_v2  ;;  %vm174_vm15 = vweird.f32 %v146_v61 }
 0x4d5   :  { %v2760_v4 = vpop.eup %2759 }
 0x4d6   :  { %v169_v6 = vmul.f32 %v2760_v4, %v146_v61  ;;  %vm175_vm14 = vweird.f32 %v2760_v4 }
 0x4d7   :  { %vm176_vm1 = vmor %vm174_vm15, %vm175_vm14 }
 0x4d8   :  { %v170_v8 = vmul.f32 %v2760_v4, %v169_v6 }
 0x4da   :  { %v171_v11 = vmul.f32 0.5, %v170_v8 }
 0x4dc   :  { %v172_v13 = vsub.f32 1.5, %v171_v11 }
 0x4de   :  { %v173_v16 = vmul.f32 %v2760_v4, %v172_v13 }
 0x4e0   :  { %v177_v17 = vsel %vm176_vm1, %v2760_v4, %v173_v16 }
 0x4e1   :  { %v190_v18 = vmul.f32 %v177_v17, %v122_v29 }
 0x4e3   :  { %533 = vrot.lane.b32.xlu0 %v3082_v57, %s3851_s19  ;;  %v197_v20 = vmul.f32 %v3063_v42, %v190_v18 }
 0x4e5   :  { %v204_v21 = vadd.f32 %v3069_v47, %v197_v20 }
 0x4e7   :  { %v207_v23 = vpack.c.bf16 %v205_v22, %v204_v21 }
 0x4e9   :  { %2495 = vmatmul.msk.bf16.gmra.mxu0 %vm96_vm0, %v207_v23 }
 0x4eb   :  { %531 = vrot.lane.b32.xlu0 %v3082_v57, %s3849_s1 }
 0x53a   :  { %v479_v7 = vpop.xlane.xlu1 %478 }
 0x53b   :  { %2761 = vrcp.f32 %v479_v7 }
 0x541   :  { %v2762_v25 = vpop.eup %2761 }
 0x542   :  { %v482_v24 = vpop.xlane.xlu0 %481  ;;  %v485_v27 = vmul.f32 %v2762_v25, %v2756_v50  ;;  %v3215_v50 = vperm.slane %v3098_v63, 1  ;;  %v3229_v63 = vpop.f32.mrf.mxu3 }
 0x543   :  { %2763 = vrcp.f32 %v482_v24 }
 0x549   :  { %v2764_v26 = vpop.eup %2763 }
 0x54a   :  { %v486_v28 = vmul.f32 %v2764_v26, %v2758_v60 }
 0x54c   :  { %v487_v42 = vpack.c.bf16 %v486_v28, %v485_v27 }
 0x54e   :  { %2503 = vmatmul.msk.bf16.vlgmr.msrb.gmra.mxu2 %vm279_vm9, %v487_v42 }
 0x555   :  { %v534_v29 = vpop.permute.xlu0 %533 }
 0x556   :  { %v539_v47 = vsel %vm253_vm8, %v534_v29, 0 }
 0x557   :  { %548 = vmatpush.bf16.xpose.msra.mxu3 %v539_v47 }
 0x55d   :  { %v532_v30 = vpop.permute.xlu0 %531 }
 0x55e   :  { %2505 = vmatmul.msk.bf16.vlgmr.msra.gmra.mxu3 %vm253_vm8, %v532_v30 }
 0x566   :  { %v244_v31 = vpop.f32.mrf.mxu0 }
 0x567   :  { %v245_v33 = vadd.f32 %v3078_v53, %v244_v31 }
 0x56e   :  { %v246_v32 = vpop.f32.mrf.mxu0 }
 0x56f   :  { %v247_v34 = vadd.f32 %v3078_v53, %v246_v32 }
 0x571   :  { %v3194_v35 = vpack.c.bf16 %v247_v34, %v245_v33 }
 0x573   :  { %627 = vrot.lane.b32.xlu1 %v3194_v35, %s2928_s30 }
 0x5d1   :  { %v503_v38 = vpop.f32.mrf.mxu2 }
 0x5d9   :  { %v505_v39 = vpop.f32.mrf.mxu2 }
 0x5da   :  { %v508_v43 = vpack.c.bf16 %v505_v39, %v503_v38 }
 0x5dc   :  { %2504 = vmatmul.msk.bf16.vlgmr.msra.gmra.mxu1 %vm253_vm8, %v508_v43 }
 0x5e1   :  { %v550_v2 = vpop.f32.mrf.mxu3 }
 0x5e2   :  { %v555_v8 = vmul.f32 0.35355338, %v550_v2  ;;  %v73_v2 = vld [vmem:[%s3830_s4 + $0xc] sm:$0xf] }
 0x5e4   :  { %v557_v11 = vadd.f32 %v555_v8, %v3101_v1 }
 0x5e5   :  { %v628_v44 = vpop.permute.xlu1 %627 }
 0x5e6   :  { %v633_v53 = vsel %vm253_vm8, %v628_v44, 0  ;;  %v559_v17 = vsel %vm279_vm9, %v557_v11, -inf }
 0x5e7   :  { %642 = vmatpush.bf16.xpose.msrb.mxu1 %v633_v53 }
 0x5e9   :  { %v552_v13 = vpop.f32.mrf.mxu3 }
 0x5ea   :  { %v556_v16 = vmul.f32 0.35355338, %v552_v13 }
 0x5ec   :  { %v558_v19 = vadd.f32 %v556_v16, %v3101_v1 }
 0x5ee   :  { %2508 = vmatmul.msk.bf16.vlgmr.msrb.gmra.mxu1 %vm253_vm8, %v3194_v35  ;;  %v562_v20 = vsel %vm279_vm9, %v558_v19, -inf }
 0x5ef   :  { %780 = vmatpush.bf16.msra.mxu1 %v3161_v14 }
 0x5f3   :  { %886 = vmatpush.bf16.msrb.mxu1 %v513_v37 }
 0x659   :  { %v524_v46 = vpop.f32.mrf.mxu1 }
 0x65a   :  { %v3210_v48 = vadd.f32 %v524_v46, %v3174_v41 }
 0x661   :  { %v3212_v49 = vpop.f32.mrf.mxu1 }
 0x66b   :  { %v644_v51 = vpop.f32.mrf.mxu1 }
 0x66c   :  { %v649_v54 = vmul.f32 0.35355338, %v644_v51 }
 0x66e   :  { %v652_v55 = vadd.f32 %v3215_v50, %v649_v54 }
 0x670   :  { %v654_v14 = vsel %vm279_vm9, %v652_v55, -inf }
 0x671   :  { %655 = vmax.xlane.f32.xlu2 %v654_v14 }
 0x673   :  { %v646_v56 = vpop.f32.mrf.mxu1 }
 0x674   :  { %v650_v58 = vmul.f32 0.35355338, %v646_v56 }
 0x676   :  { %v653_v59 = vadd.f32 %v3215_v50, %v650_v58 }
 0x678   :  { %v657_v60 = vsel %vm279_vm9, %v653_v59, -inf }
 0x679   :  { %658 = vmax.xlane.f32.xlu1 %v657_v60 }
 0x692   :  { %677 = vrot.lane.b32.xlu1 %v3194_v35, %s3853_s22  ;;  %s3865_s22 = smov 72  }
 0x69a   :  { %698 = vrot.lane.b32.xlu1 %v3194_v35, %s2927_s28 }
 0x6a2   :  { %897 = vrot.lane.b32.xlu1 %v3194_v35, %s3851_s19 }
 0x6aa   :  { %895 = vrot.lane.b32.xlu1 %v3194_v35, %s3849_s1 }
 0x6e4   :  { %v656_v41 = vpop.xlane.xlu2 %655 }
 0x6e5   :  { %v660_v61 = vsub.f32 %v652_v55, %v656_v41 }
 0x6e7   :  { %v662_v62 = vmul.f32 1.442695, %v660_v61 }
 0x6e9   :  { %2765 = vpow2.f32 %v662_v62 }
 0x6ec   :  { %v659_v3 = vpop.xlane.xlu1 %658 }
 0x6ed   :  { %v661_v4 = vsub.f32 %v653_v59, %v659_v3  ;;  %v3261_v3 = vsel %vm399_vm10, %v73_v2, 0 }
 0x6ee   :  { %616 = vmatpush.bf16.msrb.mxu0 %v3261_v3 }
 0x6ef   :  { %v2766_v5 = vpop.eup %2765  ;;  %v664_v6 = vmul.f32 1.442695, %v661_v4 }
 0x6f0   :  { %v666_v9 = vsel %vm279_vm9, %v2766_v5, 0.0 }
 0x6f1   :  { %2767 = vpow2.f32 %v664_v6  ;;  %667 = vadd.xlane.f32.xlu0 %v666_v9 }
 0x6f7   :  { %v2768_v15 = vpop.eup %2767 }
 0x6f8   :  { %v669_v18 = vsel %vm279_vm9, %v2768_v15, 0.0 }
 0x6f9   :  { %560 = vmax.xlane.f32.xlu0 %v559_v17  ;;  %670 = vadd.xlane.f32.xlu2 %v669_v18 }
 0x701   :  { %563 = vmax.xlane.f32.xlu2 %v562_v20 }
 0x704   :  { %v678_v21 = vpop.permute.xlu1 %677 }
 0x705   :  { %690 = vmatpush.bf16.msrb.mxu3 %v678_v21 }
 0x709   :  { %797 = vmatpush.bf16.msra.mxu3 %v3152_v12 }
 0x70c   :  { %v699_v23 = vpop.permute.xlu1 %698 }
 0x714   :  { %v898_v30 = vpop.permute.xlu1 %897 }
 0x715   :  { %v903_v12 = vsel %vm253_vm8, %v898_v30, 0 }
 0x71c   :  { %v896_v61 = vpop.permute.xlu1 %895 }
 0x764   :  { %v668_v22 = vpop.xlane.xlu0 %667 }
 0x765   :  { %2769 = vrcp.f32 %v668_v22 }
 0x76b   :  { %v2770_v27 = vpop.eup %2769 }
 0x76c   :  { %v561_v7 = vpop.xlane.xlu0 %560  ;;  %v671_v24 = vpop.xlane.xlu2 %670  ;;  %v674_v42 = vmul.f32 %v2770_v27, %v2766_v5 }
 0x76d   :  { %v565_v25 = vsub.f32 %v557_v11, %v561_v7  ;;  %2771 = vrcp.f32 %v671_v24 }
 0x76f   :  { %v567_v26 = vmul.f32 1.442695, %v565_v25 }
 0x771   :  { %2773 = vpow2.f32 %v567_v26 }
 0x773   :  { %v2772_v28 = vpop.eup %2771 }
 0x774   :  { %v675_v29 = vmul.f32 %v2772_v28, %v2768_v15  ;;  %v564_v47 = vpop.xlane.xlu2 %563 }
 0x775   :  { %v566_v31 = vsub.f32 %v558_v19, %v564_v47 }
 0x776   :  { %v676_v32 = vpack.c.bf16 %v675_v29, %v674_v42 }
 0x777   :  { %v2774_v33 = vpop.eup %2773  ;;  %v569_v34 = vmul.f32 1.442695, %v566_v31 }
 0x778   :  { %2509 = vmatmul.msk.bf16.vlgmr.msrb.gmra.mxu3 %vm279_vm9, %v676_v32  ;;  %v571_v36 = vsel %vm279_vm9, %v2774_v33, 0.0 }
 0x779   :  { %2775 = vpow2.f32 %v569_v34  ;;  %912 = vmatpush.bf16.xpose.msrb.mxu3 %v903_v12  ;;  %572 = vadd.xlane.f32.xlu0 %v571_v36  ;;  %v3286_v34 = vld [vmem:[%s3831_s5] ss:$0 sm:$0xff] }
 0x77f   :  { %v2776_v37 = vpop.eup %2775 }
 0x780   :  { %v574_v38 = vsel %vm279_vm9, %v2776_v37, 0.0 }
 0x781   :  { %575 = vadd.xlane.f32.xlu2 %v574_v38 }
 0x78d   :  { %582 = vrot.lane.b32.xlu0 %v3082_v57, %s3847_s27 }
 0x795   :  { %806 = vrot.lane.b32.xlu0 %v3194_v35, %s2933_s24 }
 0x799   :  { %700 = vrot.lane.b32.xlu2 %v3194_v35, %s2929_s0 }
 0x7a1   :  { %804 = vrot.lane.b32.xlu2 %v3194_v35, %s2931_s2 }
 0x7ec   :  { %v573_v39 = vpop.xlane.xlu0 %572 }
 0x7f4   :  { %v576_v43 = vpop.xlane.xlu2 %575 }
 0x7f5   :  { %2777 = vrcp.f32 %v576_v43 }
 0x7f6   :  { %2779 = vrcp.f32 %v573_v39 }
 0x7fb   :  { %v2778_v44 = vpop.eup %2777  ;;  %v692_v53 = vpop.f32.mrf.mxu3 }
 0x7fc   :  { %v2780_v46 = vpop.eup %2779  ;;  %v580_v51 = vmul.f32 %v2778_v44, %v2776_v37  ;;  %v701_v54 = vpop.permute.xlu2 %700 }
 0x7fd   :  { %v579_v55 = vmul.f32 %v2780_v46, %v2774_v33  ;;  %v706_v14 = vsel %vm253_vm8, %v701_v54, 0 }
 0x7ff   :  { %v583_v57 = vpop.permute.xlu0 %582  ;;  %v581_v56 = vpack.c.bf16 %v580_v51, %v579_v55 }
 0x800   :  { %595 = vmatpush.bf16.msra.mxu2 %v583_v57 }
 0x803   :  { %2506 = vmatmul.msk.bf16.vlgmr.msra.gmra.mxu2 %vm279_vm9, %v581_v56  ;;  %v694_v58 = vpop.f32.mrf.mxu3 }
 0x804   :  { %715 = vmatpush.bf16.xpose.msrb.mxu2 %v706_v14  ;;  %v697_v59 = vpack.c.bf16 %v694_v58, %v692_v53  ;;  %v805_v62 = vpop.permute.xlu2 %804 }
 0x806   :  { %2513 = vmatmul.msk.bf16.vlgmr.msra.gmra.mxu3 %vm253_vm8, %v697_v59 }
 0x807   :  { %v807_v60 = vpop.permute.xlu0 %806 }
 0x808   :  { %v812_v41 = vsel %vm253_vm8, %v807_v60, 0 }
 0x80c   :  { %821 = vmatpush.bf16.xpose.msra.mxu2 %v812_v41 }
 0x813   :  { %2510 = vmatmul.msk.bf16.vlgmr.msrb.gmra.mxu2 %vm253_vm8, %v699_v23 }
 0x816   :  { %2517 = vmatmul.msk.bf16.vlgmr.msrb.gmra.mxu3 %vm253_vm8, %v896_v61 }
 0x823   :  { %2514 = vmatmul.msk.bf16.vlgmr.msra.gmra.mxu2 %vm253_vm8, %v805_v62 }
 0x886   :  { %v597_v4 = vpop.f32.mrf.mxu2 }
 0x889   :  { %v3264_v5 = vpop.f32.mrf.mxu3 }
 0x88e   :  { %v599_v6 = vpop.f32.mrf.mxu2 }
 0x88f   :  { %v602_v8 = vpack.c.bf16 %v599_v6, %v597_v4 }
 0x891   :  { %2507 = vmatmul.msk.bf16.vlgmr.msrb.gmra.mxu0 %vm253_vm8, %v602_v8  ;;  %v3267_v9 = vpop.f32.mrf.mxu3 }
 0x896   :  { %v717_v11 = vpop.f32.mrf.mxu2 }
 0x897   :  { %v722_v13 = vmul.f32 0.35355338, %v717_v11 }
 0x899   :  { %v914_v15 = vpop.f32.mrf.mxu3  ;;  %v724_v16 = vadd.f32 %v722_v13, %v3215_v50 }
 0x89a   :  { %v919_v17 = vmul.f32 0.35355338, %v914_v15 }
 0x89b   :  { %v726_v18 = vsel %vm279_vm9, %v724_v16, -inf }
 0x89c   :  { %727 = vmax.xlane.f32.xlu0 %v726_v18  ;;  %v921_v19 = vadd.f32 %v919_v17, %v3215_v50 }
 0x89e   :  { %v719_v20 = vpop.f32.mrf.mxu2  ;;  %v923_v21 = vsel %vm279_vm9, %v921_v19, -inf }
 0x89f   :  { %v723_v22 = vmul.f32 0.35355338, %v719_v20  ;;  %924 = vmax.xlane.f32.xlu2 %v923_v21 }
 0x8a1   :  { %v916_v23 = vpop.f32.mrf.mxu3  ;;  %v725_v7 = vadd.f32 %v723_v22, %v3215_v50  ;;  %v435_v22 = vadd.f32 %v3229_v63, %v3207_v45 }
 0x8a2   :  { %v920_v24 = vmul.f32 0.35355338, %v916_v23 }
 0x8a3   :  { %v729_v25 = vsel %vm279_vm9, %v725_v7, -inf }
 0x8a4   :  { %730 = vmax.xlane.f32.xlu1 %v729_v25  ;;  %v922_v26 = vadd.f32 %v920_v24, %v3215_v50 }
 0x8a6   :  { %v823_v27 = vpop.f32.mrf.mxu2  ;;  %v926_v28 = vsel %vm279_vm9, %v922_v26, -inf }
 0x8a7   :  { %v828_v42 = vmul.f32 0.35355338, %v823_v27  ;;  %927 = vmax.xlane.f32.xlu0 %v926_v28 }
 0x8a9   :  { %v830_v29 = vadd.f32 %v828_v42, %v3215_v50 }
 0x8ab   :  { %v832_v47 = vsel %vm279_vm9, %v830_v29, -inf }
 0x8ac   :  { %833 = vmax.xlane.f32.xlu1 %v832_v47 }
 0x8ae   :  { %v825_v30 = vpop.f32.mrf.mxu2 }
 0x8af   :  { %v829_v31 = vmul.f32 0.35355338, %v825_v30 }
 0x8b1   :  { %v831_v32 = vadd.f32 %v829_v31, %v3215_v50 }
 0x8b3   :  { %v835_v33 = vsel %vm279_vm9, %v831_v32, -inf }
 0x8b4   :  { %836 = vmax.xlane.f32.xlu2 %v835_v33 }
 0x8cc   :  { %749 = vrot.lane.b32.xlu2 %v3194_v35, %s2932_s23 }
 0x90e   :  { %v618_v12 = vpop.f32.mrf.mxu0 }
 0x90f   :  { %v623_v36 = vadd.f32 %v618_v12, %v3210_v48  ;;  %v728_v37 = vpop.xlane.xlu0 %727 }
 0x910   :  { %v732_v38 = vsub.f32 %v724_v16, %v728_v37 }
 0x911   :  { %v990_v39 = vadd.f32 %v3286_v34, %v623_v36 }
 0x912   :  { %v734_v43 = vmul.f32 1.442695, %v732_v38  ;;  %v925_v48 = vpop.xlane.xlu2 %924 }
 0x913   :  { %v3291_v44 = vadd.f32 %v990_v39, %v3037_v0  ;;  %v929_v59 = vsub.f32 %v921_v19, %v925_v48 }
 0x914   :  { %2781 = vpow2.f32 %v734_v43 }
 0x915   :  { %v1000_v53 = vsel %vm96_vm0, %v3291_v44, 0.0  ;;  %v931_v41 = vmul.f32 1.442695, %v929_v59 }
 0x916   :  { %1001 = vadd.xlane.f32.xlu2 %v1000_v53  ;;  %v620_v23 = vpop.f32.mrf.mxu0 }
 0x917   :  { %v731_v46 = vpop.xlane.xlu1 %730 }
 0x918   :  { %v733_v51 = vsub.f32 %v725_v7, %v731_v46  ;;  %v530_v7 = vadd.f32 %v3212_v49, %v435_v22  ;;  %v2677_v22 = vld [vmem:[%s3836_s10] sm:$0xff] }
 0x91a   :  { %v2782_v54 = vpop.eup %2781  ;;  %v736_v55 = vmul.f32 1.442695, %v733_v51  ;;  %v928_v61 = vpop.xlane.xlu0 %927  ;;  %v624_v24 = vadd.f32 %v620_v23, %v530_v7 }
 0x91b   :  { %v738_v57 = vsel %vm279_vm9, %v2782_v54, 0.0  ;;  %v930_v6 = vsub.f32 %v922_v26, %v928_v61  ;;  %v2899_v26 = vld [vmem:[%s3860_s29 + $0x8] sm:$0xff]  ;;  %s2477_s29 = sshll.u32 %s3844_s18, 4  ;;  %s2478_s29 = int_to_ptr.hbm [resolvable:$true] %s2477_s29 }
 0x91c   :  { %2783 = vpow2.f32 %v736_v55  ;;  %739 = vadd.xlane.f32.xlu0 %v738_v57  ;;  %v991_v25 = vadd.f32 %v3286_v34, %v624_v24 }
 0x91d   :  { %v933_v13 = vmul.f32 1.442695, %v930_v6 }
 0x91e   :  { %v3315_v27 = vadd.f32 %v2899_v26, %v991_v25 }
 0x91f   :  { %v834_v14 = vpop.xlane.xlu1 %833 }
 0x920   :  { %v838_v56 = vsub.f32 %v830_v29, %v834_v14  ;;  %v1003_v28 = vsel %vm96_vm0, %v3315_v27, 0.0 }
 0x922   :  { %v2784_v58 = vpop.eup %2783  ;;  %v840_v0 = vmul.f32 1.442695, %v838_v56 }
 0x923   :  { %v741_v60 = vsel %vm279_vm9, %v2784_v58, 0.0 }
 0x924   :  { %2785 = vpow2.f32 %v840_v0  ;;  %742 = vadd.xlane.f32.xlu1 %v741_v60 }
 0x925   :  { %2787 = vpow2.f32 %v931_v41 }
 0x927   :  { %v837_v62 = vpop.xlane.xlu2 %836 }
 0x928   :  { %v839_v2 = vsub.f32 %v831_v32, %v837_v62 }
 0x92a   :  { %v3297_v4 = vpop.eup %2785  ;;  %v842_v8 = vmul.f32 1.442695, %v839_v2 }
 0x92b   :  { %v844_v11 = vsel %vm279_vm9, %v3297_v4, 0.0  ;;  %v2788_v16 = vpop.eup %2787 }
 0x92c   :  { %2789 = vpow2.f32 %v842_v8  ;;  %845 = vadd.xlane.f32.xlu0 %v844_v11  ;;  %v935_v19 = vsel %vm279_vm9, %v2788_v16, 0.0 }
 0x92d   :  { %2791 = vpow2.f32 %v933_v13 }
 0x92f   :  { %v750_v15 = vpop.permute.xlu2 %749 }
 0x930   :  { %762 = vmatpush.bf16.msra.mxu0 %v750_v15 }
 0x932   :  { %v2790_v17 = vpop.eup %2789 }
 0x933   :  { %v847_v18 = vsel %vm279_vm9, %v2790_v17, 0.0  ;;  %v2792_v20 = vpop.eup %2791 }
 0x934   :  { %848 = vadd.xlane.f32.xlu1 %v847_v18  ;;  %936 = vadd.xlane.f32.xlu0 %v935_v19  ;;  %v938_v21 = vsel %vm279_vm9, %v2792_v20, 0.0 }
 0x93c   :  { %939 = vadd.xlane.f32.xlu1 %v938_v21 }
 0x948   :  { %946 = vrot.lane.b32.xlu0 %v3194_v35, %s3847_s27 }
 0x955   :  { %855 = vrot.lane.b32.xlu1 %v3194_v35, %s3855_s25  ;;  %s3866_s25 = smov 104  }
 0x972   :  { %1004 = vadd.xlane.f32.xlu0 %v1003_v28 }
 0x989   :  { %v1002_v35 = vpop.xlane.xlu2 %1001 }
 0x98a   :  { %v1012_v42 = vmul.f32 %v1002_v35, %v3045_v10 }
 0x98c   :  { %v3321_v45 = vsub.f32 %v3291_v44, %v1012_v42 }
 0x98e   :  { %v1020_v49 = vmul.f32 %v3321_v45, %v3321_v45 }
 0x98f   :  { %v740_v29 = vpop.xlane.xlu0 %739 }
 0x990   :  { %v1024_v63 = vsel %vm96_vm0, %v1020_v49, 0.0  ;;  %2793 = vrcp.f32 %v740_v29 }
 0x991   :  { %1025 = vadd.xlane.f32.xlu1 %v1024_v63 }
 0x996   :  { %v2794_v30 = vpop.eup %2793 }
 0x997   :  { %v743_v47 = vpop.xlane.xlu1 %742  ;;  %v746_v32 = vmul.f32 %v2794_v30, %v2782_v54 }
 0x998   :  { %2795 = vrcp.f32 %v743_v47 }
 0x99e   :  { %v2796_v31 = vpop.eup %2795 }
 0x99f   :  { %v747_v33 = vmul.f32 %v2796_v31, %v2784_v58  ;;  %v846_v36 = vpop.xlane.xlu0 %845 }
 0x9a1   :  { %v748_v12 = vpack.c.bf16 %v747_v33, %v746_v32  ;;  %v3348_v32 = vld [vmem:[%s3834_s8] ss:$0 sm:$0xff] }
 0x9a3   :  { %2511 = vmatmul.msk.bf16.vlgmr.msra.gmra.mxu0 %vm279_vm9, %v748_v12 }
 0x9a7   :  { %v849_v37 = vpop.xlane.xlu1 %848  ;;  %v937_v38 = vpop.xlane.xlu0 %936 }
 0x9af   :  { %v940_v39 = vpop.xlane.xlu1 %939 }
 0x9b0   :  { %2797 = vrcp.f32 %v940_v39 }
 0x9b1   :  { %2799 = vrcp.f32 %v937_v38 }
 0x9b2   :  { %2801 = vrcp.f32 %v849_v37  ;;  %v3354_v37 = vld [vmem:[%s3835_s9] ss:$0 sm:$0xff] }
 0x9b3   :  { %2803 = vrcp.f32 %v846_v36 }
 0x9b6   :  { %v2798_v43 = vpop.eup %2797 }
 0x9b7   :  { %v2800_v53 = vpop.eup %2799  ;;  %v944_v46 = vmul.f32 %v2798_v43, %v2792_v20  ;;  %v2678_v20 = vld [vmem:[%s3836_s10 + $0x8] sm:$0xff] }
 0x9b8   :  { %v943_v51 = vmul.f32 %v2800_v53, %v2788_v16  ;;  %v2802_v54 = vpop.eup %2801  ;;  %1132 = vmatpush.bf16.msra.mxu3 %v2678_v20 }
 0x9b9   :  { %v2804_v48 = vpop.eup %2803  ;;  %v853_v14 = vmul.f32 %v2802_v54, %v2790_v17 }
 0x9ba   :  { %v947_v55 = vpop.permute.xlu0 %946  ;;  %v945_v57 = vpack.c.bf16 %v944_v46, %v943_v51  ;;  %v852_v56 = vmul.f32 %v2804_v48, %v3297_v4 }
 0x9bb   :  { %959 = vmatpush.bf16.msrb.mxu2 %v947_v55 }
 0x9bc   :  { %v854_v59 = vpack.c.bf16 %v853_v14, %v852_v56  ;;  %1133 = vmatpush.bf16.msra.mxu3 %v2677_v22  ;;  %v2683_v22 = vld [vmem:[%s3838_s12 + $0x20] sm:$0xff] }
 0x9be   :  { %2518 = vmatmul.msk.bf16.vlgmr.msrb.gmra.mxu2 %vm279_vm9, %v945_v57 }
 0x9c7   :  { %v856_v58 = vpop.permute.xlu1 %855 }
 0x9c8   :  { %868 = vmatpush.bf16.msrb.mxu0 %v856_v58 }
 0x9cb   :  { %2515 = vmatmul.msk.bf16.vlgmr.msrb.gmra.mxu0 %vm279_vm9, %v854_v59 }
 0x9cc   :  { %977 = vmatpush.bf16.msra.mxu0 %v3261_v3 }
 0x9e5   :  { %v1005_v0 = vpop.xlane.xlu0 %1004 }
 0x9e6   :  { %v1013_v60 = vmul.f32 %v1005_v0, %v3045_v10 }
 0x9e8   :  { %v1017_v41 = vsub.f32 %v3315_v27, %v1013_v60 }
 0x9ea   :  { %v1021_v61 = vmul.f32 %v1017_v41, %v1017_v41 }
 0x9ec   :  { %v1027_v62 = vsel %vm96_vm0, %v1021_v61, 0.0 }
 0x9ed   :  { %1028 = vadd.xlane.f32.xlu2 %v1027_v62 }
 0xa04   :  { %v1026_v11 = vpop.xlane.xlu1 %1025 }
 0xa05   :  { %v1036_v16 = vmul.f32 %v1026_v11, %v3045_v10 }
 0xa07   :  { %v1040_v17 = vadd.f32 1e-06, %v1036_v16 }
 0xa09   :  { %2805 = vrsqrt.f32 %v1040_v17  ;;  %vm1050_vm3 = vweird.f32 %v1040_v17 }
 0xa0f   :  { %v2806_v21 = vpop.eup %2805 }
 0xa10   :  { %v1045_v23 = vmul.f32 %v2806_v21, %v1040_v17  ;;  %vm1051_vm2 = vweird.f32 %v2806_v21  ;;  %v2686_v17 = vld [vmem:[%s3838_s12 + $0x38] sm:$0xff] }
 0xa11   :  { %vm1052_vm4 = vmor %vm1050_vm3, %vm1051_vm2  ;;  %1199 = vmatpush.bf16.msrb.mxu3 %v2686_v17 }
 0xa12   :  { %v1046_v7 = vmul.f32 %v2806_v21, %v1045_v23 }
 0xa14   :  { %v1047_v28 = vmul.f32 0.5, %v1046_v7  ;;  %v2682_v7 = vld [vmem:[%s3838_s12 + $0x18] sm:$0xff] }
 0xa16   :  { %v1048_v35 = vsub.f32 1.5, %v1047_v28 }
 0xa18   :  { %v1049_v49 = vmul.f32 %v2806_v21, %v1048_v35 }
 0xa1a   :  { %v1053_v47 = vsel %vm1052_vm4, %v2806_v21, %v1049_v49  ;;  %v2680_v49 = vld [vmem:[%s3838_s12 + $0x8] sm:$0xff] }
 0xa1b   :  { %v1084_v33 = vmul.f32 %v1053_v47, %v3321_v45  ;;  %v2679_v47 = vld [vmem:[%s3838_s12] sm:$0xff] }
 0xa1d   :  { %v1091_v38 = vmul.f32 %v3348_v32, %v1084_v33 }
 0xa1f   :  { %v1098_v53 = vadd.f32 %v3354_v37, %v1091_v38 }
 0xa20   :  { %v764_v2 = vpop.f32.mrf.mxu0 }
 0xa28   :  { %v766_v6 = vpop.f32.mrf.mxu0 }
 0xa29   :  { %v769_v8 = vpack.c.bf16 %v766_v6, %v764_v2 }
 0xa2b   :  { %2512 = vmatmul.msk.bf16.vlgmr.msra.gmra.mxu1 %vm253_vm8, %v769_v8 }
 0xa41   :  { %v961_v4 = vpop.f32.mrf.mxu2 }
 0xa48   :  { %v870_v13 = vpop.f32.mrf.mxu0 }
 0xa49   :  { %v963_v3 = vpop.f32.mrf.mxu2 }
 0xa4a   :  { %v966_v15 = vpack.c.bf16 %v963_v3, %v961_v4 }
 0xa4c   :  { %2519 = vmatmul.msk.bf16.vlgmr.msra.gmra.mxu0 %vm253_vm8, %v966_v15 }
 0xa50   :  { %v872_v18 = vpop.f32.mrf.mxu0 }
 0xa51   :  { %v875_v19 = vpack.c.bf16 %v872_v18, %v870_v13  ;;  %v2685_v18 = vld [vmem:[%s3838_s12 + $0x30] sm:$0xff] }
 0xa52   :  { %1200 = vmatpush.bf16.msrb.mxu3 %v2685_v18 }
 0xa53   :  { %2516 = vmatmul.msk.bf16.vlgmr.msrb.gmra.mxu1 %vm253_vm8, %v875_v19  ;;  %v2684_v19 = vld [vmem:[%s3838_s12 + $0x28] sm:$0xff] }
 0xa56   :  { %1201 = vmatpush.bf16.msrb.mxu3 %v2684_v19 }
 0xa5a   :  { %1202 = vmatpush.bf16.msrb.mxu3 %v2683_v22 }
 0xa5e   :  { %1203 = vmatpush.bf16.msrb.mxu3 %v2682_v7 }
 0xa60   :  { %v1029_v24 = vpop.xlane.xlu2 %1028 }
 0xa61   :  { %v1037_v25 = vmul.f32 %v1029_v24, %v3045_v10 }
 0xa63   :  { %v1041_v26 = vadd.f32 1e-06, %v1037_v25 }
 0xa65   :  { %2807 = vrsqrt.f32 %v1041_v26  ;;  %vm1060_vm6 = vweird.f32 %v1041_v26 }
 0xa6b   :  { %v2808_v42 = vpop.eup %2807 }
 0xa6c   :  { %v1055_v63 = vmul.f32 %v2808_v42, %v1041_v26  ;;  %vm1061_vm5 = vweird.f32 %v2808_v42  ;;  %v2681_v26 = vld [vmem:[%s3838_s12 + $0x10] sm:$0xff] }
 0xa6d   :  { %vm1062_vm7 = vmor %vm1060_vm6, %vm1061_vm5  ;;  %1204 = vmatpush.bf16.msrb.mxu3 %v2681_v26  ;;  %v2688_v26 = vld [vmem:[%s3861_s20 + $0x18] sm:$0xff] }
 0xa6e   :  { %v1056_v29 = vmul.f32 %v2808_v42, %v1055_v63  ;;  %1399 = vmatpush.bf16.msra.mxu2 %v2688_v26 }
 0xa70   :  { %v1057_v30 = vmul.f32 0.5, %v1056_v29 }
 0xa71   :  { %1205 = vmatpush.bf16.msrb.mxu3 %v2680_v49  ;;  %v2687_v49 = vld [vmem:[%s3861_s20 + $0x10] sm:$0xff] }
 0xa72   :  { %v1058_v31 = vsub.f32 1.5, %v1057_v30  ;;  %1400 = vmatpush.bf16.msra.mxu2 %v2687_v49 }
 0xa74   :  { %v1059_v12 = vmul.f32 %v2808_v42, %v1058_v31 }
 0xa75   :  { %1206 = vmatpush.bf16.msrb.mxu3 %v2679_v47 }
 0xa76   :  { %v1063_v36 = vsel %vm1062_vm7, %v2808_v42, %v1059_v12 }
 0xa77   :  { %v1085_v39 = vmul.f32 %v1063_v36, %v1017_v41 }
 0xa79   :  { %v1092_v43 = vmul.f32 %v3348_v32, %v1085_v39 }
 0xa7b   :  { %v1099_v46 = vadd.f32 %v3354_v37, %v1092_v43 }
 0xa7d   :  { %v1102_v51 = vpack.c.bf16 %v1099_v46, %v1098_v53 }
 0xa7f   :  { %2528 = vmatmul.msk.bf16.vlgmr.msra.gmra.mxu3 %vm96_vm0, %v1102_v51 }
 0xaa8   :  { %v782_v45 = vpop.f32.mrf.mxu1 }
 0xaa9   :  { %v800_v57 = vadd.f32 %v3264_v5, %v782_v45 }
 0xab0   :  { %v784_v55 = vpop.f32.mrf.mxu1 }
 0xab1   :  { %v802_v59 = vadd.f32 %v3267_v9, %v784_v55 }
 0xac9   :  { %v979_v54 = vpop.f32.mrf.mxu0 }
 0xad0   :  { %v888_v48 = vpop.f32.mrf.mxu1 }
 0xad1   :  { %v893_v14 = vadd.f32 %v888_v48, %v800_v57  ;;  %v981_v62 = vpop.f32.mrf.mxu0 }
 0xad3   :  { %v984_v56 = vadd.f32 %v979_v54, %v893_v14 }
 0xad5   :  { %v992_v58 = vadd.f32 %v3286_v34, %v984_v56 }
 0xad7   :  { %v3365_v0 = vadd.f32 %v992_v58, %v3134_v52 }
 0xad8   :  { %v890_v60 = vpop.f32.mrf.mxu1 }
 0xad9   :  { %v894_v41 = vadd.f32 %v890_v60, %v802_v59  ;;  %v1006_v61 = vsel %vm96_vm0, %v3365_v0, 0.0  ;;  %v2718_v59 = vld [vmem:[%s3837_s11] ss:$0 sm:$0xff] }
 0xada   :  { %1007 = vadd.xlane.f32.xlu2 %v1006_v61 }
 0xadb   :  { %v985_v2 = vadd.f32 %v981_v62, %v894_v41 }
 0xadd   :  { %v993_v5 = vadd.f32 %v3286_v34, %v985_v2 }
 0xadf   :  { %v3371_v6 = vadd.f32 %v993_v5, %v3126_v40 }
 0xae1   :  { %v1009_v8 = vsel %vm96_vm0, %v3371_v6, 0.0 }
 0xae2   :  { %1010 = vadd.xlane.f32.xlu2 %v1009_v8 }
 0xb02   :  { %v1135_v57 = vpop.f32.mrf.mxu3 }
 0xb03   :  { %v1136_v41 = vadd.f32 %v2718_v59, %v1135_v57 }
 0xb05   :  { %v1145_v62 = vmax.f32 %v1136_v41, 0.0 }
 0xb0a   :  { %v1137_v58 = vpop.f32.mrf.mxu3 }
 0xb0b   :  { %v1138_v60 = vadd.f32 %v2718_v59, %v1137_v58 }
 0xb0d   :  { %v1146_v61 = vmax.f32 %v1138_v60, 0.0 }
 0xb0f   :  { %v1149_v2 = vpack.c.bf16 %v1146_v61, %v1145_v62 }
 0xb4d   :  { %v1008_v9 = vpop.xlane.xlu2 %1007 }
 0xb4e   :  { %v1014_v52 = vmul.f32 %v1008_v9, %v3045_v10 }
 0xb50   :  { %v1018_v4 = vsub.f32 %v3365_v0, %v1014_v52 }
 0xb52   :  { %v1022_v11 = vmul.f32 %v1018_v4, %v1018_v4 }
 0xb54   :  { %v1030_v13 = vsel %vm96_vm0, %v1022_v11, 0.0  ;;  %v3418_v11 = vld [vmem:[%s3839_s13] ss:$0 sm:$0xff] }
 0xb55   :  { %1031 = vadd.xlane.f32.xlu0 %v1030_v13  ;;  %v1011_v3 = vpop.xlane.xlu2 %1010 }
 0xb56   :  { %v1015_v15 = vmul.f32 %v1011_v3, %v3045_v10 }
 0xb58   :  { %v1019_v34 = vsub.f32 %v3371_v6, %v1015_v15 }
 0xb5a   :  { %v1023_v40 = vmul.f32 %v1019_v34, %v1019_v34 }
 0xb5c   :  { %v1033_v16 = vsel %vm96_vm0, %v1023_v40, 0.0 }
 0xb5d   :  { %1034 = vadd.xlane.f32.xlu1 %v1033_v16 }
 0xbc8   :  { %v1032_v20 = vpop.xlane.xlu0 %1031 }
 0xbc9   :  { %v1038_v21 = vmul.f32 %v1032_v20, %v3045_v10 }
 0xbcb   :  { %v1042_v23 = vadd.f32 1e-06, %v1038_v21 }
 0xbcd   :  { %2809 = vrsqrt.f32 %v1042_v23  ;;  %vm1070_vm12 = vweird.f32 %v1042_v23 }
 0xbd0   :  { %v1035_v24 = vpop.xlane.xlu1 %1034 }
 0xbd1   :  { %v1039_v25 = vmul.f32 %v1035_v24, %v3045_v10 }
 0xbd3   :  { %v2810_v28 = vpop.eup %2809  ;;  %v1043_v35 = vadd.f32 1e-06, %v1039_v25 }
 0xbd4   :  { %v1065_v42 = vmul.f32 %v2810_v28, %v1042_v23  ;;  %vm1071_vm11 = vweird.f32 %v2810_v28 }
 0xbd5   :  { %2811 = vrsqrt.f32 %v1043_v35  ;;  %vm1072_vm13 = vmor %vm1070_vm12, %vm1071_vm11  ;;  %vm1080_vm15 = vweird.f32 %v1043_v35 }
 0xbd6   :  { %v1066_v63 = vmul.f32 %v2810_v28, %v1065_v42 }
 0xbd8   :  { %v1067_v29 = vmul.f32 0.5, %v1066_v63 }
 0xbda   :  { %v1068_v30 = vsub.f32 1.5, %v1067_v29 }
 0xbdb   :  { %v2812_v31 = vpop.eup %2811 }
 0xbdc   :  { %v1069_v33 = vmul.f32 %v2810_v28, %v1068_v30  ;;  %v1075_v12 = vmul.f32 %v2812_v31, %v1043_v35  ;;  %vm1081_vm14 = vweird.f32 %v2812_v31 }
 0xbdd   :  { %vm1082_vm1 = vmor %vm1080_vm15, %vm1081_vm14 }
 0xbde   :  { %v1076_v36 = vmul.f32 %v2812_v31, %v1075_v12  ;;  %v1073_v38 = vsel %vm1072_vm13, %v2810_v28, %v1069_v33 }
 0xbdf   :  { %v1086_v53 = vmul.f32 %v1073_v38, %v1018_v4 }
 0xbe0   :  { %v1077_v39 = vmul.f32 0.5, %v1076_v36 }
 0xbe1   :  { %v1093_v55 = vmul.f32 %v3348_v32, %v1086_v53 }
 0xbe2   :  { %v1078_v43 = vsub.f32 1.5, %v1077_v39 }
 0xbe3   :  { %v1100_v48 = vadd.f32 %v3354_v37, %v1093_v55  ;;  %v3449_v55 = vld [vmem:[%s3832_s6 + $0x1] ss:$0 sm:$0xff] }
 0xbe4   :  { %v1079_v46 = vmul.f32 %v2812_v31, %v1078_v43 }
 0xbe6   :  { %v1083_v51 = vsel %vm1082_vm1, %v2812_v31, %v1079_v46 }
 0xbe7   :  { %v1087_v45 = vmul.f32 %v1083_v51, %v1019_v34 }
 0xbe9   :  { %v1094_v54 = vmul.f32 %v3348_v32, %v1087_v45 }
 0xbeb   :  { %v1101_v14 = vadd.f32 %v3354_v37, %v1094_v54 }
 0xbed   :  { %v1103_v56 = vpack.c.bf16 %v1101_v14, %v1100_v48  ;;  %v3454_v14 = vld [vmem:[%s3833_s7 + $0x1] ss:$0 sm:$0xff]  ;;  %s3864_s7 = smov 64  }
 0xbef   :  { %2529 = vmatmul.msk.bf16.gmra.mxu3 %vm96_vm0, %v1103_v56 }
 0xbff   :  { %1207 = vmatmul.bf16.vlgmr.msrb.gmra.mxu3 %v1149_v2  ;;  %v3464_v2 = vld [vmem:[%s3829_s3 + $0x1] ss:$0 sm:$0xff]  ;;  %s3863_s3 = smov 48  }
 0xc72   :  { %v1140_v5 = vpop.f32.mrf.mxu3 }
 0xc73   :  { %v1141_v32 = vadd.f32 %v2718_v59, %v1140_v5 }
 0xc75   :  { %v1147_v52 = vmax.f32 %v1141_v32, 0.0 }
 0xc7a   :  { %v1142_v8 = vpop.f32.mrf.mxu3 }
 0xc7b   :  { %v1143_v9 = vadd.f32 %v2718_v59, %v1142_v8 }
 0xc7d   :  { %v1148_v37 = vmax.f32 %v1143_v9, 0.0 }
 0xc7f   :  { %v1150_v4 = vpack.c.bf16 %v1148_v37, %v1147_v52 }
 0xc81   :  { %1212 = vmatmul.bf16.gmra.mxu3 %v1150_v4 }
 0xc82   :  { %v1208_v13 = vpop.f32.mrf.mxu3 }
 0xc83   :  { %v1218_v3 = vadd.f32 %v1208_v13, %v3291_v44 }
 0xc85   :  { %v3422_v15 = vadd.f32 %v3418_v11, %v1218_v3 }
 0xc87   :  { %v1266_v34 = vsel %vm96_vm0, %v3422_v15, 0.0 }
 0xc88   :  { %1267 = vadd.xlane.f32.xlu2 %v1266_v34 }
 0xc8a   :  { %v1210_v40 = vpop.f32.mrf.mxu3 }
 0xc8b   :  { %v1219_v16 = vadd.f32 %v1210_v40, %v3315_v27 }
 0xc8d   :  { %v3428_v17 = vadd.f32 %v3418_v11, %v1219_v16 }
 0xc8f   :  { %v1269_v18 = vsel %vm96_vm0, %v3428_v17, 0.0 }
 0xc90   :  { %1270 = vadd.xlane.f32.xlu0 %v1269_v18 }
 0xcfb   :  { %v1268_v19 = vpop.xlane.xlu2 %1267 }
 0xcfc   :  { %v1278_v44 = vmul.f32 %v1268_v19, %v3045_v10 }
 0xcfe   :  { %v1282_v20 = vsub.f32 %v3422_v15, %v1278_v44 }
 0xd00   :  { %v1286_v21 = vmul.f32 %v1282_v20, %v1282_v20 }
 0xd02   :  { %v1290_v22 = vsel %vm96_vm0, %v1286_v21, 0.0 }
 0xd03   :  { %1291 = vadd.xlane.f32.xlu1 %v1290_v22  ;;  %v1271_v23 = vpop.xlane.xlu0 %1270 }
 0xd04   :  { %v1279_v7 = vmul.f32 %v1271_v23, %v3045_v10  ;;  %v1213_v52 = vpop.f32.mrf.mxu3 }
 0xd05   :  { %v1220_v13 = vadd.f32 %v1213_v52, %v3365_v0 }
 0xd06   :  { %v1283_v27 = vsub.f32 %v3428_v17, %v1279_v7 }
 0xd07   :  { %v3486_v34 = vadd.f32 %v3418_v11, %v1220_v13 }
 0xd08   :  { %v1287_v24 = vmul.f32 %v1283_v27, %v1283_v27 }
 0xd09   :  { %v1272_v16 = vsel %vm96_vm0, %v3486_v34, 0.0 }
 0xd0a   :  { %v1293_v25 = vsel %vm96_vm0, %v1287_v24, 0.0 }
 0xd0b   :  { %1294 = vadd.xlane.f32.xlu2 %v1293_v25 }
 0xd0c   :  { %v1215_v37 = vpop.f32.mrf.mxu3 }
 0xd0d   :  { %v1221_v4 = vadd.f32 %v1215_v37, %v3371_v6 }
 0xd0f   :  { %v3483_v3 = vadd.f32 %v3418_v11, %v1221_v4 }
 0xd11   :  { %v1275_v40 = vsel %vm96_vm0, %v3483_v3, 0.0 }
 0xd76   :  { %v1292_v28 = vpop.xlane.xlu1 %1291 }
 0xd77   :  { %v1302_v35 = vmul.f32 %v1292_v28, %v3045_v10 }
 0xd79   :  { %v1306_v42 = vadd.f32 1e-06, %v1302_v35 }
 0xd7b   :  { %2813 = vrsqrt.f32 %v1306_v42  ;;  %vm1316_vm3 = vweird.f32 %v1306_v42 }
 0xd7e   :  { %v1295_v63 = vpop.xlane.xlu2 %1294 }
 0xd7f   :  { %v1303_v29 = vmul.f32 %v1295_v63, %v3045_v10 }
 0xd81   :  { %v2814_v47 = vpop.eup %2813  ;;  %v1307_v30 = vadd.f32 1e-06, %v1303_v29 }
 0xd82   :  { %v1311_v31 = vmul.f32 %v2814_v47, %v1306_v42  ;;  %vm1317_vm2 = vweird.f32 %v2814_v47 }
 0xd83   :  { %2815 = vrsqrt.f32 %v1307_v30  ;;  %vm1318_vm4 = vmor %vm1316_vm3, %vm1317_vm2  ;;  %vm1326_vm6 = vweird.f32 %v1307_v30 }
 0xd84   :  { %v1312_v33 = vmul.f32 %v2814_v47, %v1311_v31 }
 0xd86   :  { %v1313_v12 = vmul.f32 0.5, %v1312_v33 }
 0xd88   :  { %v1314_v36 = vsub.f32 1.5, %v1313_v12 }
 0xd89   :  { %v2816_v38 = vpop.eup %2815 }
 0xd8a   :  { %v1315_v39 = vmul.f32 %v2814_v47, %v1314_v36  ;;  %v1321_v43 = vmul.f32 %v2816_v38, %v1307_v30  ;;  %vm1327_vm5 = vweird.f32 %v2816_v38 }
 0xd8b   :  { %vm1328_vm7 = vmor %vm1326_vm6, %vm1327_vm5 }
 0xd8c   :  { %v1322_v53 = vmul.f32 %v2816_v38, %v1321_v43  ;;  %v1319_v46 = vsel %vm1318_vm4, %v2814_v47, %v1315_v39 }
 0xd8d   :  { %v1350_v57 = vmul.f32 %v1319_v46, %v1282_v20 }
 0xd8e   :  { %v1323_v51 = vmul.f32 0.5, %v1322_v53 }
 0xd8f   :  { %v1357_v56 = vmul.f32 %v3449_v55, %v1350_v57 }
 0xd90   :  { %v1324_v45 = vsub.f32 1.5, %v1323_v51 }
 0xd91   :  { %v1364_v60 = vadd.f32 %v3454_v14, %v1357_v56 }
 0xd92   :  { %v1325_v54 = vmul.f32 %v2816_v38, %v1324_v45 }
 0xd94   :  { %v1329_v48 = vsel %vm1328_vm7, %v2816_v38, %v1325_v54 }
 0xd95   :  { %v1351_v58 = vmul.f32 %v1329_v48, %v1283_v27 }
 0xd97   :  { %v1358_v59 = vmul.f32 %v3449_v55, %v1351_v58 }
 0xd99   :  { %v1365_v41 = vadd.f32 %v3454_v14, %v1358_v59 }
 0xd9b   :  { %v1368_v61 = vpack.c.bf16 %v1365_v41, %v1364_v60 }
 0xd9d   :  { %2601 = vmatmul.msk.bf16.vlgmr.msra.gmra.mxu2 %vm96_vm0, %v1368_v61 }
 0xe20   :  { %v1402_v62 = vpop.f32.mrf.mxu2 }
 0xe21   :  { %v1403_v32 = vadd.f32 %v3464_v2, %v1402_v62 }
 0xe28   :  { %v1404_v5 = vpop.f32.mrf.mxu2 }
 0xe29   :  { %v1405_v8 = vadd.f32 %v3464_v2, %v1404_v5 }
 0xe2b   :  { %v3468_v9 = vpack.c.bf16 %v1405_v8, %v1403_v32 }
 0xe2d   :  { %1598 = vrot.lane.b32.xlu2 %v3468_v9, %s2933_s24  ;;  %1484 = vrot.lane.b32.xlu1 %v3468_v9, %s2927_s28 }
 0xe2e   :  { %1486 = vrot.lane.b32.xlu0 %v3468_v9, %s2929_s0 }
 0xe36   :  { %1596 = vrot.lane.b32.xlu0 %v3468_v9, %s2931_s2 }
 0xe3e   :  { %1414 = vrot.lane.b32.xlu0 %v3468_v9, %s2928_s30 }
 0xe56   :  { %1276 = vadd.xlane.f32.xlu2 %v1275_v40 }
 0xe57   :  { %1273 = vadd.xlane.f32.xlu1 %v1272_v16 }
 0xe87   :  { %v1599_v18 = vpop.permute.xlu2 %1598 }
 0xe88   :  { %v1604_v19 = vsel %vm253_vm8, %v1599_v18, 0 }
 0xe89   :  { %1613 = vmatpush.bf16.xpose.msra.mxu3 %v1604_v19 }
 0xe9f   :  { %v1485_v44 = vpop.permute.xlu1 %1484 }
 0xea0   :  { %v1487_v6 = vpop.permute.xlu0 %1486 }
 0xea1   :  { %v1492_v0 = vsel %vm253_vm8, %v1487_v6, 0 }
 0xea2   :  { %1501 = vmatpush.bf16.xpose.msra.mxu1 %v1492_v0 }
 0xea8   :  { %v1597_v20 = vpop.permute.xlu0 %1596 }
 0xea9   :  { %2605 = vmatmul.msk.bf16.vlgmr.msra.gmra.mxu1 %vm253_vm8, %v1485_v44  ;;  %2609 = vmatmul.msk.bf16.vlgmr.msra.gmra.mxu3 %vm253_vm8, %v1597_v20 }
 0xeb0   :  { %v1415_v11 = vpop.permute.xlu0 %1414 }
 0xeb1   :  { %v1420_v21 = vsel %vm253_vm8, %v1415_v11, 0 }
 0xeb2   :  { %1429 = vmatpush.bf16.xpose.msrb.mxu0 %v1420_v21 }
 0xeb9   :  { %2603 = vmatmul.msk.bf16.vlgmr.msrb.gmra.mxu0 %vm253_vm8, %v3468_v9 }
 0xec9   :  { %v1277_v25 = vpop.xlane.xlu2 %1276 }
 0xeca   :  { %v1274_v22 = vpop.xlane.xlu1 %1273  ;;  %v1281_v28 = vmul.f32 %v1277_v25, %v3045_v10 }
 0xecb   :  { %v1280_v23 = vmul.f32 %v1274_v22, %v3045_v10 }
 0xecc   :  { %v3509_v49 = vsub.f32 %v3483_v3, %v1281_v28 }
 0xecd   :  { %v3501_v7 = vsub.f32 %v3486_v34, %v1280_v23 }
 0xece   :  { %v1289_v31 = vmul.f32 %v3509_v49, %v3509_v49 }
 0xecf   :  { %v1288_v27 = vmul.f32 %v3501_v7, %v3501_v7 }
 0xed0   :  { %v1299_v38 = vsel %vm96_vm0, %v1289_v31, 0.0 }
 0xed1   :  { %v1296_v24 = vsel %vm96_vm0, %v1288_v27, 0.0 }
 0xed2   :  { %1297 = vadd.xlane.f32.xlu1 %v1296_v24 }
 0xf26   :  { %v1503_v26 = vpop.f32.mrf.mxu1 }
 0xf27   :  { %v1508_v35 = vmul.f32 0.35355338, %v1503_v26 }
 0xf29   :  { %v1510_v42 = vadd.f32 %v1508_v35, %v3101_v1 }
 0xf2b   :  { %v1512_v63 = vsel %vm279_vm9, %v1510_v42, -inf }
 0xf2c   :  { %1513 = vmax.xlane.f32.xlu0 %v1512_v63  ;;  %v1615_v29 = vpop.f32.mrf.mxu3 }
 0xf2d   :  { %v1620_v12 = vmul.f32 0.35355338, %v1615_v29 }
 0xf2e   :  { %v1505_v47 = vpop.f32.mrf.mxu1 }
 0xf2f   :  { %v1509_v30 = vmul.f32 0.35355338, %v1505_v47  ;;  %v1622_v46 = vadd.f32 %v1620_v12, %v3101_v1 }
 0xf31   :  { %v1511_v33 = vadd.f32 %v1509_v30, %v3101_v1  ;;  %v1624_v45 = vsel %vm279_vm9, %v1622_v46, -inf }
 0xf33   :  { %v1515_v36 = vsel %vm279_vm9, %v1511_v33, -inf }
 0xf34   :  { %v1617_v39 = vpop.f32.mrf.mxu3  ;;  %1516 = vmax.xlane.f32.xlu2 %v1515_v36  ;;  %1300 = vadd.xlane.f32.xlu0 %v1299_v38 }
 0xf35   :  { %v1621_v43 = vmul.f32 0.35355338, %v1617_v39 }
 0xf36   :  { %v1431_v25 = vpop.f32.mrf.mxu0 }
 0xf37   :  { %v1623_v53 = vadd.f32 %v1621_v43, %v3101_v1  ;;  %v1436_v31 = vmul.f32 0.35355338, %v1431_v25 }
 0xf39   :  { %v1627_v51 = vsel %vm279_vm9, %v1623_v53, -inf  ;;  %v1438_v39 = vadd.f32 %v1436_v31, %v3101_v1 }
 0xf3a   :  { %1628 = vmax.xlane.f32.xlu1 %v1627_v51 }
 0xf3c   :  { %1625 = vmax.xlane.f32.xlu2 %v1624_v45  ;;  %v1440_v45 = vsel %vm279_vm9, %v1438_v39, -inf }
 0xf45   :  { %v1298_v57 = vpop.xlane.xlu1 %1297 }
 0xf46   :  { %v1304_v54 = vmul.f32 %v1298_v57, %v3045_v10 }
 0xf48   :  { %v1308_v48 = vadd.f32 1e-06, %v1304_v54 }
 0xf4a   :  { %2817 = vrsqrt.f32 %v1308_v48  ;;  %vm1336_vm12 = vweird.f32 %v1308_v48 }
 0xf50   :  { %v2818_v58 = vpop.eup %2817 }
 0xf51   :  { %v1331_v41 = vmul.f32 %v2818_v58, %v1308_v48  ;;  %vm1337_vm11 = vweird.f32 %v2818_v58 }
 0xf52   :  { %vm1338_vm13 = vmor %vm1336_vm12, %vm1337_vm11 }
 0xf53   :  { %1535 = vrot.lane.b32.xlu1 %v3468_v9, %s2932_s23  ;;  %v1332_v61 = vmul.f32 %v2818_v58, %v1331_v41 }
 0xf55   :  { %v1333_v13 = vmul.f32 0.5, %v1332_v61 }
 0xf57   :  { %v1334_v19 = vsub.f32 1.5, %v1333_v13 }
 0xf59   :  { %v1335_v22 = vmul.f32 %v2818_v58, %v1334_v19 }
 0xf5b   :  { %v1339_v26 = vsel %vm1338_vm13, %v2818_v58, %v1335_v22 }
 0xf5c   :  { %v1352_v29 = vmul.f32 %v1339_v26, %v3501_v7  ;;  %v1433_v7 = vpop.f32.mrf.mxu0 }
 0xf5d   :  { %v1437_v51 = vmul.f32 0.35355338, %v1433_v7 }
 0xf5e   :  { %v1359_v38 = vmul.f32 %v3449_v55, %v1352_v29 }
 0xf9f   :  { %v1514_v56 = vpop.xlane.xlu0 %1513 }
 0xfa0   :  { %v1518_v59 = vsub.f32 %v1510_v42, %v1514_v56 }
 0xfa2   :  { %v1520_v60 = vmul.f32 1.442695, %v1518_v59 }
 0xfa4   :  { %2819 = vpow2.f32 %v1520_v60 }
 0xfa7   :  { %v1301_v62 = vpop.xlane.xlu0 %1300  ;;  %v1517_v5 = vpop.xlane.xlu2 %1516 }
 0xfa8   :  { %v1305_v32 = vmul.f32 %v1301_v62, %v3045_v10  ;;  %v1519_v8 = vsub.f32 %v1511_v33, %v1517_v5  ;;  %v2566_v62 = vld [vmem:[%s3830_s4 + $0x10] sm:$0xf] }
 0xfaa   :  { %v3525_v52 = vpop.eup %2819  ;;  %v1309_v37 = vadd.f32 1e-06, %v1305_v32  ;;  %v1522_v4 = vmul.f32 1.442695, %v1519_v8  ;;  %v3556_v32 = vsel %vm399_vm10, %v2566_v62, 0 }
 0xfab   :  { %v1524_v40 = vsel %vm279_vm9, %v3525_v52, 0.0  ;;  %1589 = vmatpush.bf16.msrb.mxu1 %v3556_v32 }
 0xfac   :  { %2821 = vrsqrt.f32 %v1309_v37  ;;  %1525 = vadd.xlane.f32.xlu0 %v1524_v40  ;;  %vm1346_vm15 = vweird.f32 %v1309_v37 }
 0xfad   :  { %2823 = vpow2.f32 %v1522_v4  ;;  %v1629_v16 = vpop.xlane.xlu1 %1628 }
 0xfae   :  { %v1631_v18 = vsub.f32 %v1623_v53, %v1629_v16  ;;  %v1366_v53 = vadd.f32 %v3454_v14, %v1359_v38 }
 0xfaf   :  { %v1626_v6 = vpop.xlane.xlu2 %1625 }
 0xfb0   :  { %v1634_v0 = vmul.f32 1.442695, %v1631_v18  ;;  %v1630_v44 = vsub.f32 %v1622_v46, %v1626_v6 }
 0xfb2   :  { %v2822_v20 = vpop.eup %2821  ;;  %v1632_v11 = vmul.f32 1.442695, %v1630_v44  ;;  %2825 = vpow2.f32 %v1634_v0 }
 0xfb3   :  { %v2824_v21 = vpop.eup %2823  ;;  %v1341_v23 = vmul.f32 %v2822_v20, %v1309_v37  ;;  %vm1347_vm14 = vweird.f32 %v2822_v20 }
 0xfb4   :  { %2827 = vpow2.f32 %v1632_v11  ;;  %v1527_v27 = vsel %vm279_vm9, %v2824_v21, 0.0  ;;  %vm1348_vm1 = vmor %vm1346_vm15, %vm1347_vm14  ;;  %vm2390_vm14 = vcmask 1040384   ;;  %vm2394_vm15 = vcmask 254976  }
 0xfb5   :  { %v1342_v24 = vmul.f32 %v2822_v20, %v1341_v23  ;;  %1528 = vadd.xlane.f32.xlu2 %v1527_v27 }
 0xfb7   :  { %v1343_v28 = vmul.f32 0.5, %v1342_v24 }
 0xfb8   :  { %v2826_v35 = vpop.eup %2825 }
 0xfb9   :  { %v1344_v42 = vsub.f32 1.5, %v1343_v28  ;;  %v1639_v33 = vsel %vm279_vm9, %v2826_v35, 0.0 }
 0xfba   :  { %v2828_v63 = vpop.eup %2827 }
 0xfbb   :  { %v1345_v47 = vmul.f32 %v2822_v20, %v1344_v42  ;;  %v1636_v30 = vsel %vm279_vm9, %v2828_v63, 0.0 }
 0xfbc   :  { %1637 = vadd.xlane.f32.xlu0 %v1636_v30 }
 0xfbd   :  { %v1349_v12 = vsel %vm1348_vm1, %v2822_v20, %v1345_v47  ;;  %1640 = vadd.xlane.f32.xlu2 %v1639_v33 }
 0xfbe   :  { %v1353_v36 = vmul.f32 %v1349_v12, %v3509_v49  ;;  %v1439_v49 = vadd.f32 %v1437_v51, %v3101_v1 }
 0xfc0   :  { %v1360_v43 = vmul.f32 %v3449_v55, %v1353_v36  ;;  %v1443_v48 = vsel %vm279_vm9, %v1439_v49, -inf }
 0xfc2   :  { %v1367_v46 = vadd.f32 %v3454_v14, %v1360_v43 }
 0xfc4   :  { %v1369_v57 = vpack.c.bf16 %v1367_v46, %v1366_v53 }
 0xfc5   :  { %1441 = vmax.xlane.f32.xlu2 %v1440_v45  ;;  %v1536_v54 = vpop.permute.xlu1 %1535 }
 0xfc6   :  { %2602 = vmatmul.msk.bf16.gmra.mxu2 %vm96_vm0, %v1369_v57 }
 0xfc7   :  { %1548 = vmatpush.bf16.msrb.mxu2 %v1536_v54 }
 0xfcd   :  { %1444 = vmax.xlane.f32.xlu2 %v1443_v48 }
 0xfd0   :  { %1647 = vrot.lane.b32.xlu0 %v3468_v9, %s3863_s3 }
 0xfd8   :  { %1463 = vrot.lane.b32.xlu0 %v3468_v9, %s3864_s7 }
 0xfe0   :  { %1692 = vrot.lane.b32.xlu0 %v3468_v9, %s3865_s22 }
 0xfe8   :  { %1690 = vrot.lane.b32.xlu0 %v3468_v9, %s3866_s25 }
0x101f   :  { %v1526_v55 = vpop.xlane.xlu0 %1525 }
0x1020   :  { %2829 = vrcp.f32 %v1526_v55 }
0x1026   :  { %v2830_v56 = vpop.eup %2829 }
0x1027   :  { %v1532_v59 = vmul.f32 %v2830_v56, %v3525_v52 }
0x1028   :  { %v1529_v14 = vpop.xlane.xlu2 %1528 }
0x1029   :  { %2831 = vrcp.f32 %v1529_v14 }
0x102f   :  { %v2832_v58 = vpop.eup %2831  ;;  %v1638_v5 = vpop.xlane.xlu0 %1637 }
0x1030   :  { %v1533_v60 = vmul.f32 %v2832_v58, %v2824_v21  ;;  %v1641_v41 = vpop.xlane.xlu2 %1640  ;;  %2833 = vrcp.f32 %v1638_v5 }
0x1031   :  { %2835 = vrcp.f32 %v1641_v41 }
0x1032   :  { %v1534_v61 = vpack.c.bf16 %v1533_v60, %v1532_v59 }
0x1034   :  { %2606 = vmatmul.msk.bf16.vlgmr.msrb.gmra.mxu2 %vm279_vm9, %v1534_v61 }
0x1036   :  { %v2834_v4 = vpop.eup %2833 }
0x1037   :  { %v2836_v13 = vpop.eup %2835  ;;  %v1644_v40 = vmul.f32 %v2834_v4, %v2828_v63  ;;  %v2567_v63 = vld [vmem:[%s3830_s4 + $0x14] sm:$0xf] }
0x1038   :  { %v1442_v8 = vpop.xlane.xlu2 %1441  ;;  %v1645_v16 = vmul.f32 %v2836_v13, %v2826_v35  ;;  %v1560_v29 = vsel %vm399_vm10, %v2567_v63, 0 }
0x1039   :  { %v1446_v37 = vsub.f32 %v1438_v39, %v1442_v8 }
0x103a   :  { %v1646_v20 = vpack.c.bf16 %v1645_v16, %v1644_v40 }
0x103b   :  { %v1448_v52 = vmul.f32 1.442695, %v1446_v37 }
0x103d   :  { %2837 = vpow2.f32 %v1448_v52 }
0x1040   :  { %v1445_v18 = vpop.xlane.xlu2 %1444 }
0x1041   :  { %v1447_v19 = vsub.f32 %v1439_v49, %v1445_v18 }
0x1042   :  { %v1648_v6 = vpop.permute.xlu0 %1647 }
0x1043   :  { %v2838_v0 = vpop.eup %2837  ;;  %v1450_v44 = vmul.f32 1.442695, %v1447_v19  ;;  %1660 = vmatpush.bf16.msra.mxu2 %v1648_v6 }
0x1044   :  { %v1452_v11 = vsel %vm279_vm9, %v2838_v0, 0.0 }
0x1045   :  { %2839 = vpow2.f32 %v1450_v44  ;;  %1453 = vadd.xlane.f32.xlu1 %v1452_v11 }
0x1046   :  { %2610 = vmatmul.msk.bf16.vlgmr.msra.gmra.mxu2 %vm279_vm9, %v1646_v20 }
0x1049   :  { %v1407_v27 = vpop.f32.mrf.mxu2 }
0x104a   :  { %v1464_v21 = vpop.permute.xlu0 %1463  ;;  %v1408_v35 = vadd.f32 %v3464_v2, %v1407_v27 }
0x104b   :  { %v2840_v22 = vpop.eup %2839  ;;  %1476 = vmatpush.bf16.msra.mxu0 %v1464_v21 }
0x104c   :  { %v1455_v23 = vsel %vm279_vm9, %v2840_v22, 0.0 }
0x104d   :  { %1456 = vadd.xlane.f32.xlu2 %v1455_v23 }
0x104f   :  { %1569 = vmatpush.bf16.msrb.mxu0 %v1560_v29 }
0x1051   :  { %v1409_v26 = vpop.f32.mrf.mxu2 }
0x1052   :  { %v1693_v24 = vpop.permute.xlu0 %1692  ;;  %v1410_v28 = vadd.f32 %v3464_v2, %v1409_v26  ;;  %v2568_v2 = vld [vmem:[%s3830_s4 + $0x18] sm:$0xf] }
0x1053   :  { %v1698_v25 = vsel %vm253_vm8, %v1693_v24, 0  ;;  %v1672_v39 = vsel %vm399_vm10, %v2568_v2, 0 }
0x1054   :  { %1707 = vmatpush.bf16.xpose.msra.mxu1 %v1698_v25  ;;  %v3566_v42 = vpack.c.bf16 %v1410_v28, %v1408_v35 }
0x105a   :  { %v1691_v58 = vpop.permute.xlu0 %1690 }
0x1065   :  { %1786 = vrot.lane.b32.xlu2 %v3566_v42, %s2928_s30  ;;  %s3867_s30 = smov 40  }
0x10b7   :  { %v1550_v43 = vpop.f32.mrf.mxu2 }
0x10b8   :  { %v1454_v47 = vpop.xlane.xlu1 %1453 }
0x10b9   :  { %2841 = vrcp.f32 %v1454_v47 }
0x10bf   :  { %v2842_v31 = vpop.eup %2841  ;;  %v1552_v7 = vpop.f32.mrf.mxu2 }
0x10c0   :  { %v1457_v30 = vpop.xlane.xlu2 %1456  ;;  %v1460_v12 = vmul.f32 %v2842_v31, %v2838_v0  ;;  %v1555_v46 = vpack.c.bf16 %v1552_v7, %v1550_v43 }
0x10c1   :  { %2843 = vrcp.f32 %v1457_v30 }
0x10c7   :  { %v2844_v33 = vpop.eup %2843 }
0x10c8   :  { %v1461_v36 = vmul.f32 %v2844_v33, %v2840_v22  ;;  %v1787_v53 = vpop.permute.xlu2 %1786 }
0x10c9   :  { %v1792_v51 = vsel %vm253_vm8, %v1787_v53, 0  ;;  %v1662_v45 = vpop.f32.mrf.mxu2 }
0x10ca   :  { %v1462_v38 = vpack.c.bf16 %v1461_v36, %v1460_v12 }
0x10cc   :  { %2604 = vmatmul.msk.bf16.vlgmr.msra.gmra.mxu0 %vm279_vm9, %v1462_v38 }
0x10cd   :  { %1681 = vmatpush.bf16.msra.mxu0 %v1672_v39 }
0x10d1   :  { %v1664_v57 = vpop.f32.mrf.mxu2 }
0x10d2   :  { %v1667_v54 = vpack.c.bf16 %v1664_v57, %v1662_v45 }
0x10dc   :  { %2607 = vmatmul.msk.bf16.vlgmr.msrb.gmra.mxu0 %vm253_vm8, %v1555_v46 }
0x10dd   :  { %1801 = vmatpush.bf16.xpose.msrb.mxu0 %v1792_v51 }
0x10ec   :  { %2611 = vmatmul.msk.bf16.vlgmr.msra.gmra.mxu0 %vm253_vm8, %v1667_v54 }
0x10ed   :  { %1938 = vmatpush.bf16.msra.mxu0 %v1560_v29 }
0x10fc   :  { %2615 = vmatmul.msk.bf16.vlgmr.msrb.gmra.mxu0 %vm253_vm8, %v3566_v42 }
0x10fd   :  { %2044 = vmatpush.bf16.msrb.mxu0 %v1672_v39 }
0x1149   :  { %v1478_v49 = vpop.f32.mrf.mxu0 }
0x1151   :  { %v1480_v48 = vpop.f32.mrf.mxu0 }
0x1152   :  { %v1483_v55 = vpack.c.bf16 %v1480_v48, %v1478_v49 }
0x1154   :  { %2608 = vmatmul.msk.bf16.vlgmr.msrb.gmra.mxu1 %vm253_vm8, %v1483_v55 }
0x1159   :  { %v3585_v14 = vpop.f32.mrf.mxu0 }
0x1161   :  { %v3587_v56 = vpop.f32.mrf.mxu0 }
0x1164   :  { %2612 = vmatmul.msk.bf16.vlgmr.msra.gmra.mxu1 %vm253_vm8, %v1691_v58 }
0x1169   :  { %v3590_v59 = vpop.f32.mrf.mxu0 }
0x1171   :  { %v3592_v60 = vpop.f32.mrf.mxu0 }
0x1179   :  { %v1803_v41 = vpop.f32.mrf.mxu0 }
0x117a   :  { %v1808_v61 = vmul.f32 0.35355338, %v1803_v41 }
0x117c   :  { %v1810_v62 = vadd.f32 %v1808_v61, %v3215_v50 }
0x117e   :  { %v1812_v5 = vsel %vm279_vm9, %v1810_v62, -inf }
0x117f   :  { %1813 = vmax.xlane.f32.xlu0 %v1812_v5 }
0x1181   :  { %v1805_v8 = vpop.f32.mrf.mxu0 }
0x1182   :  { %v1809_v37 = vmul.f32 0.35355338, %v1805_v8 }
0x1184   :  { %v1811_v52 = vadd.f32 %v1809_v37, %v3215_v50 }
0x1186   :  { %v1815_v4 = vsel %vm279_vm9, %v1811_v52, -inf }
0x1187   :  { %1816 = vmax.xlane.f32.xlu2 %v1815_v4 }
0x11d1   :  { %v3598_v13 = vpop.f32.mrf.mxu1 }
0x11d9   :  { %v3600_v40 = vpop.f32.mrf.mxu1 }
0x11e1   :  { %v1709_v16 = vpop.f32.mrf.mxu1 }
0x11e2   :  { %v1714_v18 = vmul.f32 0.35355338, %v1709_v16 }
0x11e4   :  { %v1716_v19 = vadd.f32 %v1714_v18, %v3101_v1 }
0x11e6   :  { %v1718_v6 = vsel %vm279_vm9, %v1716_v19, -inf }
0x11e7   :  { %1719 = vmax.xlane.f32.xlu0 %v1718_v6 }
0x11e9   :  { %v1711_v0 = vpop.f32.mrf.mxu1 }
0x11ea   :  { %v1715_v44 = vmul.f32 0.35355338, %v1711_v0 }
0x11ec   :  { %v1717_v20 = vadd.f32 %v1715_v44, %v3101_v1  ;;  %v2569_v44 = vld [vmem:[%s3830_s4 + $0x1c] sm:$0xf] }
0x11ee   :  { %v1721_v11 = vsel %vm279_vm9, %v1717_v20, -inf }
0x11ef   :  { %1722 = vmax.xlane.f32.xlu2 %v1721_v11 }
0x11f2   :  { %v1814_v21 = vpop.xlane.xlu0 %1813 }
0x11f3   :  { %v1818_v22 = vsub.f32 %v1810_v62, %v1814_v21 }
0x11f5   :  { %v1820_v23 = vmul.f32 1.442695, %v1818_v22 }
0x11f7   :  { %2845 = vpow2.f32 %v1820_v23 }
0x11fa   :  { %v1817_v27 = vpop.xlane.xlu2 %1816 }
0x11fb   :  { %v1819_v24 = vsub.f32 %v1811_v52, %v1817_v27 }
0x11fd   :  { %v2846_v25 = vpop.eup %2845  ;;  %v1822_v26 = vmul.f32 1.442695, %v1819_v24 }
0x11fe   :  { %v1824_v28 = vsel %vm279_vm9, %v2846_v25, 0.0 }
0x11ff   :  { %2847 = vpow2.f32 %v1822_v26  ;;  %1825 = vadd.xlane.f32.xlu1 %v1824_v28 }
0x1205   :  { %v2848_v35 = vpop.eup %2847 }
0x1206   :  { %v1827_v63 = vsel %vm279_vm9, %v2848_v35, 0.0 }
0x1207   :  { %1741 = vrot.lane.b32.xlu2 %v3468_v9, %s3867_s30  ;;  %1828 = vadd.xlane.f32.xlu1 %v1827_v63 }
0x120f   :  { %1964 = vrot.lane.b32.xlu2 %v3566_v42, %s2933_s24 }
0x1217   :  { %1962 = vrot.lane.b32.xlu2 %v3566_v42, %s2931_s2 }
0x1220   :  { %1835 = vrot.lane.b32.xlu1 %v3566_v42, %s3864_s7 }
0x125a   :  { %v1720_v1 = vpop.xlane.xlu0 %1719 }
0x125b   :  { %v1724_v29 = vsub.f32 %v1716_v19, %v1720_v1 }
0x125d   :  { %v1726_v47 = vmul.f32 1.442695, %v1724_v29 }
0x125f   :  { %2849 = vpow2.f32 %v1726_v47 }
0x1262   :  { %v1723_v30 = vpop.xlane.xlu2 %1722 }
0x1263   :  { %v1725_v31 = vsub.f32 %v1717_v20, %v1723_v30  ;;  %v3640_v20 = vsel %vm399_vm10, %v2569_v44, 0 }
0x1264   :  { %1775 = vmatpush.bf16.msrb.mxu2 %v3640_v20 }
0x1265   :  { %v2850_v33 = vpop.eup %2849  ;;  %v1728_v2 = vmul.f32 1.442695, %v1725_v31 }
0x1266   :  { %v1730_v9 = vsel %vm279_vm9, %v2850_v33, 0.0 }
0x1267   :  { %2851 = vpow2.f32 %v1728_v2  ;;  %1731 = vadd.xlane.f32.xlu0 %v1730_v9 }
0x126a   :  { %v1742_v12 = vpop.permute.xlu2 %1741 }
0x126b   :  { %1754 = vmatpush.bf16.msrb.mxu3 %v1742_v12 }
0x126d   :  { %v2852_v36 = vpop.eup %2851 }
0x126e   :  { %v1733_v38 = vsel %vm279_vm9, %v2852_v36, 0.0 }
0x126f   :  { %1734 = vadd.xlane.f32.xlu1 %v1733_v38 }
0x1272   :  { %v1826_v39 = vpop.xlane.xlu1 %1825  ;;  %v1965_v61 = vpop.permute.xlu2 %1964 }
0x1273   :  { %v1970_v37 = vsel %vm253_vm8, %v1965_v61, 0 }
0x127a   :  { %v1829_v43 = vpop.xlane.xlu1 %1828  ;;  %v1963_v16 = vpop.permute.xlu2 %1962 }
0x127b   :  { %1858 = vrot.lane.b32.xlu0 %v3566_v42, %s2929_s0  ;;  %2853 = vrcp.f32 %v1829_v43 }
0x127c   :  { %2855 = vrcp.f32 %v1826_v39 }
0x1281   :  { %v2854_v7 = vpop.eup %2853 }
0x1282   :  { %v2856_v53 = vpop.eup %2855  ;;  %v1833_v46 = vmul.f32 %v2854_v7, %v2848_v35 }
0x1283   :  { %1856 = vrot.lane.b32.xlu0 %v3566_v42, %s2927_s28  ;;  %v1832_v51 = vmul.f32 %v2856_v53, %v2846_v25 }
0x1285   :  { %v1834_v57 = vpack.c.bf16 %v1833_v46, %v1832_v51 }
0x1288   :  { %2053 = vrot.lane.b32.xlu1 %v3566_v42, %s3866_s25 }
0x128b   :  { %2055 = vrot.lane.b32.xlu0 %v3566_v42, %s3865_s22 }
0x1292   :  { %v1836_v45 = vpop.permute.xlu1 %1835 }
0x1293   :  { %1848 = vmatpush.bf16.msrb.mxu1 %v1836_v45 }
0x1296   :  { %2616 = vmatmul.msk.bf16.vlgmr.msrb.gmra.mxu1 %vm279_vm9, %v1834_v57 }
0x1297   :  { %1955 = vmatpush.bf16.msra.mxu1 %v3556_v32 }
0x12da   :  { %v1732_v54 = vpop.xlane.xlu0 %1731 }
0x12db   :  { %2857 = vrcp.f32 %v1732_v54 }
0x12e1   :  { %v2858_v48 = vpop.eup %2857 }
0x12e2   :  { %v1735_v49 = vpop.xlane.xlu1 %1734  ;;  %v1738_v58 = vmul.f32 %v2858_v48, %v2850_v33 }
0x12e3   :  { %2859 = vrcp.f32 %v1735_v49 }
0x12e9   :  { %v2860_v55 = vpop.eup %2859 }
0x12ea   :  { %v1739_v41 = vmul.f32 %v2860_v55, %v2852_v36 }
0x12ec   :  { %v1740_v62 = vpack.c.bf16 %v1739_v41, %v1738_v58 }
0x12ed   :  { %v1859_v5 = vpop.permute.xlu0 %1858 }
0x12ee   :  { %v1864_v8 = vsel %vm253_vm8, %v1859_v5, 0  ;;  %2613 = vmatmul.msk.bf16.vlgmr.msrb.gmra.mxu3 %vm279_vm9, %v1740_v62 }
0x12ef   :  { %1873 = vmatpush.bf16.xpose.msra.mxu3 %v1864_v8 }
0x12f5   :  { %v1857_v32 = vpop.permute.xlu0 %1856 }
0x12f7   :  { %1979 = vmatpush.bf16.xpose.msrb.mxu3 %v1970_v37 }
0x12fa   :  { %v2054_v0 = vpop.permute.xlu1 %2053 }
0x12fd   :  { %v2056_v52 = vpop.permute.xlu0 %2055 }
0x12fe   :  { %v2061_v4 = vsel %vm253_vm8, %v2056_v52, 0  ;;  %2617 = vmatmul.msk.bf16.vlgmr.msra.gmra.mxu3 %vm253_vm8, %v1857_v32 }
0x12ff   :  { %2070 = vmatpush.bf16.xpose.msrb.mxu1 %v2061_v4 }
0x130e   :  { %2621 = vmatmul.msk.bf16.vlgmr.msrb.gmra.mxu3 %vm253_vm8, %v1963_v16 }
0x1313   :  { %v1850_v18 = vpop.f32.mrf.mxu1 }
0x131b   :  { %v1852_v19 = vpop.f32.mrf.mxu1 }
0x131c   :  { %v1855_v6 = vpack.c.bf16 %v1852_v19, %v1850_v18 }
0x131e   :  { %2620 = vmatmul.msk.bf16.vlgmr.msra.gmra.mxu1 %vm253_vm8, %v1855_v6 }
0x132e   :  { %2624 = vmatmul.msk.bf16.vlgmr.msrb.gmra.mxu1 %vm253_vm8, %v2054_v0 }
0x1371   :  { %v1756_v11 = vpop.f32.mrf.mxu3 }
0x1379   :  { %v1758_v21 = vpop.f32.mrf.mxu3 }
0x137a   :  { %v1761_v22 = vpack.c.bf16 %v1758_v21, %v1756_v11 }
0x137c   :  { %2614 = vmatmul.msk.bf16.vlgmr.msrb.gmra.mxu2 %vm253_vm8, %v1761_v22 }
0x1381   :  { %v1875_v23 = vpop.f32.mrf.mxu3 }
0x1382   :  { %v1880_v27 = vmul.f32 0.35355338, %v1875_v23 }
0x1384   :  { %v1882_v24 = vadd.f32 %v1880_v27, %v3215_v50 }
0x1386   :  { %v1884_v25 = vsel %vm279_vm9, %v1882_v24, -inf }
0x1387   :  { %1885 = vmax.xlane.f32.xlu0 %v1884_v25  ;;  %v1592_v25 = vadd.f32 %v3598_v13, %v3585_v14 }
0x1389   :  { %v1877_v26 = vpop.f32.mrf.mxu3 }
0x138a   :  { %v1881_v28 = vmul.f32 0.35355338, %v1877_v26 }
0x138c   :  { %v1883_v35 = vadd.f32 %v1881_v28, %v3215_v50 }
0x138e   :  { %v1887_v63 = vsel %vm279_vm9, %v1883_v35, -inf }
0x138f   :  { %1888 = vmax.xlane.f32.xlu2 %v1887_v63  ;;  %v1688_v63 = vadd.f32 %v3590_v59, %v1592_v25  ;;  %v1594_v59 = vadd.f32 %v3600_v40, %v3587_v56 }
0x1391   :  { %v1981_v1 = vpop.f32.mrf.mxu3 }
0x1392   :  { %v1986_v29 = vmul.f32 0.35355338, %v1981_v1 }
0x1394   :  { %v1988_v47 = vadd.f32 %v1986_v29, %v3215_v50  ;;  %v3683_v29 = vld [vmem:[%s3831_s5 + $0x1] ss:$0 sm:$0xff] }
0x1396   :  { %v1990_v30 = vsel %vm279_vm9, %v1988_v47, -inf }
0x1397   :  { %1991 = vmax.xlane.f32.xlu2 %v1990_v30 }
0x1399   :  { %v1983_v31 = vpop.f32.mrf.mxu3 }
0x139a   :  { %v1987_v33 = vmul.f32 0.35355338, %v1983_v31  ;;  %v1689_v31 = vadd.f32 %v3592_v60, %v1594_v59 }
0x139b   :  { %v3650_v2 = vpop.f32.mrf.mxu1 }
0x139c   :  { %v1989_v9 = vadd.f32 %v1987_v33, %v3215_v50 }
0x139e   :  { %v1993_v12 = vsel %vm279_vm9, %v1989_v9, -inf }
0x139f   :  { %1994 = vmax.xlane.f32.xlu0 %v1993_v12 }
0x13a3   :  { %v3654_v36 = vpop.f32.mrf.mxu1 }
0x13ab   :  { %v2072_v38 = vpop.f32.mrf.mxu1 }
0x13ac   :  { %v2077_v39 = vmul.f32 0.35355338, %v2072_v38 }
0x13ae   :  { %v2079_v43 = vadd.f32 %v2077_v39, %v3215_v50 }
0x13b0   :  { %v2081_v7 = vsel %vm279_vm9, %v2079_v43, -inf }
0x13b1   :  { %2082 = vmax.xlane.f32.xlu1 %v2081_v7 }
0x13b3   :  { %v2074_v53 = vpop.f32.mrf.mxu1 }
0x13b4   :  { %v2078_v46 = vmul.f32 0.35355338, %v2074_v53 }
0x13b6   :  { %v2080_v51 = vadd.f32 %v2078_v46, %v3215_v50 }
0x13b8   :  { %v2084_v45 = vsel %vm279_vm9, %v2080_v51, -inf }
0x13b9   :  { %2085 = vmax.xlane.f32.xlu0 %v2084_v45 }
0x13fa   :  { %v1886_v57 = vpop.xlane.xlu0 %1885 }
0x13fb   :  { %v1890_v54 = vsub.f32 %v1882_v24, %v1886_v57 }
0x13fd   :  { %v1892_v49 = vmul.f32 1.442695, %v1890_v54 }
0x13ff   :  { %2861 = vpow2.f32 %v1892_v49  ;;  %v1777_v28 = vpop.f32.mrf.mxu2 }
0x1400   :  { %v1782_v1 = vadd.f32 %v1777_v28, %v1688_v63 }
0x1402   :  { %v1889_v48 = vpop.xlane.xlu2 %1888 }
0x1403   :  { %v1891_v55 = vsub.f32 %v1883_v35, %v1889_v48 }
0x1405   :  { %v3660_v58 = vpop.eup %2861  ;;  %v1894_v41 = vmul.f32 1.442695, %v1891_v55 }
0x1406   :  { %v1896_v61 = vsel %vm279_vm9, %v3660_v58, 0.0 }
0x1407   :  { %2863 = vpow2.f32 %v1894_v41  ;;  %1897 = vadd.xlane.f32.xlu2 %v1896_v61  ;;  %v1779_v13 = vpop.f32.mrf.mxu2 }
0x1408   :  { %v1783_v33 = vadd.f32 %v1779_v13, %v1689_v31 }
0x140a   :  { %v1992_v62 = vpop.xlane.xlu2 %1991 }
0x140b   :  { %v1996_v5 = vsub.f32 %v1988_v47, %v1992_v62  ;;  %v2149_v47 = vadd.f32 %v3683_v29, %v1782_v1 }
0x140d   :  { %v2864_v50 = vpop.eup %2863  ;;  %v1998_v8 = vmul.f32 1.442695, %v1996_v5  ;;  %v3687_v30 = vadd.f32 %v2149_v47, %v3422_v15  ;;  %v2150_v15 = vadd.f32 %v3683_v29, %v1783_v33 }
0x140e   :  { %v1899_v37 = vsel %vm279_vm9, %v2864_v50, 0.0 }
0x140f   :  { %2865 = vpow2.f32 %v1998_v8  ;;  %1900 = vadd.xlane.f32.xlu0 %v1899_v37  ;;  %v2161_v14 = vsel %vm96_vm0, %v3687_v30, 0.0 }
0x1412   :  { %v1995_v32 = vpop.xlane.xlu0 %1994 }
0x1413   :  { %v1997_v52 = vsub.f32 %v1989_v9, %v1995_v32  ;;  %v3700_v9 = vadd.f32 %v2150_v15, %v3428_v17 }
0x1415   :  { %v3665_v4 = vpop.eup %2865  ;;  %v2000_v16 = vmul.f32 1.442695, %v1997_v52  ;;  %v2164_v12 = vsel %vm96_vm0, %v3700_v9, 0.0 }
0x1416   :  { %v2002_v18 = vsel %vm279_vm9, %v3665_v4, 0.0 }
0x1417   :  { %2867 = vpow2.f32 %v2000_v16  ;;  %2003 = vadd.xlane.f32.xlu0 %v2002_v18 }
0x141d   :  { %v3669_v19 = vpop.eup %2867 }
0x141e   :  { %v2005_v6 = vsel %vm279_vm9, %v3669_v19, 0.0 }
0x141f   :  { %1907 = vrot.lane.b32.xlu2 %v3566_v42, %s2932_s23  ;;  %2006 = vadd.xlane.f32.xlu1 %v2005_v6 }
0x1424   :  { %v2083_v0 = vpop.xlane.xlu1 %2082 }
0x1425   :  { %v2087_v44 = vsub.f32 %v2079_v43, %v2083_v0 }
0x1427   :  { %v2089_v11 = vmul.f32 1.442695, %v2087_v44 }
0x1429   :  { %2869 = vpow2.f32 %v2089_v11 }
0x142c   :  { %v2086_v21 = vpop.xlane.xlu0 %2085 }
0x142d   :  { %v2088_v22 = vsub.f32 %v2080_v51, %v2086_v21 }
0x142f   :  { %v2870_v23 = vpop.eup %2869  ;;  %v2091_v27 = vmul.f32 1.442695, %v2088_v22 }
0x1430   :  { %v2093_v24 = vsel %vm279_vm9, %v2870_v23, 0.0 }
0x1431   :  { %2871 = vpow2.f32 %v2091_v27  ;;  %2094 = vadd.xlane.f32.xlu0 %v2093_v24 }
0x1437   :  { %v2872_v26 = vpop.eup %2871 }
0x1438   :  { %v2096_v35 = vsel %vm279_vm9, %v2872_v26, 0.0 }
0x1439   :  { %2097 = vadd.xlane.f32.xlu1 %v2096_v35 }
0x1445   :  { %2104 = vrot.lane.b32.xlu0 %v3566_v42, %s3867_s30 }
0x1448   :  { %2162 = vadd.xlane.f32.xlu2 %v2161_v14 }
0x1452   :  { %2013 = vrot.lane.b32.xlu1 %v3566_v42, %s3863_s3 }
0x146f   :  { %2165 = vadd.xlane.f32.xlu0 %v2164_v12 }
0x147a   :  { %v1898_v38 = vpop.xlane.xlu2 %1897 }
0x147b   :  { %2873 = vrcp.f32 %v1898_v38 }
0x1481   :  { %v2874_v56 = vpop.eup %2873 }
0x1482   :  { %v1901_v39 = vpop.xlane.xlu0 %1900  ;;  %v1908_v42 = vpop.permute.xlu2 %1907  ;;  %v1904_v60 = vmul.f32 %v2874_v56, %v3660_v58 }
0x1483   :  { %2875 = vrcp.f32 %v1901_v39  ;;  %1920 = vmatpush.bf16.msra.mxu2 %v1908_v42 }
0x1489   :  { %v2876_v40 = vpop.eup %2875 }
0x148a   :  { %v1905_v43 = vmul.f32 %v2876_v40, %v2864_v50  ;;  %v2004_v17 = vpop.xlane.xlu0 %2003 }
0x148c   :  { %v1906_v7 = vpack.c.bf16 %v1905_v43, %v1904_v60 }
0x148e   :  { %2618 = vmatmul.msk.bf16.vlgmr.msra.gmra.mxu2 %vm279_vm9, %v1906_v7 }
0x1492   :  { %v2007_v53 = vpop.xlane.xlu1 %2006 }
0x14a4   :  { %v2095_v46 = vpop.xlane.xlu0 %2094 }
0x14ac   :  { %v2098_v51 = vpop.xlane.xlu1 %2097 }
0x14ad   :  { %2877 = vrcp.f32 %v2098_v51 }
0x14ae   :  { %2879 = vrcp.f32 %v2095_v46 }
0x14af   :  { %2881 = vrcp.f32 %v2007_v53  ;;  %v2690_v53 = vld [vmem:[%s3836_s10 + $0x18] sm:$0xff] }
0x14b0   :  { %2883 = vrcp.f32 %v2004_v17 }
0x14b3   :  { %v2878_v45 = vpop.eup %2877 }
0x14b4   :  { %v2880_v57 = vpop.eup %2879  ;;  %v2102_v54 = vmul.f32 %v2878_v45, %v2872_v26 }
0x14b5   :  { %v2101_v49 = vmul.f32 %v2880_v57, %v2870_v23  ;;  %v2882_v58 = vpop.eup %2881  ;;  %v2689_v57 = vld [vmem:[%s3836_s10 + $0x10] sm:$0xff] }
0x14b6   :  { %v2884_v41 = vpop.eup %2883  ;;  %v2011_v61 = vmul.f32 %v2882_v58, %v3669_v19 }
0x14b7   :  { %v2105_v48 = vpop.permute.xlu0 %2104  ;;  %v2103_v55 = vpack.c.bf16 %v2102_v54, %v2101_v49  ;;  %v2010_v62 = vmul.f32 %v2884_v41, %v3665_v4 }
0x14b8   :  { %2117 = vmatpush.bf16.msra.mxu3 %v2105_v48 }
0x14b9   :  { %v2012_v50 = vpack.c.bf16 %v2011_v61, %v2010_v62 }
0x14bb   :  { %2625 = vmatmul.msk.bf16.vlgmr.msra.gmra.mxu3 %vm279_vm9, %v2103_v55  ;;  %v2163_v63 = vpop.xlane.xlu2 %2162 }
0x14bc   :  { %v2173_v47 = vmul.f32 %v2163_v63, %v3045_v10 }
0x14c4   :  { %v2014_v5 = vpop.permute.xlu1 %2013 }
0x14c5   :  { %2026 = vmatpush.bf16.msrb.mxu2 %v2014_v5 }
0x14c8   :  { %2622 = vmatmul.msk.bf16.vlgmr.msrb.gmra.mxu2 %vm279_vm9, %v2012_v50 }
0x14c9   :  { %2135 = vmatpush.bf16.msra.mxu2 %v3640_v20 }
0x14e2   :  { %v2166_v13 = vpop.xlane.xlu0 %2165 }
0x14e3   :  { %v2174_v31 = vmul.f32 %v2166_v13, %v3045_v10  ;;  %v2695_v13 = vld [vmem:[%s3838_s12 + $0x60] sm:$0xff] }
0x14e5   :  { %v2178_v15 = vsub.f32 %v3700_v9, %v2174_v31 }
0x14e7   :  { %v2182_v38 = vmul.f32 %v2178_v15, %v2178_v15 }
0x14e9   :  { %v2188_v39 = vsel %vm96_vm0, %v2182_v38, 0.0 }
0x1511   :  { %v1922_v8 = vpop.f32.mrf.mxu2 }
0x1519   :  { %v1924_v37 = vpop.f32.mrf.mxu2 }
0x151a   :  { %v1927_v32 = vpack.c.bf16 %v1924_v37, %v1922_v8 }
0x151c   :  { %2619 = vmatmul.msk.bf16.vlgmr.msra.gmra.mxu0 %vm253_vm8, %v1927_v32 }
0x151d   :  { %2294 = vmatpush.bf16.msra.mxu0 %v2690_v53 }
0x1521   :  { %2295 = vmatpush.bf16.msra.mxu0 %v2689_v57  ;;  %v2691_v57 = vld [vmem:[%s3838_s12 + $0x40] sm:$0xff] }
0x153e   :  { %v2119_v52 = vpop.f32.mrf.mxu3 }
0x1546   :  { %v2121_v16 = vpop.f32.mrf.mxu3 }
0x1547   :  { %v2124_v18 = vpack.c.bf16 %v2121_v16, %v2119_v52 }
0x1549   :  { %2626 = vmatmul.msk.bf16.vlgmr.msra.gmra.mxu2 %vm253_vm8, %v2124_v18  ;;  %v2724_v18 = vld [vmem:[%s3834_s8 + $0x1] ss:$0 sm:$0xff] }
0x154b   :  { %v2028_v19 = vpop.f32.mrf.mxu2 }
0x1553   :  { %v2030_v6 = vpop.f32.mrf.mxu2 }
0x1554   :  { %v2033_v4 = vpack.c.bf16 %v2030_v6, %v2028_v19 }
0x1556   :  { %2623 = vmatmul.msk.bf16.vlgmr.msrb.gmra.mxu0 %vm253_vm8, %v2033_v4 }
0x1599   :  { %v1940_v0 = vpop.f32.mrf.mxu0 }
0x159a   :  { %v1958_v20 = vadd.f32 %v3650_v2, %v1940_v0  ;;  %v2725_v0 = vld [vmem:[%s3835_s9 + $0x1] ss:$0 sm:$0xff] }
0x15a1   :  { %v1942_v44 = vpop.f32.mrf.mxu0 }
0x15a2   :  { %v1960_v24 = vadd.f32 %v3654_v36, %v1942_v44  ;;  %v2177_v36 = vsub.f32 %v3687_v30, %v2173_v47 }
0x15a4   :  { %v2181_v33 = vmul.f32 %v2177_v36, %v2177_v36 }
0x15a6   :  { %v2185_v12 = vsel %vm96_vm0, %v2181_v33, 0.0 }
0x15cc   :  { %v2137_v11 = vpop.f32.mrf.mxu2 }
0x15d3   :  { %v2046_v21 = vpop.f32.mrf.mxu0 }
0x15d4   :  { %v2051_v22 = vadd.f32 %v2046_v21, %v1958_v20  ;;  %v2139_v1 = vpop.f32.mrf.mxu2 }
0x15d6   :  { %v2142_v23 = vadd.f32 %v2137_v11, %v2051_v22 }
0x15d8   :  { %v2151_v27 = vadd.f32 %v3683_v29, %v2142_v23 }
0x15da   :  { %v3718_v25 = vadd.f32 %v2151_v27, %v3486_v34 }
0x15db   :  { %v2048_v26 = vpop.f32.mrf.mxu0 }
0x15dc   :  { %v2052_v28 = vadd.f32 %v2048_v26, %v1960_v24  ;;  %v2167_v35 = vsel %vm96_vm0, %v3718_v25, 0.0 }
0x15dd   :  { %2168 = vadd.xlane.f32.xlu1 %v2167_v35 }
0x15de   :  { %v2143_v2 = vadd.f32 %v2139_v1, %v2052_v28  ;;  %v2698_v28 = vld [vmem:[%s3838_s12 + $0x78] sm:$0xff]  ;;  %v2697_v1 = vld [vmem:[%s3838_s12 + $0x70] sm:$0xff] }
0x15df   :  { %2361 = vmatpush.bf16.msra.mxu1 %v2698_v28 }
0x15e0   :  { %v2152_v14 = vadd.f32 %v3683_v29, %v2143_v2 }
0x15e2   :  { %v2156_v59 = vadd.f32 %v2152_v14, %v3483_v3 }
0x15e3   :  { %2362 = vmatpush.bf16.msra.mxu1 %v2697_v1  ;;  %v2426_v1 = vld [vmem:[%s3842_s16 + $0x8] sm:$0xff] }
0x15e4   :  { %v2170_v34 = vsel %vm96_vm0, %v2156_v59, 0.0 }
0x15e5   :  { %2171 = vadd.xlane.f32.xlu2 %v2170_v34 }
0x15ed   :  { %2186 = vadd.xlane.f32.xlu2 %v2185_v12 }
0x15f5   :  { %2189 = vadd.xlane.f32.xlu2 %v2188_v39 }
0x1650   :  { %v2169_v29 = vpop.xlane.xlu1 %2168 }
0x1651   :  { %v2175_v3 = vmul.f32 %v2169_v29, %v3045_v10 }
0x1653   :  { %v3733_v42 = vsub.f32 %v3718_v25, %v2175_v3  ;;  %v2694_v3 = vld [vmem:[%s3838_s12 + $0x58] sm:$0xff] }
0x1655   :  { %v2183_v56 = vmul.f32 %v3733_v42, %v3733_v42 }
0x1657   :  { %v2191_v40 = vsel %vm96_vm0, %v2183_v56, 0.0 }
0x1658   :  { %2192 = vadd.xlane.f32.xlu0 %v2191_v40  ;;  %v2172_v9 = vpop.xlane.xlu2 %2171 }
0x1659   :  { %v2176_v60 = vmul.f32 %v2172_v9, %v3045_v10 }
0x165b   :  { %v3739_v43 = vsub.f32 %v2156_v59, %v2176_v60  ;;  %v2696_v59 = vld [vmem:[%s3838_s12 + $0x68] sm:$0xff]  ;;  %v2693_v60 = vld [vmem:[%s3838_s12 + $0x50] sm:$0xff] }
0x165c   :  { %2363 = vmatpush.bf16.msra.mxu1 %v2696_v59 }
0x165d   :  { %v2184_v7 = vmul.f32 %v3739_v43, %v3739_v43 }
0x165f   :  { %v2194_v17 = vsel %vm96_vm0, %v2184_v7, 0.0 }
0x1660   :  { %2195 = vadd.xlane.f32.xlu2 %v2194_v17  ;;  %v2187_v46 = vpop.xlane.xlu2 %2186  ;;  %2364 = vmatpush.bf16.msra.mxu1 %v2695_v13 }
0x1661   :  { %v2197_v51 = vmul.f32 %v2187_v46, %v3045_v10  ;;  %v2692_v46 = vld [vmem:[%s3838_s12 + $0x48] sm:$0xff] }
0x1663   :  { %v2201_v45 = vadd.f32 1e-06, %v2197_v51 }
0x1664   :  { %2365 = vmatpush.bf16.msra.mxu1 %v2694_v3 }
0x1665   :  { %2885 = vrsqrt.f32 %v2201_v45  ;;  %vm2211_vm9 = vweird.f32 %v2201_v45 }
0x1668   :  { %v2190_v54 = vpop.xlane.xlu2 %2189  ;;  %2366 = vmatpush.bf16.msra.mxu1 %v2693_v60 }
0x1669   :  { %v2198_v49 = vmul.f32 %v2190_v54, %v3045_v10 }
0x166b   :  { %v2886_v48 = vpop.eup %2885  ;;  %v2202_v55 = vadd.f32 1e-06, %v2198_v49 }
0x166c   :  { %v2206_v58 = vmul.f32 %v2886_v48, %v2201_v45  ;;  %vm2212_vm8 = vweird.f32 %v2886_v48  ;;  %2367 = vmatpush.bf16.msra.mxu1 %v2692_v46 }
0x166d   :  { %2887 = vrsqrt.f32 %v2202_v55  ;;  %vm2213_vm10 = vmor %vm2211_vm9, %vm2212_vm8  ;;  %vm2221_vm3 = vweird.f32 %v2202_v55 }
0x166e   :  { %v2207_v41 = vmul.f32 %v2886_v48, %v2206_v58 }
0x1670   :  { %v2208_v61 = vmul.f32 0.5, %v2207_v41  ;;  %2368 = vmatpush.bf16.msra.mxu1 %v2691_v57 }
0x1672   :  { %v2209_v62 = vsub.f32 1.5, %v2208_v61 }
0x1673   :  { %v2888_v5 = vpop.eup %2887 }
0x1674   :  { %v2210_v50 = vmul.f32 %v2886_v48, %v2209_v62  ;;  %v2216_v8 = vmul.f32 %v2888_v5, %v2202_v55  ;;  %vm2222_vm2 = vweird.f32 %v2888_v5 }
0x1675   :  { %vm2223_vm4 = vmor %vm2221_vm3, %vm2222_vm2 }
0x1676   :  { %v2217_v37 = vmul.f32 %v2888_v5, %v2216_v8  ;;  %v2214_v32 = vsel %vm2213_vm10, %v2886_v48, %v2210_v50  ;;  %vm2456_vm10 = vcmask 17408  }
0x1677   :  { %v2245_v19 = vmul.f32 %v2214_v32, %v2177_v36 }
0x1678   :  { %v2218_v52 = vmul.f32 0.5, %v2217_v37 }
0x1679   :  { %v2252_v44 = vmul.f32 %v2724_v18, %v2245_v19 }
0x167a   :  { %v2219_v16 = vsub.f32 1.5, %v2218_v52 }
0x167b   :  { %v2259_v21 = vadd.f32 %v2725_v0, %v2252_v44 }
0x167c   :  { %v2220_v6 = vmul.f32 %v2888_v5, %v2219_v16 }
0x167e   :  { %v2224_v4 = vsel %vm2223_vm4, %v2888_v5, %v2220_v6 }
0x167f   :  { %v2246_v20 = vmul.f32 %v2224_v4, %v2178_v15 }
0x1681   :  { %v2253_v11 = vmul.f32 %v2724_v18, %v2246_v20 }
0x1683   :  { %v2260_v22 = vadd.f32 %v2725_v0, %v2253_v11 }
0x1685   :  { %v2263_v23 = vpack.c.bf16 %v2260_v22, %v2259_v21 }
0x1687   :  { %2639 = vmatmul.msk.bf16.vlgmr.msra.gmra.mxu0 %vm96_vm0, %v2263_v23 }
0x16cb   :  { %v2193_v27 = vpop.xlane.xlu0 %2192 }
0x16cc   :  { %v2199_v24 = vmul.f32 %v2193_v27, %v3045_v10 }
0x16ce   :  { %v2203_v26 = vadd.f32 1e-06, %v2199_v24 }
0x16d0   :  { %2889 = vrsqrt.f32 %v2203_v26  ;;  %vm2231_vm6 = vweird.f32 %v2203_v26 }
0x16d3   :  { %v2196_v35 = vpop.xlane.xlu2 %2195 }
0x16d4   :  { %v2200_v63 = vmul.f32 %v2196_v35, %v3045_v10 }
0x16d6   :  { %v2890_v2 = vpop.eup %2889  ;;  %v2204_v47 = vadd.f32 1e-06, %v2200_v63  ;;  %v2427_v63 = vld [vmem:[%s3842_s16 + $0x10] sm:$0xff] }
0x16d7   :  { %v2226_v14 = vmul.f32 %v2890_v2, %v2203_v26  ;;  %vm2232_vm5 = vweird.f32 %v2890_v2 }
0x16d8   :  { %2891 = vrsqrt.f32 %v2204_v47  ;;  %vm2233_vm7 = vmor %vm2231_vm6, %vm2232_vm5  ;;  %vm2241_vm12 = vweird.f32 %v2204_v47 }
0x16d9   :  { %v2227_v36 = vmul.f32 %v2890_v2, %v2226_v14 }
0x16db   :  { %v2228_v34 = vmul.f32 0.5, %v2227_v36 }
0x16dd   :  { %v2229_v31 = vsub.f32 1.5, %v2228_v34 }
0x16de   :  { %v2892_v33 = vpop.eup %2891 }
0x16df   :  { %v2230_v15 = vmul.f32 %v2890_v2, %v2229_v31  ;;  %v2236_v12 = vmul.f32 %v2892_v33, %v2204_v47  ;;  %vm2242_vm11 = vweird.f32 %v2892_v33 }
0x16e0   :  { %vm2243_vm13 = vmor %vm2241_vm12, %vm2242_vm11 }
0x16e1   :  { %v2237_v38 = vmul.f32 %v2892_v33, %v2236_v12  ;;  %v2234_v39 = vsel %vm2233_vm7, %v2890_v2, %v2230_v15  ;;  %v2425_v2 = vld [vmem:[%s3842_s16] sm:$0xff] }
0x16e2   :  { %v2247_v40 = vmul.f32 %v2234_v39, %v3733_v42  ;;  %v2728_v12 = vld [vmem:[%s3840_s14] ss:$0 sm:$0xff]  ;;  %s2938_s14 = smov [#allocation2]  }
0x16e3   :  { %v2238_v29 = vmul.f32 0.5, %v2237_v38 }
0x16e4   :  { %v2254_v53 = vmul.f32 %v2724_v18, %v2247_v40 }
0x16e5   :  { %v2239_v56 = vsub.f32 1.5, %v2238_v29 }
0x16e6   :  { %v2261_v45 = vadd.f32 %v2725_v0, %v2254_v53 }
0x16e7   :  { %v2240_v9 = vmul.f32 %v2892_v33, %v2239_v56  ;;  %v2730_v56 = vld [vmem:[%s3843_s17] ss:$0 sm:$0xff] }
0x16e9   :  { %v2244_v7 = vsel %vm2243_vm13, %v2892_v33, %v2240_v9 }
0x16ea   :  { %v2248_v17 = vmul.f32 %v2244_v7, %v3739_v43  ;;  %v2726_v43 = vld [vmem:[%s3837_s11 + $0x1] ss:$0 sm:$0xff] }
0x16ec   :  { %v2255_v51 = vmul.f32 %v2724_v18, %v2248_v17 }
0x16ee   :  { %v2262_v42 = vadd.f32 %v2725_v0, %v2255_v51  ;;  %v2727_v0 = vld [vmem:[%s3839_s13 + $0x1] ss:$0 sm:$0xff] }
0x16f0   :  { %v2264_v54 = vpack.c.bf16 %v2262_v42, %v2261_v45 }
0x16f2   :  { %2640 = vmatmul.msk.bf16.gmra.mxu0 %vm96_vm0, %v2264_v54 }
0x1704   :  { %v2297_v49 = vpop.f32.mrf.mxu0 }
0x1705   :  { %v2298_v48 = vadd.f32 %v2726_v43, %v2297_v49 }
0x1707   :  { %v2307_v41 = vmax.f32 %v2298_v48, 0.0 }
0x170c   :  { %v2299_v55 = vpop.f32.mrf.mxu0 }
0x170d   :  { %v2300_v58 = vadd.f32 %v2726_v43, %v2299_v55 }
0x170f   :  { %v2308_v61 = vmax.f32 %v2300_v58, 0.0 }
0x1711   :  { %v2311_v62 = vpack.c.bf16 %v2308_v61, %v2307_v41 }
0x1713   :  { %2369 = vmatmul.bf16.vlgmr.msra.gmra.mxu1 %v2311_v62 }
0x176f   :  { %v2302_v5 = vpop.f32.mrf.mxu0 }
0x1770   :  { %v2303_v50 = vadd.f32 %v2726_v43, %v2302_v5 }
0x1772   :  { %v2309_v32 = vmax.f32 %v2303_v50, 0.0 }
0x1777   :  { %v2304_v8 = vpop.f32.mrf.mxu0 }
0x1778   :  { %v2305_v37 = vadd.f32 %v2726_v43, %v2304_v8 }
0x177a   :  { %v2310_v52 = vmax.f32 %v2305_v37, 0.0 }
0x177c   :  { %v2312_v16 = vpack.c.bf16 %v2310_v52, %v2309_v32 }
0x177e   :  { %2373 = vmatmul.bf16.gmra.mxu1 %v2312_v16 }
0x1790   :  { %v2370_v18 = vpop.f32.mrf.mxu1 }
0x1791   :  { %v2378_v4 = vadd.f32 %v2370_v18, %v3687_v30 }
0x1793   :  { %v2385_v11 = vadd.f32 %v2727_v0, %v2378_v4 }
0x1798   :  { %v2372_v19 = vpop.f32.mrf.mxu1 }
0x17fb   :  { %v2374_v6 = vpop.f32.mrf.mxu1 }
0x17fc   :  { %v2379_v44 = vadd.f32 %v2374_v6, %v3718_v25  ;;  %v2428_v25 = vld [vmem:[%s3842_s16 + $0x18] sm:$0xff] }
0x17fd   :  { %2448 = vmatpush.msrb.mxu3 %v2428_v25 }
0x17fe   :  { %v2386_v20 = vadd.f32 %v2727_v0, %v2379_v44 }
0x17ff   :  { %2449 = vmatpush.msrb.mxu3 %v2427_v63 }
0x1800   :  { %v2388_v21 = vrot.slane %v2386_v20, 7 }
0x1801   :  { %2450 = vmatpush.msrb.mxu3 %v2426_v1 }
0x1802   :  { %v2391_v22 = vsel %vm2390_vm14, %v2385_v11, %v2388_v21 }
0x1803   :  { %v2376_v23 = vpop.f32.mrf.mxu1  ;;  %v2395_v27 = vsel %vm2394_vm15, %v2391_v22, 0.0  ;;  %2451 = vmatpush.msrb.mxu3 %v2425_v2 }
0x1804   :  { %2396 = vadd.xlane.f32.xlu1 %v2395_v27 }
0x1877   :  { %v2397_v24 = vpop.xlane.xlu1 %2396 }
0x1878   :  { %v2398_v26 = vmul.f32 %v2397_v24, %v3045_v10 }
0x187a   :  { %v2399_v28 = vsub.f32 %v2391_v22, %v2398_v26 }
0x187c   :  { %v2400_v30 = vmul.f32 %v2399_v28, %v2399_v28 }
0x187e   :  { %v2401_v35 = vsel %vm2394_vm15, %v2400_v30, 0.0 }
0x187f   :  { %2402 = vadd.xlane.f32.xlu0 %v2401_v35 }
0x18f2   :  { %v2403_v47 = vpop.xlane.xlu0 %2402 }
0x18f3   :  { %v2404_v14 = vmul.f32 %v2403_v47, %v3045_v10  ;;  %v2729_v10 = vld [vmem:[%s3841_s15] ss:$0 sm:$0xff]  ;;  %s2475_s15 = sshll.u32 %s2938_s14, 4  ;;  %s2476_s15 = int_to_ptr.vmem [resolvable:$true] %s2475_s15 }
0x18f5   :  { %v2405_v59 = vadd.f32 1e-06, %v2404_v14 }
0x18f7   :  { %2893 = vrsqrt.f32 %v2405_v59  ;;  %vm2412_vm8 = vweird.f32 %v2405_v59 }
0x18fd   :  { %v2894_v36 = vpop.eup %2893 }
0x18fe   :  { %v2407_v34 = vmul.f32 %v2894_v36, %v2405_v59  ;;  %vm2413_vm1 = vweird.f32 %v2894_v36 }
0x18ff   :  { %vm2414_vm9 = vmor %vm2412_vm8, %vm2413_vm1 }
0x1900   :  { %v2408_v13 = vmul.f32 %v2894_v36, %v2407_v34 }
0x1902   :  { %v2409_v31 = vmul.f32 0.5, %v2408_v13 }
0x1904   :  { %v2410_v33 = vsub.f32 1.5, %v2409_v31 }
0x1906   :  { %v2411_v15 = vmul.f32 %v2894_v36, %v2410_v33 }
0x1908   :  { %v2415_v38 = vsel %vm2414_vm9, %v2894_v36, %v2411_v15 }
0x1909   :  { %v2416_v39 = vmul.f32 %v2415_v38, %v2399_v28 }
0x190b   :  { %v2420_v29 = vmul.f32 %v2728_v12, %v2416_v39 }
0x190d   :  { %v2424_v3 = vadd.f32 %v2729_v10, %v2420_v29 }
0x190f   :  { %2674 = vmatmul.msk.f32.vlgmr.msrb.gmra.mxu3 %vm96_vm0, %v2424_v3 }
0x1992   :  { %v2453_v40 = vpop.f32.mrf.mxu3 }
0x1993   :  { %v2454_v9 = vadd.f32 %v2730_v56, %v2453_v40 }
0x1995   :  { %v2457_v60 = vsel %vm2456_vm10, %v2454_v9, -inf }
0x1996   :  { %2458 = vmax.xlane.f32.xlu2 %v2457_v60 }
0x1a09   :  { %v2459_v7 = vpop.xlane.xlu2 %2458 }
0x1a0a   :  { %v2460_v17 = vsub.f32 %v2454_v9, %v2459_v7 }
0x1a0c   :  { %v2461_v53 = vmul.f32 1.442695, %v2460_v17 }
0x1a0e   :  { %2895 = vpow2.f32 %v2461_v53 }
0x1a14   :  { %v2896_v46 = vpop.eup %2895 }
0x1a15   :  { %v2463_v51 = vsel %vm2456_vm10, %v2896_v46, 0.0 }
0x1a16   :  { %2464 = vadd.xlane.f32.xlu1 %v2463_v51 }
0x1a89   :  { %v2465_v45 = vpop.xlane.xlu1 %2464 }
0x1a8a   :  { %2897 = vlog2.f32 %v2465_v45 }
0x1a90   :  { %v2898_v42 = vpop.eup %2897 }
0x1a91   :  { %v2467_v57 = vmul.f32 0.6931472, %v2898_v42 }
0x1a93   :  { %v2468_v54 = vsub.f32 %v2460_v17, %v2467_v57 }
0x1a95   :  { %2469 = vst.msk [vmem:[#allocation2] sm:$0x3] %vm2456_vm10, %v2468_v54 }
0x1a96   :  { %2480 = dma.vmem_to_hbm [thread:$0]  %s2476_s15, 32, %s2478_s29, [#allocation3]  }
0x1a97   :  { %2924 = dma.done.wait [#allocation3], 32  }
0x1a98   :  { %2925 = vsyncadd [#allocation3], 4294967264 }
0x1a99   :  { %2485 = vsyncpa [#allocation3], 1 }

</bundles_post_ra>
